<compile_context>
chip_gen: v5e
topology: v5e:2x2
jax: 0.10.0
libtpu: 0.0.40
codegen_flags: <defaults>
</compile_context>

<pallas_src>
import jax
import jax.numpy as jnp
import numpy as np
from jax.experimental import pallas as pl
from jax.experimental.pallas import tpu as pltpu


# ----------------------------- Pallas kernels -------------------------------

def _pool_window_max(acc, n):
    """acc: [Cout, nwin*n] -> elementwise max over the nwin contiguous [Cout, n] lane slabs."""
    m = acc[:, :n]
    for w in range(1, acc.shape[1] // n):
        m = jnp.maximum(m, acc[:, w * n:(w + 1) * n])
    return m


def conv_pool_relu_kernel(p_ref, w_ref, b_ref, o_ref):
    # p_ref: [K, 4*N]  (pool-window-major lane slabs for this batch tile, N = Bt*PH*PW)
    # w_ref: [Cout, K]   b_ref: [Cout, 1]   o_ref: [Cout, N]
    # TODO(synk): bf16 matmul operands (f32 accumulate) would give ~3x MXU throughput on v6e/v7x
    # and halve the patch DMA, at the cost of a looser numerical tolerance; kept f32 here.
    acc = jnp.dot(w_ref[...], p_ref[...], preferred_element_type=jnp.float32)   # ONE MXU matmul
    m = _pool_window_max(acc, o_ref.shape[1])                                    # VPU slab maxes
    # bias (commutes with the max) + relu; b is (Cout, 1) so the add is a pure VPU lane-broadcast
    o_ref[...] = jnp.maximum(m + b_ref[...], 0.0).astype(o_ref.dtype)


def conv2_head_kernel(p_ref, w2_ref, b2_ref, fw1x_ref, fb1_ref, ob_ref,
                      fw2_ref, fb2_ref, o_ref):
    # p_ref:    [250, 4*NB]   conv2 im2col patches for this batch tile (NB = Bt*16 = 128 lanes)
    # w2_ref:   [20, 250]     b2_ref: [20, 1]
    # fw1x_ref: [20, 50, NB]  fc1 weights pre-tiled ONCE per batch tile: fw1x[c,j,b*16+p]=fc1.w[j,c*16+p]
    # fb1_ref:  [50, 1]
    # ob_ref:   [NB, Bt]      0/1 batch-block reducer: ob[n, b] = (n // 16 == b)
    # fw2_ref:  [10, 50]      fb2_ref: [10, 1]
    # o_ref:    [1, 10, Bt]   log-probs with classes on sublanes (regrouped to [B, 10] in the wrapper)
    nb = fw1x_ref.shape[2]
    acc = jnp.dot(w2_ref[...], p_ref[...], preferred_element_type=jnp.float32)   # ONE MXU matmul
    h2 = jnp.maximum(_pool_window_max(acc, nb) + b2_ref[...], 0.0)               # [20, NB]
    # TODO(synk): nn.Dropout2d / F.dropout are identity in eval mode; training-mode masks not implemented.

    # fc1 in the PyTorch flatten order (c*16+p) without reshaping/transposing h2:
    #   E[j, n] = sum_c fw1x[c, j, n] * h2[c, n]
    e = fw1x_ref[0] * h2[0:1, :]
    for c in range(1, fw1x_ref.shape[0]):
        e = e + fw1x_ref[c] * h2[c:c + 1, :]
    z1 = jnp.dot(e, ob_ref[...], preferred_element_type=jnp.float32) + fb1_ref[...]        # [50, Bt]
    a1 = jnp.maximum(z1, 0.0)
    logits = jnp.dot(fw2_ref[...], a1, preferred_element_type=jnp.float32) + fb2_ref[...]  # [10, Bt]
    mx = jnp.max(logits, axis=0, keepdims=True)
    lse = jnp.log(jnp.sum(jnp.exp(logits - mx), axis=0, keepdims=True)) + mx
    o_ref[0] = (logits - lse).astype(o_ref.dtype)                                # log_softmax over classes


# --------------------------- pallas_call wrappers ----------------------------

_VMEM_LIMIT = 32 * 1024 * 1024   # explicit scoped-VMEM budget (safe on v5e/v6e/v7x)


def conv_pool_relu(p, w, b, *, n):
    """p: [K, T*4*n] f32 (window-major lane slabs per batch tile), w: [Cout,K], b: [Cout,1] -> [Cout, T*n]."""
    K, ltot = p.shape
    Cout = w.shape[0]
    T = ltot // (4 * n)
    flops = 2 * Cout * K * ltot
    bytes_accessed = 4 * (p.size + w.size + b.size + Cout * T * n)
    return pl.pallas_call(
        conv_pool_relu_kernel,
        out_shape=jax.ShapeDtypeStruct((Cout, T * n), jnp.float32),
        grid_spec=pltpu.PrefetchScalarGridSpec(
            num_scalar_prefetch=0,
            grid=(T,),                                           # batch-tile grid -> pipelined DMA
            in_specs=[
                pl.BlockSpec((K, 4 * n), lambda i: (0, i)),
                pl.BlockSpec((Cout, K), lambda i: (0, 0)),
                pl.BlockSpec((Cout, 1), lambda i: (0, 0)),
            ],
            out_specs=pl.BlockSpec((Cout, n), lambda i: (0, i)),
        ),
        compiler_params=pltpu.CompilerParams(
            dimension_semantics=("parallel",),
            vmem_limit_bytes=_VMEM_LIMIT),
        cost_estimate=pl.CostEstimate(flops=flops, transcendentals=0,
                                      bytes_accessed=bytes_accessed),
    )(p, w, b)


def conv2_head(p2, w2, b2, fw1x, fb1, ob, fw2, fb2, *, bt):
    K, ltot = p2.shape
    Cout = w2.shape[0]
    H1 = fw1x.shape[1]
    C = fw2.shape[0]
    nb = bt * 16
    T = ltot // (4 * nb)
    flops = 2 * (Cout * K * ltot + Cout * H1 * nb * T + H1 * nb * bt * T + C * H1 * bt * T)
    bytes_accessed = 4 * (p2.size + w2.size + b2.size + fw1x.size + fb1.size
                          + ob.size + fw2.size + fb2.size + T * C * bt)
    return pl.pallas_call(
        conv2_head_kernel,
        out_shape=jax.ShapeDtypeStruct((T, C, bt), jnp.float32),
        grid_spec=pltpu.PrefetchScalarGridSpec(
            num_scalar_prefetch=0,
            grid=(T,),
            in_specs=[
                pl.BlockSpec((K, 4 * nb), lambda i: (0, i)),
                pl.BlockSpec((Cout, K), lambda i: (0, 0)),
                pl.BlockSpec((Cout, 1), lambda i: (0, 0)),
                pl.BlockSpec((Cout, H1, nb), lambda i: (0, 0, 0)),   # fixed-size, reused every step
                pl.BlockSpec((H1, 1), lambda i: (0, 0)),
                pl.BlockSpec((nb, bt), lambda i: (0, 0)),
                pl.BlockSpec((C, H1), lambda i: (0, 0)),
                pl.BlockSpec((C, 1), lambda i: (0, 0)),
            ],
            out_specs=pl.BlockSpec((1, C, bt), lambda i: (i, 0, 0)),
        ),
        compiler_params=pltpu.CompilerParams(
            dimension_semantics=("parallel",),
            vmem_limit_bytes=_VMEM_LIMIT),
        cost_estimate=pl.CostEstimate(flops=flops, transcendentals=(C + 2) * bt * T,
                                      bytes_accessed=bytes_accessed),
    )(p2, w2, b2, fw1x, fb1, ob, fw2, fb2)


# ------------------------------- JAX glue ------------------------------------

def im2col_pool2x2_tiled(x, bt, kh=5, kw=5):
    """x: [C, B, H, W] (channel-leading) -> patches [C*kh*kw, (B//bt) * 4 * (bt*PH*PW)].

    Row k = c*(kh*kw) + ih*kw + iw (channel-major, matches w.reshape(Cout, C*kh*kw)).
    Lane = ((tile*4 + window) * bt + b_local) * PH*PW + ph*PW + pw, i.e. each batch tile owns one
    contiguous [K, 4*bt*P] lane slab whose 4 pool-window sub-slabs are contiguous and 128-aligned,
    so the kernel does ONE matmul then a slab max.
    """
    C, B, H, W = x.shape
    assert B % bt == 0
    OH, OW = H - kh + 1, W - kw + 1
    PH, PW = OH // 2, OW // 2
    P = PH * PW
    T = B // bt
    K = C * kh * kw
    # TODO(synk): im2col stays as XLA strided-slice glue (25x/11x HBM expansion); building it
    # in-kernel from pl.ANY inputs needs strided lane gathers that do not lower cleanly.
    wins = []
    for dh in range(2):
        for dw in range(2):
            taps = []
            for ih in range(kh):
                for iw in range(kw):
                    t = x[:, :, dh + ih: dh + ih + 2 * PH: 2,
                             dw + iw: dw + iw + 2 * PW: 2]            # [C, B, PH, PW]
                    taps.append(t.reshape(C, 1, T, bt * P))
            wins.append(jnp.concatenate(taps, axis=1))                 # [C, kh*kw, T, bt*P]
    p = jnp.stack(wins, axis=3)                                        # [C, kh*kw, T, 4, bt*P]
    return p.reshape(K, T * 4 * bt * P)


def prepare_params(params, bt=8):
    """One-time prep: reshape weights and build the fixed-size (per-batch-tile) fc1 bridge operands."""
    w1, b1, w2, b2, fw1, fb1, fw2, fb2 = params
    # fw1x[c, j, b*16+p] = fc1.w[j, c*16+p] ; fixed [20, 50, bt*16], reused by every grid step.
    fw1x = jnp.tile(fw1.reshape(50, 20, 16).transpose(1, 0, 2), (1, 1, bt))
    # ob[n, b] = (n // 16 == b): reduces the 16 flat lanes of each batch back to one column.
    ob = jnp.repeat(jnp.eye(bt, dtype=jnp.float32), 16, axis=0)
    return (w1.reshape(10, 25), b1.reshape(10, 1),
            w2.reshape(20, 250), b2.reshape(20, 1),
            fw1x, fb1.reshape(50, 1), ob, fw2, fb2.reshape(10, 1))


def net_forward(x, prep):
    w1, b1, w2, b2, fw1x, fb1, ob, fw2, fb2 = prep
    bt = ob.shape[1]
    B = x.shape[0]
    T = -(-B // bt)
    Bpad = T * bt
    if Bpad != B:
        x = jnp.pad(x, ((0, Bpad - B), (0, 0), (0, 0), (0, 0)))
    # Stage A: conv1 (1->10, k=5) + maxpool2 + relu; batch-tiled grid, one fused matmul per tile.
    p1 = im2col_pool2x2_tiled(jnp.transpose(x, (1, 0, 2, 3)), bt)      # [25, T*4*(bt*144)]
    h1 = conv_pool_relu(p1, w1, b1, n=bt * 144)                        # [10, Bpad*144]
    # Stage B: conv2 + (Dropout2d: identity) + maxpool2 + relu + flatten + fc1 + relu + fc2 +
    # log_softmax, fused in one pallas_call.  No transpose between stages: stage-B im2col works on
    # the channel-leading [10, Bpad, 12, 12] reshape of h1 directly.
    p2 = im2col_pool2x2_tiled(h1.reshape(10, Bpad, 12, 12), bt)        # [250, T*4*(bt*16)]
    out = conv2_head(p2, w2, b2, fw1x, fb1, ob, fw2, fb2, bt=bt)       # [T, 10, bt]
    out = jnp.transpose(out, (0, 2, 1)).reshape(Bpad, 10)
    return out[:B]                                                     # [B, 10]


def init_params(key):
    ks = jax.random.split(key, 8)

    def u(k, shape, fan_in):
        bound = 1.0 / np.sqrt(fan_in)
        return jax.random.uniform(k, shape, jnp.float32, -bound, bound)

    w1 = u(ks[0], (10, 1, 5, 5), 25);    b1 = u(ks[1], (10,), 25)
    w2 = u(ks[2], (20, 10, 5, 5), 250);  b2 = u(ks[3], (20,), 250)
    fw1 = u(ks[4], (50, 320), 320);      fb1 = u(ks[5], (50,), 320)
    fw2 = u(ks[6], (10, 50), 50);        fb2 = u(ks[7], (10,), 50)
    return (w1, b1, w2, b2, fw1, fb1, fw2, fb2)


def reference_forward(x, params):
    """Pure-JAX reference matching the PyTorch forward (eval mode)."""
    w1, b1, w2, b2, fw1, fb1, fw2, fb2 = params
    hp = jax.lax.Precision.HIGHEST

    def conv(z, w, b):
        y = jax.lax.conv_general_dilated(
            z, w, (1, 1), 'VALID',
            dimension_numbers=('NCHW', 'OIHW', 'NCHW'), precision=hp)
        return y + b[None, :, None, None]

    def maxpool2(z):
        B, C, H, W = z.shape
        return jnp.max(z.reshape(B, C, H // 2, 2, W // 2, 2), axis=(3, 5))

    h = jax.nn.relu(maxpool2(conv(x, w1, b1)))
    h = jax.nn.relu(maxpool2(conv(h, w2, b2)))
    h = h.reshape(x.shape[0], 320)
    h = jax.nn.relu(jnp.dot(h, fw1.T, precision=hp) + fb1)
    logits = jnp.dot(h, fw2.T, precision=hp) + fb2
    return jax.nn.log_softmax(logits, axis=1)


if __name__ == "__main__":
    key = jax.random.PRNGKey(0)
    kx, kp = jax.random.split(key)
    # Spatial size must be 28x28 with 1 channel so the flattened feature dim is 320.
    # B=12 is deliberately not a multiple of the batch tile (8): exercises padding + a 2-step grid.
    x = jax.random.normal(kx, (12, 1, 28, 28), jnp.float32)
    params = init_params(kp)
    prep = prepare_params(params, bt=8)        # fc1 bridge built once, outside the forward pass

    fwd = jax.jit(net_forward)
    out = jax.block_until_ready(fwd(x, prep))

    ref = reference_forward(x, params)
    assert out.shape == (12, 10), out.shape
    err = np.max(np.abs(np.asarray(out) - np.asarray(ref)))
    assert np.allclose(np.asarray(out), np.asarray(ref), atol=2e-3, rtol=2e-3), err

    print("KERNEL_OK")
</pallas_src>

<mosaic_0001>
module attributes {stable_mosaic.version = 11 : i64} {
  func.func @conv_pool_relu_kernel(%arg0: i32, %arg1: memref<25x4608xf32, #tpu.memory_space<vmem>>, %arg2: memref<10x25xf32, #tpu.memory_space<vmem>>, %arg3: memref<10x1xf32, #tpu.memory_space<vmem>>, %arg4: memref<10x1152xf32, #tpu.memory_space<vmem>>) attributes {dimension_semantics = [#tpu.dimension_semantics<parallel>], iteration_bounds = array<i64: 2>, scalar_prefetch = 0 : i64, scratch_operands = 0 : i64, tpu.core_type = #tpu.core_type<tc>, window_params = [{transform_indices = @transform_0, window_bounds = array<i64: 25, 4608>}, {pipeline_mode = #tpu.pipeline_mode<synchronous>, transform_indices = @transform_1, window_bounds = array<i64: 10, 25>}, {pipeline_mode = #tpu.pipeline_mode<synchronous>, transform_indices = @transform_2, window_bounds = array<i64: 10, 1>}, {transform_indices = @transform_3, window_bounds = array<i64: 10, 1152>}]} {
    %c0 = arith.constant 0 : index
    %c0_0 = arith.constant 0 : index
    %0 = vector.load %arg2[%c0, %c0_0] : memref<10x25xf32, #tpu.memory_space<vmem>>, vector<10x25xf32>
    %c0_1 = arith.constant 0 : index
    %c0_2 = arith.constant 0 : index
    %1 = vector.load %arg1[%c0_1, %c0_2] : memref<25x4608xf32, #tpu.memory_space<vmem>>, vector<25x4608xf32>
    %cst = arith.constant dense<0.000000e+00> : vector<10x4608xf32>
    %2 = tpu.matmul %0, %1, %cst {dimension_numbers = #tpu.dot_dimension_numbers<[1], [0], [0], [1], [0, 0, 1, 1], [], []>} : vector<10x25xf32>, vector<25x4608xf32>, vector<10x4608xf32> -> vector<10x4608xf32>
    %3 = vector.extract_strided_slice %2 {offsets = [0, 0], sizes = [10, 1152], strides = [1, 1]} : vector<10x4608xf32> to vector<10x1152xf32>
    %4 = vector.extract_strided_slice %2 {offsets = [0, 1152], sizes = [10, 1152], strides = [1, 1]} : vector<10x4608xf32> to vector<10x1152xf32>
    %5 = arith.maximumf %3, %4 : vector<10x1152xf32>
    %6 = vector.extract_strided_slice %2 {offsets = [0, 2304], sizes = [10, 1152], strides = [1, 1]} : vector<10x4608xf32> to vector<10x1152xf32>
    %7 = arith.maximumf %5, %6 : vector<10x1152xf32>
    %8 = vector.extract_strided_slice %2 {offsets = [0, 3456], sizes = [10, 1152], strides = [1, 1]} : vector<10x4608xf32> to vector<10x1152xf32>
    %9 = arith.maximumf %7, %8 : vector<10x1152xf32>
    %c0_3 = arith.constant 0 : index
    %c0_4 = arith.constant 0 : index
    %10 = vector.load %arg3[%c0_3, %c0_4] : memref<10x1xf32, #tpu.memory_space<vmem>>, vector<10x1xf32>
    %11 = vector.broadcast %10 : vector<10x1xf32> to vector<10x1152xf32>
    %12 = arith.addf %9, %11 : vector<10x1152xf32>
    %cst_5 = arith.constant 0.000000e+00 : f32
    %13 = vector.broadcast %cst_5 : f32 to vector<10x1152xf32>
    %14 = arith.maximumf %12, %13 : vector<10x1152xf32>
    %c0_6 = arith.constant 0 : index
    %c0_7 = arith.constant 0 : index
    %15 = vector.load %arg4[%c0_6, %c0_7] : memref<10x1152xf32, #tpu.memory_space<vmem>>, vector<10x1152xf32>
    tpu.vector_store %arg4[%c0_6, %c0_7], %14 {strides = array<i32>} : memref<10x1152xf32, #tpu.memory_space<vmem>>, vector<10x1152xf32>,
    return
  }
  func.func @transform_0(%arg0: i32) -> (i32, i32) {
    %c0_i32 = arith.constant 0 : i32
    %c0_i32_0 = arith.constant 0 : i32
    return %c0_i32, %arg0 : i32, i32
  }
  func.func @transform_1(%arg0: i32) -> (i32, i32) {
    %c0_i32 = arith.constant 0 : i32
    %c0_i32_0 = arith.constant 0 : i32
    %c0_i32_1 = arith.constant 0 : i32
    return %c0_i32, %c0_i32_0 : i32, i32
  }
  func.func @transform_2(%arg0: i32) -> (i32, i32) {
    %c0_i32 = arith.constant 0 : i32
    %c0_i32_0 = arith.constant 0 : i32
    %c0_i32_1 = arith.constant 0 : i32
    return %c0_i32, %c0_i32_0 : i32, i32
  }
  func.func @transform_3(%arg0: i32) -> (i32, i32) {
    %c0_i32 = arith.constant 0 : i32
    %c0_i32_0 = arith.constant 0 : i32
    return %c0_i32, %arg0 : i32, i32
  }
}

module attributes {stable_mosaic.version = 11 : i64} {
  func.func @conv2_head_kernel(%arg0: i32, %arg1: memref<250x512xf32, #tpu.memory_space<vmem>>, %arg2: memref<20x250xf32, #tpu.memory_space<vmem>>, %arg3: memref<20x1xf32, #tpu.memory_space<vmem>>, %arg4: memref<20x50x128xf32, #tpu.memory_space<vmem>>, %arg5: memref<50x1xf32, #tpu.memory_space<vmem>>, %arg6: memref<128x8xf32, #tpu.memory_space<vmem>>, %arg7: memref<10x50xf32, #tpu.memory_space<vmem>>, %arg8: memref<10x1xf32, #tpu.memory_space<vmem>>, %arg9: memref<1x10x8xf32, #tpu.memory_space<vmem>>) attributes {dimension_semantics = [#tpu.dimension_semantics<parallel>], iteration_bounds = array<i64: 2>, scalar_prefetch = 0 : i64, scratch_operands = 0 : i64, tpu.core_type = #tpu.core_type<tc>, window_params = [{transform_indices = @transform_0, window_bounds = array<i64: 250, 512>}, {pipeline_mode = #tpu.pipeline_mode<synchronous>, transform_indices = @transform_1, window_bounds = array<i64: 20, 250>}, {pipeline_mode = #tpu.pipeline_mode<synchronous>, transform_indices = @transform_2, window_bounds = array<i64: 20, 1>}, {pipeline_mode = #tpu.pipeline_mode<synchronous>, transform_indices = @transform_3, window_bounds = array<i64: 20, 50, 128>}, {pipeline_mode = #tpu.pipeline_mode<synchronous>, transform_indices = @transform_4, window_bounds = array<i64: 50, 1>}, {pipeline_mode = #tpu.pipeline_mode<synchronous>, transform_indices = @transform_5, window_bounds = array<i64: 128, 8>}, {pipeline_mode = #tpu.pipeline_mode<synchronous>, transform_indices = @transform_6, window_bounds = array<i64: 10, 50>}, {pipeline_mode = #tpu.pipeline_mode<synchronous>, transform_indices = @transform_7, window_bounds = array<i64: 10, 1>}, {transform_indices = @transform_8, window_bounds = array<i64: 1, 10, 8>}]} {
    %c0 = arith.constant 0 : index
    %c0_0 = arith.constant 0 : index
    %0 = vector.load %arg2[%c0, %c0_0] : memref<20x250xf32, #tpu.memory_space<vmem>>, vector<20x250xf32>
    %c0_1 = arith.constant 0 : index
    %c0_2 = arith.constant 0 : index
    %1 = vector.load %arg1[%c0_1, %c0_2] : memref<250x512xf32, #tpu.memory_space<vmem>>, vector<250x512xf32>
    %cst = arith.constant dense<0.000000e+00> : vector<20x512xf32>
    %2 = tpu.matmul %0, %1, %cst {dimension_numbers = #tpu.dot_dimension_numbers<[1], [0], [0], [1], [0, 0, 1, 1], [], []>} : vector<20x250xf32>, vector<250x512xf32>, vector<20x512xf32> -> vector<20x512xf32>
    %3 = vector.extract_strided_slice %2 {offsets = [0, 0], sizes = [20, 128], strides = [1, 1]} : vector<20x512xf32> to vector<20x128xf32>
    %4 = vector.extract_strided_slice %2 {offsets = [0, 128], sizes = [20, 128], strides = [1, 1]} : vector<20x512xf32> to vector<20x128xf32>
    %5 = arith.maximumf %3, %4 : vector<20x128xf32>
    %6 = vector.extract_strided_slice %2 {offsets = [0, 256], sizes = [20, 128], strides = [1, 1]} : vector<20x512xf32> to vector<20x128xf32>
    %7 = arith.maximumf %5, %6 : vector<20x128xf32>
    %8 = vector.extract_strided_slice %2 {offsets = [0, 384], sizes = [20, 128], strides = [1, 1]} : vector<20x512xf32> to vector<20x128xf32>
    %9 = arith.maximumf %7, %8 : vector<20x128xf32>
    %c0_3 = arith.constant 0 : index
    %c0_4 = arith.constant 0 : index
    %10 = vector.load %arg3[%c0_3, %c0_4] : memref<20x1xf32, #tpu.memory_space<vmem>>, vector<20x1xf32>
    %11 = vector.broadcast %10 : vector<20x1xf32> to vector<20x128xf32>
    %12 = arith.addf %9, %11 : vector<20x128xf32>
    %cst_5 = arith.constant 0.000000e+00 : f32
    %13 = vector.broadcast %cst_5 : f32 to vector<20x128xf32>
    %14 = arith.maximumf %12, %13 : vector<20x128xf32>
    %c0_6 = arith.constant 0 : index
    %c0_7 = arith.constant 0 : index
    %c0_8 = arith.constant 0 : index
    %15 = vector.load %arg4[%c0_6, %c0_7, %c0_8] : memref<20x50x128xf32, #tpu.memory_space<vmem>>, vector<1x50x128xf32>
    %16 = vector.shape_cast %15 : vector<1x50x128xf32> to vector<50x128xf32>
    %17 = vector.extract_strided_slice %14 {offsets = [0, 0], sizes = [1, 128], strides = [1, 1]} : vector<20x128xf32> to vector<1x128xf32>
    %18 = vector.broadcast %17 : vector<1x128xf32> to vector<50x128xf32>
    %19 = arith.mulf %16, %18 : vector<50x128xf32>
    %c1 = arith.constant 1 : index
    %c0_9 = arith.constant 0 : index
    %c0_10 = arith.constant 0 : index
    %20 = vector.load %arg4[%c1, %c0_9, %c0_10] : memref<20x50x128xf32, #tpu.memory_space<vmem>>, vector<1x50x128xf32>
    %21 = vector.shape_cast %20 : vector<1x50x128xf32> to vector<50x128xf32>
    %22 = vector.extract_strided_slice %14 {offsets = [1, 0], sizes = [1, 128], strides = [1, 1]} : vector<20x128xf32> to vector<1x128xf32>
    %23 = vector.broadcast %22 : vector<1x128xf32> to vector<50x128xf32>
    %24 = arith.mulf %21, %23 : vector<50x128xf32>
    %25 = arith.addf %19, %24 : vector<50x128xf32>
    %c2 = arith.constant 2 : index
    %c0_11 = arith.constant 0 : index
    %c0_12 = arith.constant 0 : index
    %26 = vector.load %arg4[%c2, %c0_11, %c0_12] : memref<20x50x128xf32, #tpu.memory_space<vmem>>, vector<1x50x128xf32>
    %27 = vector.shape_cast %26 : vector<1x50x128xf32> to vector<50x128xf32>
    %28 = vector.extract_strided_slice %14 {offsets = [2, 0], sizes = [1, 128], strides = [1, 1]} : vector<20x128xf32> to vector<1x128xf32>
    %29 = vector.broadcast %28 : vector<1x128xf32> to vector<50x128xf32>
    %30 = arith.mulf %27, %29 : vector<50x128xf32>
    %31 = arith.addf %25, %30 : vector<50x128xf32>
    %c3 = arith.constant 3 : index
    %c0_13 = arith.constant 0 : index
    %c0_14 = arith.constant 0 : index
    %32 = vector.load %arg4[%c3, %c0_13, %c0_14] : memref<20x50x128xf32, #tpu.memory_space<vmem>>, vector<1x50x128xf32>
    %33 = vector.shape_cast %32 : vector<1x50x128xf32> to vector<50x128xf32>
    %34 = vector.extract_strided_slice %14 {offsets = [3, 0], sizes = [1, 128], strides = [1, 1]} : vector<20x128xf32> to vector<1x128xf32>
    %35 = vector.broadcast %34 : vector<1x128xf32> to vector<50x128xf32>
    %36 = arith.mulf %33, %35 : vector<50x128xf32>
    %37 = arith.addf %31, %36 : vector<50x128xf32>
    %c4 = arith.constant 4 : index
    %c0_15 = arith.constant 0 : index
    %c0_16 = arith.constant 0 : index
    %38 = vector.load %arg4[%c4, %c0_15, %c0_16] : memref<20x50x128xf32, #tpu.memory_space<vmem>>, vector<1x50x128xf32>
    %39 = vector.shape_cast %38 : vector<1x50x128xf32> to vector<50x128xf32>
    %40 = vector.extract_strided_slice %14 {offsets = [4, 0], sizes = [1, 128], strides = [1, 1]} : vector<20x128xf32> to vector<1x128xf32>
    %41 = vector.broadcast %40 : vector<1x128xf32> to vector<50x128xf32>
    %42 = arith.mulf %39, %41 : vector<50x128xf32>
    %43 = arith.addf %37, %42 : vector<50x128xf32>
    %c5 = arith.constant 5 : index
    %c0_17 = arith.constant 0 : index
    %c0_18 = arith.constant 0 : index
    %44 = vector.load %arg4[%c5, %c0_17, %c0_18] : memref<20x50x128xf32, #tpu.memory_space<vmem>>, vector<1x50x128xf32>
    %45 = vector.shape_cast %44 : vector<1x50x128xf32> to vector<50x128xf32>
    %46 = vector.extract_strided_slice %14 {offsets = [5, 0], sizes = [1, 128], strides = [1, 1]} : vector<20x128xf32> to vector<1x128xf32>
    %47 = vector.broadcast %46 : vector<1x128xf32> to vector<50x128xf32>
    %48 = arith.mulf %45, %47 : vector<50x128xf32>
    %49 = arith.addf %43, %48 : vector<50x128xf32>
    %c6 = arith.constant 6 : index
    %c0_19 = arith.constant 0 : index
    %c0_20 = arith.constant 0 : index
    %50 = vector.load %arg4[%c6, %c0_19, %c0_20] : memref<20x50x128xf32, #tpu.memory_space<vmem>>, vector<1x50x128xf32>
    %51 = vector.shape_cast %50 : vector<1x50x128xf32> to vector<50x128xf32>
    %52 = vector.extract_strided_slice %14 {offsets = [6, 0], sizes = [1, 128], strides = [1, 1]} : vector<20x128xf32> to vector<1x128xf32>
    %53 = vector.broadcast %52 : vector<1x128xf32> to vector<50x128xf32>
    %54 = arith.mulf %51, %53 : vector<50x128xf32>
    %55 = arith.addf %49, %54 : vector<50x128xf32>
    %c7 = arith.constant 7 : index
    %c0_21 = arith.constant 0 : index
    %c0_22 = arith.constant 0 : index
    %56 = vector.load %arg4[%c7, %c0_21, %c0_22] : memref<20x50x128xf32, #tpu.memory_space<vmem>>, vector<1x50x128xf32>
    %57 = vector.shape_cast %56 : vector<1x50x128xf32> to vector<50x128xf32>
    %58 = vector.extract_strided_slice %14 {offsets = [7, 0], sizes = [1, 128], strides = [1, 1]} : vector<20x128xf32> to vector<1x128xf32>
    %59 = vector.broadcast %58 : vector<1x128xf32> to vector<50x128xf32>
    %60 = arith.mulf %57, %59 : vector<50x128xf32>
    %61 = arith.addf %55, %60 : vector<50x128xf32>
    %c8 = arith.constant 8 : index
    %c0_23 = arith.constant 0 : index
    %c0_24 = arith.constant 0 : index
    %62 = vector.load %arg4[%c8, %c0_23, %c0_24] : memref<20x50x128xf32, #tpu.memory_space<vmem>>, vector<1x50x128xf32>
    %63 = vector.shape_cast %62 : vector<1x50x128xf32> to vector<50x128xf32>
    %64 = vector.extract_strided_slice %14 {offsets = [8, 0], sizes = [1, 128], strides = [1, 1]} : vector<20x128xf32> to vector<1x128xf32>
    %65 = vector.broadcast %64 : vector<1x128xf32> to vector<50x128xf32>
    %66 = arith.mulf %63, %65 : vector<50x128xf32>
    %67 = arith.addf %61, %66 : vector<50x128xf32>
    %c9 = arith.constant 9 : index
    %c0_25 = arith.constant 0 : index
    %c0_26 = arith.constant 0 : index
    %68 = vector.load %arg4[%c9, %c0_25, %c0_26] : memref<20x50x128xf32, #tpu.memory_space<vmem>>, vector<1x50x128xf32>
    %69 = vector.shape_cast %68 : vector<1x50x128xf32> to vector<50x128xf32>
    %70 = vector.extract_strided_slice %14 {offsets = [9, 0], sizes = [1, 128], strides = [1, 1]} : vector<20x128xf32> to vector<1x128xf32>
    %71 = vector.broadcast %70 : vector<1x128xf32> to vector<50x128xf32>
    %72 = arith.mulf %69, %71 : vector<50x128xf32>
    %73 = arith.addf %67, %72 : vector<50x128xf32>
    %c10 = arith.constant 10 : index
    %c0_27 = arith.constant 0 : index
    %c0_28 = arith.constant 0 : index
    %74 = vector.load %arg4[%c10, %c0_27, %c0_28] : memref<20x50x128xf32, #tpu.memory_space<vmem>>, vector<1x50x128xf32>
    %75 = vector.shape_cast %74 : vector<1x50x128xf32> to vector<50x128xf32>
    %76 = vector.extract_strided_slice %14 {offsets = [10, 0], sizes = [1, 128], strides = [1, 1]} : vector<20x128xf32> to vector<1x128xf32>
    %77 = vector.broadcast %76 : vector<1x128xf32> to vector<50x128xf32>
    %78 = arith.mulf %75, %77 : vector<50x128xf32>
    %79 = arith.addf %73, %78 : vector<50x128xf32>
    %c11 = arith.constant 11 : index
    %c0_29 = arith.constant 0 : index
    %c0_30 = arith.constant 0 : index
    %80 = vector.load %arg4[%c11, %c0_29, %c0_30] : memref<20x50x128xf32, #tpu.memory_space<vmem>>, vector<1x50x128xf32>
    %81 = vector.shape_cast %80 : vector<1x50x128xf32> to vector<50x128xf32>
    %82 = vector.extract_strided_slice %14 {offsets = [11, 0], sizes = [1, 128], strides = [1, 1]} : vector<20x128xf32> to vector<1x128xf32>
    %83 = vector.broadcast %82 : vector<1x128xf32> to vector<50x128xf32>
    %84 = arith.mulf %81, %83 : vector<50x128xf32>
    %85 = arith.addf %79, %84 : vector<50x128xf32>
    %c12 = arith.constant 12 : index
    %c0_31 = arith.constant 0 : index
    %c0_32 = arith.constant 0 : index
    %86 = vector.load %arg4[%c12, %c0_31, %c0_32] : memref<20x50x128xf32, #tpu.memory_space<vmem>>, vector<1x50x128xf32>
    %87 = vector.shape_cast %86 : vector<1x50x128xf32> to vector<50x128xf32>
    %88 = vector.extract_strided_slice %14 {offsets = [12, 0], sizes = [1, 128], strides = [1, 1]} : vector<20x128xf32> to vector<1x128xf32>
    %89 = vector.broadcast %88 : vector<1x128xf32> to vector<50x128xf32>
    %90 = arith.mulf %87, %89 : vector<50x128xf32>
    %91 = arith.addf %85, %90 : vector<50x128xf32>
    %c13 = arith.constant 13 : index
    %c0_33 = arith.constant 0 : index
    %c0_34 = arith.constant 0 : index
    %92 = vector.load %arg4[%c13, %c0_33, %c0_34] : memref<20x50x128xf32, #tpu.memory_space<vmem>>, vector<1x50x128xf32>
    %93 = vector.shape_cast %92 : vector<1x50x128xf32> to vector<50x128xf32>
    %94 = vector.extract_strided_slice %14 {offsets = [13, 0], sizes = [1, 128], strides = [1, 1]} : vector<20x128xf32> to vector<1x128xf32>
    %95 = vector.broadcast %94 : vector<1x128xf32> to vector<50x128xf32>
    %96 = arith.mulf %93, %95 : vector<50x128xf32>
    %97 = arith.addf %91, %96 : vector<50x128xf32>
    %c14 = arith.constant 14 : index
    %c0_35 = arith.constant 0 : index
    %c0_36 = arith.constant 0 : index
    %98 = vector.load %arg4[%c14, %c0_35, %c0_36] : memref<20x50x128xf32, #tpu.memory_space<vmem>>, vector<1x50x128xf32>
    %99 = vector.shape_cast %98 : vector<1x50x128xf32> to vector<50x128xf32>
    %100 = vector.extract_strided_slice %14 {offsets = [14, 0], sizes = [1, 128], strides = [1, 1]} : vector<20x128xf32> to vector<1x128xf32>
    %101 = vector.broadcast %100 : vector<1x128xf32> to vector<50x128xf32>
    %102 = arith.mulf %99, %101 : vector<50x128xf32>
    %103 = arith.addf %97, %102 : vector<50x128xf32>
    %c15 = arith.constant 15 : index
    %c0_37 = arith.constant 0 : index
    %c0_38 = arith.constant 0 : index
    %104 = vector.load %arg4[%c15, %c0_37, %c0_38] : memref<20x50x128xf32, #tpu.memory_space<vmem>>, vector<1x50x128xf32>
    %105 = vector.shape_cast %104 : vector<1x50x128xf32> to vector<50x128xf32>
    %106 = vector.extract_strided_slice %14 {offsets = [15, 0], sizes = [1, 128], strides = [1, 1]} : vector<20x128xf32> to vector<1x128xf32>
    %107 = vector.broadcast %106 : vector<1x128xf32> to vector<50x128xf32>
    %108 = arith.mulf %105, %107 : vector<50x128xf32>
    %109 = arith.addf %103, %108 : vector<50x128xf32>
    %c16 = arith.constant 16 : index
    %c0_39 = arith.constant 0 : index
    %c0_40 = arith.constant 0 : index
    %110 = vector.load %arg4[%c16, %c0_39, %c0_40] : memref<20x50x128xf32, #tpu.memory_space<vmem>>, vector<1x50x128xf32>
    %111 = vector.shape_cast %110 : vector<1x50x128xf32> to vector<50x128xf32>
    %112 = vector.extract_strided_slice %14 {offsets = [16, 0], sizes = [1, 128], strides = [1, 1]} : vector<20x128xf32> to vector<1x128xf32>
    %113 = vector.broadcast %112 : vector<1x128xf32> to vector<50x128xf32>
    %114 = arith.mulf %111, %113 : vector<50x128xf32>
    %115 = arith.addf %109, %114 : vector<50x128xf32>
    %c17 = arith.constant 17 : index
    %c0_41 = arith.constant 0 : index
    %c0_42 = arith.constant 0 : index
    %116 = vector.load %arg4[%c17, %c0_41, %c0_42] : memref<20x50x128xf32, #tpu.memory_space<vmem>>, vector<1x50x128xf32>
    %117 = vector.shape_cast %116 : vector<1x50x128xf32> to vector<50x128xf32>
    %118 = vector.extract_strided_slice %14 {offsets = [17, 0], sizes = [1, 128], strides = [1, 1]} : vector<20x128xf32> to vector<1x128xf32>
    %119 = vector.broadcast %118 : vector<1x128xf32> to vector<50x128xf32>
    %120 = arith.mulf %117, %119 : vector<50x128xf32>
    %121 = arith.addf %115, %120 : vector<50x128xf32>
    %c18 = arith.constant 18 : index
    %c0_43 = arith.constant 0 : index
    %c0_44 = arith.constant 0 : index
    %122 = vector.load %arg4[%c18, %c0_43, %c0_44] : memref<20x50x128xf32, #tpu.memory_space<vmem>>, vector<1x50x128xf32>
    %123 = vector.shape_cast %122 : vector<1x50x128xf32> to vector<50x128xf32>
    %124 = vector.extract_strided_slice %14 {offsets = [18, 0], sizes = [1, 128], strides = [1, 1]} : vector<20x128xf32> to vector<1x128xf32>
    %125 = vector.broadcast %124 : vector<1x128xf32> to vector<50x128xf32>
    %126 = arith.mulf %123, %125 : vector<50x128xf32>
    %127 = arith.addf %121, %126 : vector<50x128xf32>
    %c19 = arith.constant 19 : index
    %c0_45 = arith.constant 0 : index
    %c0_46 = arith.constant 0 : index
    %128 = vector.load %arg4[%c19, %c0_45, %c0_46] : memref<20x50x128xf32, #tpu.memory_space<vmem>>, vector<1x50x128xf32>
    %129 = vector.shape_cast %128 : vector<1x50x128xf32> to vector<50x128xf32>
    %130 = vector.extract_strided_slice %14 {offsets = [19, 0], sizes = [1, 128], strides = [1, 1]} : vector<20x128xf32> to vector<1x128xf32>
    %131 = vector.broadcast %130 : vector<1x128xf32> to vector<50x128xf32>
    %132 = arith.mulf %129, %131 : vector<50x128xf32>
    %133 = arith.addf %127, %132 : vector<50x128xf32>
    %c0_47 = arith.constant 0 : index
    %c0_48 = arith.constant 0 : index
    %134 = vector.load %arg6[%c0_47, %c0_48] : memref<128x8xf32, #tpu.memory_space<vmem>>, vector<128x8xf32>
    %cst_49 = arith.constant dense<0.000000e+00> : vector<50x8xf32>
    %135 = tpu.matmul %133, %134, %cst_49 {dimension_numbers = #tpu.dot_dimension_numbers<[1], [0], [0], [1], [0, 0, 1, 1], [], []>} : vector<50x128xf32>, vector<128x8xf32>, vector<50x8xf32> -> vector<50x8xf32>
    %c0_50 = arith.constant 0 : index
    %c0_51 = arith.constant 0 : index
    %136 = vector.load %arg5[%c0_50, %c0_51] : memref<50x1xf32, #tpu.memory_space<vmem>>, vector<50x1xf32>
    %137 = vector.broadcast %136 : vector<50x1xf32> to vector<50x8xf32>
    %138 = arith.addf %135, %137 : vector<50x8xf32>
    %cst_52 = arith.constant 0.000000e+00 : f32
    %139 = vector.broadcast %cst_52 : f32 to vector<50x8xf32>
    %140 = arith.maximumf %138, %139 : vector<50x8xf32>
    %c0_53 = arith.constant 0 : index
    %c0_54 = arith.constant 0 : index
    %141 = vector.load %arg7[%c0_53, %c0_54] : memref<10x50xf32, #tpu.memory_space<vmem>>, vector<10x50xf32>
    %cst_55 = arith.constant dense<0.000000e+00> : vector<10x8xf32>
    %142 = tpu.matmul %141, %140, %cst_55 {dimension_numbers = #tpu.dot_dimension_numbers<[1], [0], [0], [1], [0, 0, 1, 1], [], []>} : vector<10x50xf32>, vector<50x8xf32>, vector<10x8xf32> -> vector<10x8xf32>
    %c0_56 = arith.constant 0 : index
    %c0_57 = arith.constant 0 : index
    %143 = vector.load %arg8[%c0_56, %c0_57] : memref<10x1xf32, #tpu.memory_space<vmem>>, vector<10x1xf32>
    %144 = vector.broadcast %143 : vector<10x1xf32> to vector<10x8xf32>
    %145 = arith.addf %142, %144 : vector<10x8xf32>
    %cst_58 = arith.constant dense<0xFF800000> : vector<8xf32>
    %146 = vector.multi_reduction <maximumf>, %145, %cst_58 [0] : vector<10x8xf32> to vector<8xf32>
    %147 = vector.shape_cast %146 : vector<8xf32> to vector<1x8xf32>
    %148 = vector.broadcast %147 : vector<1x8xf32> to vector<10x8xf32>
    %149 = arith.subf %145, %148 : vector<10x8xf32>
    %150 = math.exp %149 : vector<10x8xf32>
    %cst_59 = arith.constant dense<0.000000e+00> : vector<8xf32>
    %151 = vector.multi_reduction <add>, %150, %cst_59 [0] : vector<10x8xf32> to vector<8xf32>
    %152 = vector.shape_cast %151 : vector<8xf32> to vector<1x8xf32>
    %153 = math.log %152 : vector<1x8xf32>
    %154 = arith.addf %153, %147 : vector<1x8xf32>
    %155 = vector.broadcast %154 : vector<1x8xf32> to vector<10x8xf32>
    %156 = arith.subf %145, %155 : vector<10x8xf32>
    %c0_60 = arith.constant 0 : index
    %c0_61 = arith.constant 0 : index
    %c0_62 = arith.constant 0 : index
    %157 = vector.load %arg9[%c0_60, %c0_61, %c0_62] : memref<1x10x8xf32, #tpu.memory_space<vmem>>, vector<1x10x8xf32>
    %158 = vector.shape_cast %157 : vector<1x10x8xf32> to vector<10x8xf32>
    %159 = vector.shape_cast %156 : vector<10x8xf32> to vector<1x10x8xf32>
    tpu.vector_store %arg9[%c0_60, %c0_61, %c0_62], %159 {strides = array<i32>} : memref<1x10x8xf32, #tpu.memory_space<vmem>>, vector<1x10x8xf32>,
    return
  }
  func.func @transform_0(%arg0: i32) -> (i32, i32) {
    %c0_i32 = arith.constant 0 : i32
    %c0_i32_0 = arith.constant 0 : i32
    return %c0_i32, %arg0 : i32, i32
  }
  func.func @transform_1(%arg0: i32) -> (i32, i32) {
    %c0_i32 = arith.constant 0 : i32
    %c0_i32_0 = arith.constant 0 : i32
    %c0_i32_1 = arith.constant 0 : i32
    return %c0_i32, %c0_i32_0 : i32, i32
  }
  func.func @transform_2(%arg0: i32) -> (i32, i32) {
    %c0_i32 = arith.constant 0 : i32
    %c0_i32_0 = arith.constant 0 : i32
    %c0_i32_1 = arith.constant 0 : i32
    return %c0_i32, %c0_i32_0 : i32, i32
  }
  func.func @transform_3(%arg0: i32) -> (i32, i32, i32) {
    %c0_i32 = arith.constant 0 : i32
    %c0_i32_0 = arith.constant 0 : i32
    %c0_i32_1 = arith.constant 0 : i32
    %c0_i32_2 = arith.constant 0 : i32
    return %c0_i32, %c0_i32_0, %c0_i32_1 : i32, i32, i32
  }
  func.func @transform_4(%arg0: i32) -> (i32, i32) {
    %c0_i32 = arith.constant 0 : i32
    %c0_i32_0 = arith.constant 0 : i32
    %c0_i32_1 = arith.constant 0 : i32
    return %c0_i32, %c0_i32_0 : i32, i32
  }
  func.func @transform_5(%arg0: i32) -> (i32, i32) {
    %c0_i32 = arith.constant 0 : i32
    %c0_i32_0 = arith.constant 0 : i32
    %c0_i32_1 = arith.constant 0 : i32
    return %c0_i32, %c0_i32_0 : i32, i32
  }
  func.func @transform_6(%arg0: i32) -> (i32, i32) {
    %c0_i32 = arith.constant 0 : i32
    %c0_i32_0 = arith.constant 0 : i32
    %c0_i32_1 = arith.constant 0 : i32
    return %c0_i32, %c0_i32_0 : i32, i32
  }
  func.func @transform_7(%arg0: i32) -> (i32, i32) {
    %c0_i32 = arith.constant 0 : i32
    %c0_i32_0 = arith.constant 0 : i32
    %c0_i32_1 = arith.constant 0 : i32
    return %c0_i32, %c0_i32_0 : i32, i32
  }
  func.func @transform_8(%arg0: i32) -> (i32, i32, i32) {
    %c0_i32 = arith.constant 0 : i32
    %c0_i32_0 = arith.constant 0 : i32
    %c0_i32_1 = arith.constant 0 : i32
    return %arg0, %c0_i32, %c0_i32_0 : i32, i32, i32
  }
}

</mosaic_0001>

<bundles_post_ra>
// kernel: net_forward.2
= control target key start
LH: loop header
LB: loop body
LE: loop exit
PB: predicated region body
PF: predicated region fallthrough
CT: control target
= control target key end

     0   :  { %s1993_s12 = smov 0   ;;  %s1995_s13 = smov 0   ;;  %s2933_s0 = inlined_call_operand.vmem [shape: f32[25,9216], index: 0, kind: input, shape index: {}]   ;;  %s2934_s1 = inlined_call_operand.vmem [shape: f32[10,25], index: 1, kind: input, shape index: {}]   ;;  %s2935_s2 = inlined_call_operand.vmem [shape: f32[10,1], index: 2, kind: input, shape index: {}]   ;;  %s2936_s3 = inlined_call_operand.vmem [shape: f32[10,2304], index: 3, kind: output, shape index: {}]  }
   0x1   :  { %s1997_s14 = smov 0  }
   0x2 LB: > { %s1800_s15 = sadd.s32 4294967295, %s1970_s14   ;;  %s2010_s16 = sadd.s32 1, %s1970_s14   ;;  %s1970_s14 = sphi %s1997_s14, %s2951_s14   ;;  %s1966_s13 = sphi %s1995_s13, %s2950_s13   ;;  %s1962_s12 = sphi %s1993_s12, %s2949_s12  }
   0x3   : > { %s17_s17 = ssub.s32 %s1970_s14, %s2010_s16  ;;  %s20_s18 = sadd.s32 1, %s1966_s13 }
   0x4   : > { %p18_p0 = scmp.eq.s32.totalorder %s17_s17, 0  ;;  %p27_p1 = scmp.ne.s32.totalorder %s1966_s13, %s1962_s12 }
   0x5   : > { %p28_p2 = scmp.eq.s32.totalorder %s1970_s14, 0  ;;  %p99_p3 = scmp.eq.s32.totalorder %s1800_s15, 1 }
   0x6   : > { %s2021_s19 = scalar_select %p18_p0, %s1966_s13, %s20_s18  }
   0x7   : > { %p29_p4 = por %p28_p2, %p27_p1  ;;  %p2023_p5 = por %p99_p3, %p27_p1 }
   0x8   : > { %p1803_p6 = scmp.ge.s32.totalorder %s1970_s14, 2 }
   0xa   : > { %127 = sbr.rel (%p1803_p6) target bundleno = 164 (0xa4), region = 24 }
   0xf   : > { %130 = sbr.rel (!%p29_p4) target bundleno = 164 (0xa4), region = 28  ;;  %s132_s21 = sand.u32 (%p29_p4), 1, %s1966_s13  }
  0x10   : > { %s1917_s22 = smul.u32 (%p29_p4), 288, %s1970_s14 }
  0x11   : > { %s1919_s23 = smul.u32 (%p29_p4), 1152, %s132_s21 }
  0x12   : > { %s2033_s26 = scalar_lea.vmem (%p29_p4), %s2933_s0, %s1917_s22 }
  0x13   : > { %v150_v0 = vld [vmem:[%s2033_s26] sm:$0xff] (%p29_p4)  ;;  %v152_v1 = vld [vmem:[%s2033_s26 + $0x8] sm:$0xff] (%p29_p4)  ;;  %v154_v2 = vld [vmem:[%s2033_s26 + $0x10] sm:$0xff] (%p29_p4)  ;;  %s2038_s27 = scalar_lea.vmem (%p29_p4), [#allocation2], %s1919_s23 }
  0x14   : > { %151 = vst [vmem:[%s2038_s27] sm:$0xff] %v150_v0  ;;  %v156_v3 = vld [vmem:[%s2033_s26 + $0x18] sm:$0xff]  ;;  %v158_v4 = vld [vmem:[%s2033_s26 + $0x20] sm:$0xff]  ;;  %v160_v5 = vld [vmem:[%s2033_s26 + $0x28] sm:$0xff] }
  0x15   : > { %153 = vst [vmem:[%s2038_s27 + $0x8] sm:$0xff] %v152_v1  ;;  %v162_v6 = vld [vmem:[%s2033_s26 + $0x30] sm:$0xff]  ;;  %v164_v7 = vld [vmem:[%s2033_s26 + $0x38] sm:$0xff]  ;;  %v166_v8 = vld [vmem:[%s2033_s26 + $0x40] sm:$0xff] }
  0x16   : > { %155 = vst [vmem:[%s2038_s27 + $0x10] sm:$0xff] %v154_v2  ;;  %v168_v9 = vld [vmem:[%s2033_s26 + $0x48] sm:$0xff]  ;;  %v170_v10 = vld [vmem:[%s2033_s26 + $0x50] sm:$0xff]  ;;  %v172_v11 = vld [vmem:[%s2033_s26 + $0x58] sm:$0xff] }
  0x17   : > { %157 = vst [vmem:[%s2038_s27 + $0x18] sm:$0xff] %v156_v3  ;;  %v174_v12 = vld [vmem:[%s2033_s26 + $0x60] sm:$0xff]  ;;  %v176_v13 = vld [vmem:[%s2033_s26 + $0x68] sm:$0xff]  ;;  %v178_v14 = vld [vmem:[%s2033_s26 + $0x70] sm:$0xff] }
  0x18   : > { %159 = vst [vmem:[%s2038_s27 + $0x20] sm:$0xff] %v158_v4  ;;  %v180_v15 = vld [vmem:[%s2033_s26 + $0x78] sm:$0xff]  ;;  %v182_v16 = vld [vmem:[%s2033_s26 + $0x80] sm:$0xff]  ;;  %v184_v17 = vld [vmem:[%s2033_s26 + $0x88] sm:$0xff] }
  0x19   : > { %161 = vst [vmem:[%s2038_s27 + $0x28] sm:$0xff] %v160_v5  ;;  %v186_v18 = vld [vmem:[%s2033_s26 + $0x90] sm:$0xff]  ;;  %v188_v19 = vld [vmem:[%s2033_s26 + $0x98] sm:$0xff]  ;;  %v190_v20 = vld [vmem:[%s2033_s26 + $0xa0] sm:$0xff] }
  0x1a   : > { %163 = vst [vmem:[%s2038_s27 + $0x30] sm:$0xff] %v162_v6  ;;  %v192_v21 = vld [vmem:[%s2033_s26 + $0xa8] sm:$0xff]  ;;  %v194_v22 = vld [vmem:[%s2033_s26 + $0xb0] sm:$0xff]  ;;  %v196_v23 = vld [vmem:[%s2033_s26 + $0xb8] sm:$0xff] }
  0x1b   : > { %165 = vst [vmem:[%s2038_s27 + $0x38] sm:$0xff] %v164_v7  ;;  %v198_v24 = vld [vmem:[%s2033_s26 + $0xc0] sm:$0xff]  ;;  %v200_v25 = vld [vmem:[%s2033_s26 + $0xc8] sm:$0xff]  ;;  %v202_v26 = vld [vmem:[%s2033_s26 + $0xd0] sm:$0xff] }
  0x1c   : > { %167 = vst [vmem:[%s2038_s27 + $0x40] sm:$0xff] %v166_v8  ;;  %v204_v27 = vld [vmem:[%s2033_s26 + $0xd8] sm:$0xff]  ;;  %v206_v28 = vld [vmem:[%s2033_s26 + $0xe0] sm:$0xff]  ;;  %v208_v29 = vld [vmem:[%s2033_s26 + $0xe8] sm:$0xff] }
  0x1d   : > { %169 = vst [vmem:[%s2038_s27 + $0x48] sm:$0xff] %v168_v9  ;;  %v210_v30 = vld [vmem:[%s2033_s26 + $0xf0] sm:$0xff]  ;;  %v212_v31 = vld [vmem:[%s2033_s26 + $0xf8] sm:$0xff]  ;;  %v214_v32 = vld [vmem:[%s2033_s26 + $0x100] sm:$0xff] }
  0x1e   : > { %171 = vst [vmem:[%s2038_s27 + $0x50] sm:$0xff] %v170_v10  ;;  %v216_v33 = vld [vmem:[%s2033_s26 + $0x108] sm:$0xff]  ;;  %v218_v34 = vld [vmem:[%s2033_s26 + $0x110] sm:$0xff]  ;;  %v220_v35 = vld [vmem:[%s2033_s26 + $0x118] sm:$0xff] }
  0x1f   : > { %173 = vst [vmem:[%s2038_s27 + $0x58] sm:$0xff] %v172_v11  ;;  %v222_v36 = vld [vmem:[%s2033_s26 + $0x240] sm:$0xff]  ;;  %v224_v37 = vld [vmem:[%s2033_s26 + $0x248] sm:$0xff]  ;;  %v226_v38 = vld [vmem:[%s2033_s26 + $0x250] sm:$0xff] }
  0x20   : > { %175 = vst [vmem:[%s2038_s27 + $0x60] sm:$0xff] %v174_v12  ;;  %v228_v39 = vld [vmem:[%s2033_s26 + $0x258] sm:$0xff]  ;;  %v230_v40 = vld [vmem:[%s2033_s26 + $0x260] sm:$0xff]  ;;  %v232_v41 = vld [vmem:[%s2033_s26 + $0x268] sm:$0xff] }
  0x21   : > { %177 = vst [vmem:[%s2038_s27 + $0x68] sm:$0xff] %v176_v13  ;;  %v234_v42 = vld [vmem:[%s2033_s26 + $0x270] sm:$0xff]  ;;  %v236_v43 = vld [vmem:[%s2033_s26 + $0x278] sm:$0xff]  ;;  %v238_v44 = vld [vmem:[%s2033_s26 + $0x280] sm:$0xff] }
  0x22   : > { %179 = vst [vmem:[%s2038_s27 + $0x70] sm:$0xff] %v178_v14  ;;  %v240_v45 = vld [vmem:[%s2033_s26 + $0x288] sm:$0xff]  ;;  %v242_v46 = vld [vmem:[%s2033_s26 + $0x290] sm:$0xff]  ;;  %v244_v47 = vld [vmem:[%s2033_s26 + $0x298] sm:$0xff] }
  0x23   : > { %181 = vst [vmem:[%s2038_s27 + $0x78] sm:$0xff] %v180_v15  ;;  %v246_v48 = vld [vmem:[%s2033_s26 + $0x2a0] sm:$0xff]  ;;  %v248_v49 = vld [vmem:[%s2033_s26 + $0x2a8] sm:$0xff]  ;;  %v250_v50 = vld [vmem:[%s2033_s26 + $0x2b0] sm:$0xff] }
  0x24   : > { %183 = vst [vmem:[%s2038_s27 + $0x80] sm:$0xff] %v182_v16  ;;  %v252_v51 = vld [vmem:[%s2033_s26 + $0x2b8] sm:$0xff]  ;;  %v254_v52 = vld [vmem:[%s2033_s26 + $0x2c0] sm:$0xff]  ;;  %v256_v53 = vld [vmem:[%s2033_s26 + $0x2c8] sm:$0xff] }
  0x25   : > { %185 = vst [vmem:[%s2038_s27 + $0x88] sm:$0xff] %v184_v17  ;;  %v258_v54 = vld [vmem:[%s2033_s26 + $0x2d0] sm:$0xff]  ;;  %v260_v55 = vld [vmem:[%s2033_s26 + $0x2d8] sm:$0xff]  ;;  %v262_v56 = vld [vmem:[%s2033_s26 + $0x2e0] sm:$0xff] }
  0x26   : > { %187 = vst [vmem:[%s2038_s27 + $0x90] sm:$0xff] %v186_v18  ;;  %v264_v57 = vld [vmem:[%s2033_s26 + $0x2e8] sm:$0xff]  ;;  %v266_v58 = vld [vmem:[%s2033_s26 + $0x2f0] sm:$0xff]  ;;  %v268_v59 = vld [vmem:[%s2033_s26 + $0x2f8] sm:$0xff] }
  0x27   : > { %189 = vst [vmem:[%s2038_s27 + $0x98] sm:$0xff] %v188_v19  ;;  %v270_v60 = vld [vmem:[%s2033_s26 + $0x300] sm:$0xff]  ;;  %v272_v61 = vld [vmem:[%s2033_s26 + $0x308] sm:$0xff]  ;;  %v274_v62 = vld [vmem:[%s2033_s26 + $0x310] sm:$0xff] }
  0x28   : > { %191 = vst [vmem:[%s2038_s27 + $0xa0] sm:$0xff] %v190_v20  ;;  %v276_v63 = vld [vmem:[%s2033_s26 + $0x318] sm:$0xff]  ;;  %v278_v0 = vld [vmem:[%s2033_s26 + $0x320] sm:$0xff]  ;;  %v280_v1 = vld [vmem:[%s2033_s26 + $0x328] sm:$0xff] }
  0x29   : > { %193 = vst [vmem:[%s2038_s27 + $0xa8] sm:$0xff] %v192_v21  ;;  %v282_v2 = vld [vmem:[%s2033_s26 + $0x330] sm:$0xff]  ;;  %v284_v3 = vld [vmem:[%s2033_s26 + $0x338] sm:$0xff]  ;;  %v286_v4 = vld [vmem:[%s2033_s26 + $0x340] sm:$0xff] }
  0x2a   : > { %195 = vst [vmem:[%s2038_s27 + $0xb0] sm:$0xff] %v194_v22  ;;  %v288_v5 = vld [vmem:[%s2033_s26 + $0x348] sm:$0xff]  ;;  %v290_v6 = vld [vmem:[%s2033_s26 + $0x350] sm:$0xff]  ;;  %v292_v7 = vld [vmem:[%s2033_s26 + $0x358] sm:$0xff] }
  0x2b   : > { %197 = vst [vmem:[%s2038_s27 + $0xb8] sm:$0xff] %v196_v23  ;;  %v294_v8 = vld [vmem:[%s2033_s26 + $0x480] sm:$0xff]  ;;  %v296_v9 = vld [vmem:[%s2033_s26 + $0x488] sm:$0xff]  ;;  %v298_v10 = vld [vmem:[%s2033_s26 + $0x490] sm:$0xff] }
  0x2c   : > { %199 = vst [vmem:[%s2038_s27 + $0xc0] sm:$0xff] %v198_v24  ;;  %v300_v11 = vld [vmem:[%s2033_s26 + $0x498] sm:$0xff]  ;;  %v302_v12 = vld [vmem:[%s2033_s26 + $0x4a0] sm:$0xff]  ;;  %v304_v13 = vld [vmem:[%s2033_s26 + $0x4a8] sm:$0xff] }
  0x2d   : > { %201 = vst [vmem:[%s2038_s27 + $0xc8] sm:$0xff] %v200_v25  ;;  %v306_v14 = vld [vmem:[%s2033_s26 + $0x4b0] sm:$0xff]  ;;  %v308_v15 = vld [vmem:[%s2033_s26 + $0x4b8] sm:$0xff]  ;;  %v310_v16 = vld [vmem:[%s2033_s26 + $0x4c0] sm:$0xff] }
  0x2e   : > { %203 = vst [vmem:[%s2038_s27 + $0xd0] sm:$0xff] %v202_v26  ;;  %v312_v17 = vld [vmem:[%s2033_s26 + $0x4c8] sm:$0xff]  ;;  %v314_v18 = vld [vmem:[%s2033_s26 + $0x4d0] sm:$0xff]  ;;  %v316_v19 = vld [vmem:[%s2033_s26 + $0x4d8] sm:$0xff] }
  0x2f   : > { %205 = vst [vmem:[%s2038_s27 + $0xd8] sm:$0xff] %v204_v27  ;;  %v318_v20 = vld [vmem:[%s2033_s26 + $0x4e0] sm:$0xff]  ;;  %v320_v21 = vld [vmem:[%s2033_s26 + $0x4e8] sm:$0xff]  ;;  %v322_v22 = vld [vmem:[%s2033_s26 + $0x4f0] sm:$0xff] }
  0x30   : > { %207 = vst [vmem:[%s2038_s27 + $0xe0] sm:$0xff] %v206_v28  ;;  %v324_v23 = vld [vmem:[%s2033_s26 + $0x4f8] sm:$0xff]  ;;  %v326_v24 = vld [vmem:[%s2033_s26 + $0x500] sm:$0xff]  ;;  %v328_v25 = vld [vmem:[%s2033_s26 + $0x508] sm:$0xff] }
  0x31   : > { %209 = vst [vmem:[%s2038_s27 + $0xe8] sm:$0xff] %v208_v29  ;;  %v330_v26 = vld [vmem:[%s2033_s26 + $0x510] sm:$0xff]  ;;  %v332_v27 = vld [vmem:[%s2033_s26 + $0x518] sm:$0xff]  ;;  %v334_v28 = vld [vmem:[%s2033_s26 + $0x520] sm:$0xff] }
  0x32   : > { %211 = vst [vmem:[%s2038_s27 + $0xf0] sm:$0xff] %v210_v30  ;;  %v336_v29 = vld [vmem:[%s2033_s26 + $0x528] sm:$0xff]  ;;  %v338_v30 = vld [vmem:[%s2033_s26 + $0x530] sm:$0xff] }
  0x33   : > { %213 = vst [vmem:[%s2038_s27 + $0xf8] sm:$0xff] %v212_v31  ;;  %v340_v31 = vld [vmem:[%s2033_s26 + $0x538] sm:$0xff] }
  0x34   : > { %215 = vst [vmem:[%s2038_s27 + $0x100] sm:$0xff] %v214_v32  ;;  %v342_v32 = vld [vmem:[%s2033_s26 + $0x540] sm:$0xff] }
  0x35   : > { %217 = vst [vmem:[%s2038_s27 + $0x108] sm:$0xff] %v216_v33  ;;  %v344_v33 = vld [vmem:[%s2033_s26 + $0x548] sm:$0xff] }
  0x36   : > { %219 = vst [vmem:[%s2038_s27 + $0x110] sm:$0xff] %v218_v34  ;;  %v346_v34 = vld [vmem:[%s2033_s26 + $0x550] sm:$0xff] }
  0x37   : > { %221 = vst [vmem:[%s2038_s27 + $0x118] sm:$0xff] %v220_v35  ;;  %v348_v35 = vld [vmem:[%s2033_s26 + $0x558] sm:$0xff] }
  0x38   : > { %223 = vst [vmem:[%s2038_s27 + $0x120] sm:$0xff] %v222_v36  ;;  %v350_v36 = vld [vmem:[%s2033_s26 + $0x560] sm:$0xff] }
  0x39   : > { %225 = vst [vmem:[%s2038_s27 + $0x128] sm:$0xff] %v224_v37  ;;  %v352_v37 = vld [vmem:[%s2033_s26 + $0x568] sm:$0xff] }
  0x3a   : > { %227 = vst [vmem:[%s2038_s27 + $0x130] sm:$0xff] %v226_v38  ;;  %v354_v38 = vld [vmem:[%s2033_s26 + $0x570] sm:$0xff] }
  0x3b   : > { %229 = vst [vmem:[%s2038_s27 + $0x138] sm:$0xff] %v228_v39  ;;  %v356_v39 = vld [vmem:[%s2033_s26 + $0x578] sm:$0xff] }
  0x3c   : > { %231 = vst [vmem:[%s2038_s27 + $0x140] sm:$0xff] %v230_v40  ;;  %v358_v40 = vld [vmem:[%s2033_s26 + $0x580] sm:$0xff] }
  0x3d   : > { %233 = vst [vmem:[%s2038_s27 + $0x148] sm:$0xff] %v232_v41  ;;  %v360_v41 = vld [vmem:[%s2033_s26 + $0x588] sm:$0xff] }
  0x3e   : > { %235 = vst [vmem:[%s2038_s27 + $0x150] sm:$0xff] %v234_v42  ;;  %v362_v42 = vld [vmem:[%s2033_s26 + $0x590] sm:$0xff] }
  0x3f   : > { %237 = vst [vmem:[%s2038_s27 + $0x158] sm:$0xff] %v236_v43  ;;  %v364_v43 = vld [vmem:[%s2033_s26 + $0x598] sm:$0xff] }
  0x40   : > { %239 = vst [vmem:[%s2038_s27 + $0x160] sm:$0xff] %v238_v44  ;;  %v366_v44 = vld [vmem:[%s2033_s26 + $0x6c0] sm:$0xff] }
  0x41   : > { %241 = vst [vmem:[%s2038_s27 + $0x168] sm:$0xff] %v240_v45  ;;  %v368_v45 = vld [vmem:[%s2033_s26 + $0x6c8] sm:$0xff] }
  0x42   : > { %243 = vst [vmem:[%s2038_s27 + $0x170] sm:$0xff] %v242_v46  ;;  %v370_v46 = vld [vmem:[%s2033_s26 + $0x6d0] sm:$0xff] }
  0x43   : > { %245 = vst [vmem:[%s2038_s27 + $0x178] sm:$0xff] %v244_v47  ;;  %v372_v47 = vld [vmem:[%s2033_s26 + $0x6d8] sm:$0xff] }
  0x44   : > { %247 = vst [vmem:[%s2038_s27 + $0x180] sm:$0xff] %v246_v48  ;;  %v374_v48 = vld [vmem:[%s2033_s26 + $0x6e0] sm:$0xff] }
  0x45   : > { %249 = vst [vmem:[%s2038_s27 + $0x188] sm:$0xff] %v248_v49  ;;  %v376_v49 = vld [vmem:[%s2033_s26 + $0x6e8] sm:$0xff] }
  0x46   : > { %251 = vst [vmem:[%s2038_s27 + $0x190] sm:$0xff] %v250_v50  ;;  %v378_v50 = vld [vmem:[%s2033_s26 + $0x6f0] sm:$0xff] }
  0x47   : > { %253 = vst [vmem:[%s2038_s27 + $0x198] sm:$0xff] %v252_v51  ;;  %v380_v51 = vld [vmem:[%s2033_s26 + $0x6f8] sm:$0xff] }
  0x48   : > { %255 = vst [vmem:[%s2038_s27 + $0x1a0] sm:$0xff] %v254_v52  ;;  %v382_v52 = vld [vmem:[%s2033_s26 + $0x700] sm:$0xff] }
  0x49   : > { %257 = vst [vmem:[%s2038_s27 + $0x1a8] sm:$0xff] %v256_v53  ;;  %v384_v53 = vld [vmem:[%s2033_s26 + $0x708] sm:$0xff] }
  0x4a   : > { %259 = vst [vmem:[%s2038_s27 + $0x1b0] sm:$0xff] %v258_v54  ;;  %v386_v54 = vld [vmem:[%s2033_s26 + $0x710] sm:$0xff] }
  0x4b   : > { %261 = vst [vmem:[%s2038_s27 + $0x1b8] sm:$0xff] %v260_v55  ;;  %v388_v55 = vld [vmem:[%s2033_s26 + $0x718] sm:$0xff] }
  0x4c   : > { %263 = vst [vmem:[%s2038_s27 + $0x1c0] sm:$0xff] %v262_v56  ;;  %v390_v56 = vld [vmem:[%s2033_s26 + $0x720] sm:$0xff] }
  0x4d   : > { %265 = vst [vmem:[%s2038_s27 + $0x1c8] sm:$0xff] %v264_v57  ;;  %v392_v57 = vld [vmem:[%s2033_s26 + $0x728] sm:$0xff] }
  0x4e   : > { %267 = vst [vmem:[%s2038_s27 + $0x1d0] sm:$0xff] %v266_v58  ;;  %v394_v58 = vld [vmem:[%s2033_s26 + $0x730] sm:$0xff] }
  0x4f   : > { %269 = vst [vmem:[%s2038_s27 + $0x1d8] sm:$0xff] %v268_v59  ;;  %v396_v59 = vld [vmem:[%s2033_s26 + $0x738] sm:$0xff] }
  0x50   : > { %271 = vst [vmem:[%s2038_s27 + $0x1e0] sm:$0xff] %v270_v60  ;;  %v398_v60 = vld [vmem:[%s2033_s26 + $0x740] sm:$0xff] }
  0x51   : > { %273 = vst [vmem:[%s2038_s27 + $0x1e8] sm:$0xff] %v272_v61  ;;  %v400_v61 = vld [vmem:[%s2033_s26 + $0x748] sm:$0xff] }
  0x52   : > { %275 = vst [vmem:[%s2038_s27 + $0x1f0] sm:$0xff] %v274_v62  ;;  %v402_v62 = vld [vmem:[%s2033_s26 + $0x750] sm:$0xff] }
  0x53   : > { %277 = vst [vmem:[%s2038_s27 + $0x1f8] sm:$0xff] %v276_v63  ;;  %v404_v63 = vld [vmem:[%s2033_s26 + $0x758] sm:$0xff] }
  0x54   : > { %279 = vst [vmem:[%s2038_s27 + $0x200] sm:$0xff] %v278_v0  ;;  %v406_v0 = vld [vmem:[%s2033_s26 + $0x760] sm:$0xff] }
  0x55   : > { %281 = vst [vmem:[%s2038_s27 + $0x208] sm:$0xff] %v280_v1  ;;  %v408_v1 = vld [vmem:[%s2033_s26 + $0x768] sm:$0xff] }
  0x56   : > { %283 = vst [vmem:[%s2038_s27 + $0x210] sm:$0xff] %v282_v2  ;;  %v410_v2 = vld [vmem:[%s2033_s26 + $0x770] sm:$0xff] }
  0x57   : > { %285 = vst [vmem:[%s2038_s27 + $0x218] sm:$0xff] %v284_v3  ;;  %v412_v3 = vld [vmem:[%s2033_s26 + $0x778] sm:$0xff] }
  0x58   : > { %287 = vst [vmem:[%s2038_s27 + $0x220] sm:$0xff] %v286_v4  ;;  %v414_v4 = vld [vmem:[%s2033_s26 + $0x780] sm:$0xff] }
  0x59   : > { %289 = vst [vmem:[%s2038_s27 + $0x228] sm:$0xff] %v288_v5  ;;  %v416_v5 = vld [vmem:[%s2033_s26 + $0x788] sm:$0xff] }
  0x5a   : > { %291 = vst [vmem:[%s2038_s27 + $0x230] sm:$0xff] %v290_v6  ;;  %v418_v6 = vld [vmem:[%s2033_s26 + $0x790] sm:$0xff] }
  0x5b   : > { %293 = vst [vmem:[%s2038_s27 + $0x238] sm:$0xff] %v292_v7  ;;  %v420_v7 = vld [vmem:[%s2033_s26 + $0x798] sm:$0xff] }
  0x5c   : > { %295 = vst [vmem:[%s2038_s27 + $0x240] sm:$0xff] %v294_v8  ;;  %v422_v8 = vld [vmem:[%s2033_s26 + $0x7a0] sm:$0xff] }
  0x5d   : > { %297 = vst [vmem:[%s2038_s27 + $0x248] sm:$0xff] %v296_v9  ;;  %v424_v9 = vld [vmem:[%s2033_s26 + $0x7a8] sm:$0xff] }
  0x5e   : > { %299 = vst [vmem:[%s2038_s27 + $0x250] sm:$0xff] %v298_v10  ;;  %v426_v10 = vld [vmem:[%s2033_s26 + $0x7b0] sm:$0xff] }
  0x5f   : > { %301 = vst [vmem:[%s2038_s27 + $0x258] sm:$0xff] %v300_v11  ;;  %v428_v11 = vld [vmem:[%s2033_s26 + $0x7b8] sm:$0xff] }
  0x60   : > { %303 = vst [vmem:[%s2038_s27 + $0x260] sm:$0xff] %v302_v12  ;;  %v430_v12 = vld [vmem:[%s2033_s26 + $0x7c0] sm:$0xff] }
  0x61   : > { %305 = vst [vmem:[%s2038_s27 + $0x268] sm:$0xff] %v304_v13  ;;  %v432_v13 = vld [vmem:[%s2033_s26 + $0x7c8] sm:$0xff] }
  0x62   : > { %307 = vst [vmem:[%s2038_s27 + $0x270] sm:$0xff] %v306_v14  ;;  %v434_v14 = vld [vmem:[%s2033_s26 + $0x7d0] sm:$0xff] }
  0x63   : > { %309 = vst [vmem:[%s2038_s27 + $0x278] sm:$0xff] %v308_v15  ;;  %v436_v15 = vld [vmem:[%s2033_s26 + $0x7d8] sm:$0xff] }
  0x64   : > { %311 = vst [vmem:[%s2038_s27 + $0x280] sm:$0xff] %v310_v16 }
  0x65   : > { %313 = vst [vmem:[%s2038_s27 + $0x288] sm:$0xff] %v312_v17 }
  0x66   : > { %315 = vst [vmem:[%s2038_s27 + $0x290] sm:$0xff] %v314_v18 }
  0x67   : > { %317 = vst [vmem:[%s2038_s27 + $0x298] sm:$0xff] %v316_v19 }
  0x68   : > { %319 = vst [vmem:[%s2038_s27 + $0x2a0] sm:$0xff] %v318_v20 }
  0x69   : > { %321 = vst [vmem:[%s2038_s27 + $0x2a8] sm:$0xff] %v320_v21 }
  0x6a   : > { %323 = vst [vmem:[%s2038_s27 + $0x2b0] sm:$0xff] %v322_v22 }
  0x6b   : > { %325 = vst [vmem:[%s2038_s27 + $0x2b8] sm:$0xff] %v324_v23 }
  0x6c   : > { %327 = vst [vmem:[%s2038_s27 + $0x2c0] sm:$0xff] %v326_v24 }
  0x6d   : > { %329 = vst [vmem:[%s2038_s27 + $0x2c8] sm:$0xff] %v328_v25 }
  0x6e   : > { %331 = vst [vmem:[%s2038_s27 + $0x2d0] sm:$0xff] %v330_v26 }
  0x6f   : > { %333 = vst [vmem:[%s2038_s27 + $0x2d8] sm:$0xff] %v332_v27 }
  0x70   : > { %335 = vst [vmem:[%s2038_s27 + $0x2e0] sm:$0xff] %v334_v28 }
  0x71   : > { %337 = vst [vmem:[%s2038_s27 + $0x2e8] sm:$0xff] %v336_v29 }
  0x72   : > { %339 = vst [vmem:[%s2038_s27 + $0x2f0] sm:$0xff] %v338_v30 }
  0x73   : > { %341 = vst [vmem:[%s2038_s27 + $0x2f8] sm:$0xff] %v340_v31 }
  0x74   : > { %343 = vst [vmem:[%s2038_s27 + $0x300] sm:$0xff] %v342_v32 }
  0x75   : > { %345 = vst [vmem:[%s2038_s27 + $0x308] sm:$0xff] %v344_v33 }
  0x76   : > { %347 = vst [vmem:[%s2038_s27 + $0x310] sm:$0xff] %v346_v34 }
  0x77   : > { %349 = vst [vmem:[%s2038_s27 + $0x318] sm:$0xff] %v348_v35 }
  0x78   : > { %351 = vst [vmem:[%s2038_s27 + $0x320] sm:$0xff] %v350_v36 }
  0x79   : > { %353 = vst [vmem:[%s2038_s27 + $0x328] sm:$0xff] %v352_v37 }
  0x7a   : > { %355 = vst [vmem:[%s2038_s27 + $0x330] sm:$0xff] %v354_v38 }
  0x7b   : > { %357 = vst [vmem:[%s2038_s27 + $0x338] sm:$0xff] %v356_v39 }
  0x7c   : > { %359 = vst [vmem:[%s2038_s27 + $0x340] sm:$0xff] %v358_v40 }
  0x7d   : > { %361 = vst [vmem:[%s2038_s27 + $0x348] sm:$0xff] %v360_v41 }
  0x7e   : > { %363 = vst [vmem:[%s2038_s27 + $0x350] sm:$0xff] %v362_v42 }
  0x7f   : > { %365 = vst [vmem:[%s2038_s27 + $0x358] sm:$0xff] %v364_v43 }
  0x80   : > { %367 = vst [vmem:[%s2038_s27 + $0x360] sm:$0xff] %v366_v44 }
  0x81   : > { %369 = vst [vmem:[%s2038_s27 + $0x368] sm:$0xff] %v368_v45 }
  0x82   : > { %371 = vst [vmem:[%s2038_s27 + $0x370] sm:$0xff] %v370_v46 }
  0x83   : > { %373 = vst [vmem:[%s2038_s27 + $0x378] sm:$0xff] %v372_v47 }
  0x84   : > { %375 = vst [vmem:[%s2038_s27 + $0x380] sm:$0xff] %v374_v48 }
  0x85   : > { %377 = vst [vmem:[%s2038_s27 + $0x388] sm:$0xff] %v376_v49 }
  0x86   : > { %379 = vst [vmem:[%s2038_s27 + $0x390] sm:$0xff] %v378_v50 }
  0x87   : > { %381 = vst [vmem:[%s2038_s27 + $0x398] sm:$0xff] %v380_v51 }
  0x88   : > { %383 = vst [vmem:[%s2038_s27 + $0x3a0] sm:$0xff] %v382_v52 }
  0x89   : > { %385 = vst [vmem:[%s2038_s27 + $0x3a8] sm:$0xff] %v384_v53 }
  0x8a   : > { %387 = vst [vmem:[%s2038_s27 + $0x3b0] sm:$0xff] %v386_v54 }
  0x8b   : > { %389 = vst [vmem:[%s2038_s27 + $0x3b8] sm:$0xff] %v388_v55 }
  0x8c   : > { %391 = vst [vmem:[%s2038_s27 + $0x3c0] sm:$0xff] %v390_v56 }
  0x8d   : > { %393 = vst [vmem:[%s2038_s27 + $0x3c8] sm:$0xff] %v392_v57 }
  0x8e   : > { %395 = vst [vmem:[%s2038_s27 + $0x3d0] sm:$0xff] %v394_v58 }
  0x8f   : > { %397 = vst [vmem:[%s2038_s27 + $0x3d8] sm:$0xff] %v396_v59 }
  0x90   : > { %399 = vst [vmem:[%s2038_s27 + $0x3e0] sm:$0xff] %v398_v60 }
  0x91   : > { %401 = vst [vmem:[%s2038_s27 + $0x3e8] sm:$0xff] %v400_v61 }
  0x92   : > { %403 = vst [vmem:[%s2038_s27 + $0x3f0] sm:$0xff] %v402_v62 }
  0x93   : > { %405 = vst [vmem:[%s2038_s27 + $0x3f8] sm:$0xff] %v404_v63 }
  0x94   : > { %407 = vst [vmem:[%s2038_s27 + $0x400] sm:$0xff] %v406_v0 }
  0x95   : > { %409 = vst [vmem:[%s2038_s27 + $0x408] sm:$0xff] %v408_v1 }
  0x96   : > { %411 = vst [vmem:[%s2038_s27 + $0x410] sm:$0xff] %v410_v2 }
  0x97   : > { %413 = vst [vmem:[%s2038_s27 + $0x418] sm:$0xff] %v412_v3 }
  0x98   : > { %415 = vst [vmem:[%s2038_s27 + $0x420] sm:$0xff] %v414_v4 }
  0x99   : > { %417 = vst [vmem:[%s2038_s27 + $0x428] sm:$0xff] %v416_v5 }
  0x9a   : > { %419 = vst [vmem:[%s2038_s27 + $0x430] sm:$0xff] %v418_v6 }
  0x9b   : > { %421 = vst [vmem:[%s2038_s27 + $0x438] sm:$0xff] %v420_v7 }
  0x9c   : > { %423 = vst [vmem:[%s2038_s27 + $0x440] sm:$0xff] %v422_v8 }
  0x9d   : > { %425 = vst [vmem:[%s2038_s27 + $0x448] sm:$0xff] %v424_v9 }
  0x9e   : > { %427 = vst [vmem:[%s2038_s27 + $0x450] sm:$0xff] %v426_v10 }
  0x9f   : > { %429 = vst [vmem:[%s2038_s27 + $0x458] sm:$0xff] %v428_v11 }
  0xa0   : > { %431 = vst [vmem:[%s2038_s27 + $0x460] sm:$0xff] %v430_v12 }
  0xa1   : > { %433 = vst [vmem:[%s2038_s27 + $0x468] sm:$0xff] %v432_v13 }
  0xa2   : > { %435 = vst [vmem:[%s2038_s27 + $0x470] sm:$0xff] %v434_v14 }
  0xa3   : > { %437 = vst [vmem:[%s2038_s27 + $0x478] sm:$0xff] %v436_v15 }
  0xa4 PF: > { %p1805_p7 = scmp.ge.s32.totalorder %s1970_s14, 1  ;;  %p442_p8 = scmp.lt.s32.totalorder %s1970_s14, 3 }
  0xa6   : > { %p443_p9 = pnand %p1805_p7, %p442_p8 }
  0xa7   : > { %s449_s28 = sand.u32 (!%p443_p9), 1, %s1962_s12  }
  0xa8   : > { %446 = sbr.rel (%p443_p9) target bundleno = 468 (0x1d4), region = 51 }
  0xa9   : > { %s1920_s29 = smul.u32 (!%p443_p9), 1152, %s449_s28 }
  0xaa   : > { %s1921_s17 = smul.u32 (!%p443_p9), 144, %s449_s28 }
  0xab   : > { %s2330_s30 = scalar_lea.vmem (!%p443_p9), [#allocation2], %s1920_s29 }
  0xac   : > { %s2789_s18 = scalar_lea.vmem (!%p443_p9), [#allocation3], %s1921_s17 }
  0xad   : > { %vm626_vm0 = vcmask 1040384   ;;  %v583_v16 = vld [vmem:[%s2330_s30 + $0x360] sm:$0x1]  ;;  %v584_v17 = vld [vmem:[%s2330_s30 + $0x368] sm:$0x1]  ;;  %v549_v22 = vld [vmem:[%s2330_s30 + $0x250] sm:$0xff] }
  0xae   : > { %v585_v18 = vld [vmem:[%s2330_s30 + $0x370] sm:$0x1]  ;;  %1806 = vmatpush.msk.msra.mxu0 %vm626_vm0, %v583_v16  ;;  %1809 = vmatpush.msk.msra.mxu1 %vm626_vm0, %v584_v17  ;;  %v586_v19 = vld [vmem:[%s2330_s30 + $0x378] sm:$0x1]  ;;  %v547_v20 = vld [vmem:[%s2330_s30 + $0x240] sm:$0xff]  ;;  %vm619_vm1 = vcmask 203776  }
  0xaf   : > { %v548_v21 = vld [vmem:[%s2330_s30 + $0x248] sm:$0xff]  ;;  %1812 = vmatpush.msk.msra.mxu2 %vm626_vm0, %v585_v18  ;;  %1815 = vmatpush.msk.msra.mxu3 %vm626_vm0, %v586_v19  ;;  %v550_v23 = vld [vmem:[%s2330_s30 + $0x258] sm:$0xff]  ;;  %v511_v24 = vld [vmem:[%s2330_s30 + $0x120] sm:$0xff]  ;;  %s1918_s12 = smul.u32 (%p2023_p5), 72, %s1800_s15 }
  0xb0   : > { %748 = vmatpush.msra.mxu0 %v547_v20  ;;  %771 = vmatpush.msra.mxu1 %v548_v21  ;;  %v512_v25 = vld [vmem:[%s2330_s30 + $0x128] sm:$0xff]  ;;  %v513_v26 = vld [vmem:[%s2330_s30 + $0x130] sm:$0xff]  ;;  %v514_v27 = vld [vmem:[%s2330_s30 + $0x138] sm:$0xff] }
  0xb1   : > { %794 = vmatpush.msra.mxu2 %v549_v22  ;;  %817 = vmatpush.msra.mxu3 %v550_v23  ;;  %v475_v28 = vld [vmem:[%s2330_s30] sm:$0xff]  ;;  %v476_v29 = vld [vmem:[%s2330_s30 + $0x8] sm:$0xff]  ;;  %v477_v30 = vld [vmem:[%s2330_s30 + $0x10] sm:$0xff]  ;;  %s2887_s20 = scalar_lea.vmem (%p2023_p5), %s2936_s3, %s1918_s12 }
  0xb2   : > { %749 = vmatpush.msra.mxu0 %v511_v24  ;;  %772 = vmatpush.msra.mxu1 %v512_v25  ;;  %v478_v31 = vld [vmem:[%s2330_s30 + $0x18] sm:$0xff]  ;;  %v2355_v32 = vld [vmem:[%s2934_s1] sm:$0xff]  ;;  %v589_v33 = vld [vmem:[%s2330_s30 + $0x390] sm:$0x1] }
  0xb3   : > { %795 = vmatpush.msra.mxu2 %v513_v26  ;;  %818 = vmatpush.msra.mxu3 %v514_v27  ;;  %v590_v34 = vld [vmem:[%s2330_s30 + $0x398] sm:$0x1]  ;;  %v587_v35 = vld [vmem:[%s2330_s30 + $0x380] sm:$0x1]  ;;  %v588_v36 = vld [vmem:[%s2330_s30 + $0x388] sm:$0x1] }
  0xb4   : > { %750 = vmatpush.msra.mxu0 %v475_v28  ;;  %773 = vmatpush.msra.mxu1 %v476_v29  ;;  %v553_v37 = vld [vmem:[%s2330_s30 + $0x270] sm:$0xff]  ;;  %v554_v38 = vld [vmem:[%s2330_s30 + $0x278] sm:$0xff]  ;;  %v551_v39 = vld [vmem:[%s2330_s30 + $0x260] sm:$0xff] }
  0xb5   : > { %796 = vmatpush.msra.mxu2 %v477_v30  ;;  %819 = vmatpush.msra.mxu3 %v478_v31  ;;  %v552_v40 = vld [vmem:[%s2330_s30 + $0x268] sm:$0xff]  ;;  %v517_v41 = vld [vmem:[%s2330_s30 + $0x150] sm:$0xff]  ;;  %v518_v42 = vld [vmem:[%s2330_s30 + $0x158] sm:$0xff] }
  0xb6   : > { %1807 = vmatmul.msk.f32.vlgmr.msra.gmra.mxu0 %vm619_vm1, %v2355_v32  ;;  %1810 = vmatmul.msk.f32.vlgmr.msra.gmra.mxu1 %vm619_vm1, %v2355_v32  ;;  %v515_v43 = vld [vmem:[%s2330_s30 + $0x140] sm:$0xff]  ;;  %v516_v44 = vld [vmem:[%s2330_s30 + $0x148] sm:$0xff]  ;;  %v481_v46 = vld [vmem:[%s2330_s30 + $0x30] sm:$0xff] }
  0xb7   : > { %1813 = vmatmul.msk.f32.vlgmr.msra.gmra.mxu2 %vm619_vm1, %v2355_v32  ;;  %1816 = vmatmul.msk.f32.vlgmr.msra.gmra.mxu3 %vm619_vm1, %v2355_v32  ;;  %v2384_v45 = vld [vmem:[%s2934_s1 + $0x8] sm:$0x3]  ;;  %v482_v47 = vld [vmem:[%s2330_s30 + $0x38] sm:$0xff]  ;;  %v479_v48 = vld [vmem:[%s2330_s30 + $0x20] sm:$0xff] }
  0xb8   : > { %1824 = vmatpush.msk.msrb.mxu2 %vm626_vm0, %v589_v33  ;;  %1827 = vmatpush.msk.msrb.mxu3 %vm626_vm0, %v590_v34  ;;  %v480_v49 = vld [vmem:[%s2330_s30 + $0x28] sm:$0xff]  ;;  %v593_v50 = vld [vmem:[%s2330_s30 + $0x3b0] sm:$0x1]  ;;  %v594_v51 = vld [vmem:[%s2330_s30 + $0x3b8] sm:$0x1] }
  0xb9   : > { %1818 = vmatpush.msk.msrb.mxu0 %vm626_vm0, %v587_v35  ;;  %1821 = vmatpush.msk.msrb.mxu1 %vm626_vm0, %v588_v36  ;;  %v591_v52 = vld [vmem:[%s2330_s30 + $0x3a0] sm:$0x1]  ;;  %v592_v53 = vld [vmem:[%s2330_s30 + $0x3a8] sm:$0x1]  ;;  %v557_v54 = vld [vmem:[%s2330_s30 + $0x290] sm:$0xff] }
  0xba   : > { %886 = vmatpush.msrb.mxu2 %v553_v37  ;;  %909 = vmatpush.msrb.mxu3 %v554_v38  ;;  %v558_v55 = vld [vmem:[%s2330_s30 + $0x298] sm:$0xff]  ;;  %v555_v56 = vld [vmem:[%s2330_s30 + $0x280] sm:$0xff]  ;;  %v556_v57 = vld [vmem:[%s2330_s30 + $0x288] sm:$0xff] }
  0xbb   : > { %840 = vmatpush.msrb.mxu0 %v551_v39  ;;  %863 = vmatpush.msrb.mxu1 %v552_v40  ;;  %v521_v58 = vld [vmem:[%s2330_s30 + $0x170] sm:$0xff]  ;;  %v522_v59 = vld [vmem:[%s2330_s30 + $0x178] sm:$0xff]  ;;  %v519_v60 = vld [vmem:[%s2330_s30 + $0x160] sm:$0xff] }
  0xbc   : > { %887 = vmatpush.msrb.mxu2 %v517_v41  ;;  %910 = vmatpush.msrb.mxu3 %v518_v42  ;;  %v520_v61 = vld [vmem:[%s2330_s30 + $0x168] sm:$0xff]  ;;  %v485_v62 = vld [vmem:[%s2330_s30 + $0x50] sm:$0xff]  ;;  %v486_v63 = vld [vmem:[%s2330_s30 + $0x58] sm:$0xff] }
  0xbd   : > { %841 = vmatpush.msrb.mxu0 %v515_v43  ;;  %864 = vmatpush.msrb.mxu1 %v516_v44  ;;  %v483_v0 = vld [vmem:[%s2330_s30 + $0x40] sm:$0xff]  ;;  %v484_v1 = vld [vmem:[%s2330_s30 + $0x48] sm:$0xff]  ;;  %v597_v2 = vld [vmem:[%s2330_s30 + $0x3d0] sm:$0x1] }
  0xbe   : > { %1808 = vmatmul.msk.f32.gmra.mxu0 %vm619_vm1, %v2384_v45  ;;  %1811 = vmatmul.msk.f32.gmra.mxu1 %vm619_vm1, %v2384_v45  ;;  %v598_v3 = vld [vmem:[%s2330_s30 + $0x3d8] sm:$0x1]  ;;  %v595_v4 = vld [vmem:[%s2330_s30 + $0x3c0] sm:$0x1]  ;;  %v596_v5 = vld [vmem:[%s2330_s30 + $0x3c8] sm:$0x1] }
  0xbf   : > { %1814 = vmatmul.msk.f32.gmra.mxu2 %vm619_vm1, %v2384_v45  ;;  %1817 = vmatmul.msk.f32.gmra.mxu3 %vm619_vm1, %v2384_v45  ;;  %v561_v6 = vld [vmem:[%s2330_s30 + $0x2b0] sm:$0xff]  ;;  %v562_v7 = vld [vmem:[%s2330_s30 + $0x2b8] sm:$0xff]  ;;  %v559_v8 = vld [vmem:[%s2330_s30 + $0x2a0] sm:$0xff] }
  0xc0   : > { %888 = vmatpush.msrb.mxu2 %v481_v46  ;;  %911 = vmatpush.msrb.mxu3 %v482_v47  ;;  %v560_v9 = vld [vmem:[%s2330_s30 + $0x2a8] sm:$0xff]  ;;  %v525_v10 = vld [vmem:[%s2330_s30 + $0x190] sm:$0xff]  ;;  %v526_v11 = vld [vmem:[%s2330_s30 + $0x198] sm:$0xff] }
  0xc1   : > { %842 = vmatpush.msrb.mxu0 %v479_v48  ;;  %865 = vmatpush.msrb.mxu1 %v480_v49  ;;  %v523_v12 = vld [vmem:[%s2330_s30 + $0x180] sm:$0xff]  ;;  %v524_v13 = vld [vmem:[%s2330_s30 + $0x188] sm:$0xff]  ;;  %v489_v14 = vld [vmem:[%s2330_s30 + $0x70] sm:$0xff] }
  0xc2   : > { %1836 = vmatpush.msk.msra.mxu2 %vm626_vm0, %v593_v50  ;;  %1839 = vmatpush.msk.msra.mxu3 %vm626_vm0, %v594_v51  ;;  %v490_v15 = vld [vmem:[%s2330_s30 + $0x78] sm:$0xff]  ;;  %v487_v16 = vld [vmem:[%s2330_s30 + $0x60] sm:$0xff]  ;;  %v488_v17 = vld [vmem:[%s2330_s30 + $0x68] sm:$0xff] }
  0xc3   : > { %1830 = vmatpush.msk.msra.mxu0 %vm626_vm0, %v591_v52  ;;  %1833 = vmatpush.msk.msra.mxu1 %vm626_vm0, %v592_v53  ;;  %v601_v18 = vld [vmem:[%s2330_s30 + $0x3f0] sm:$0x1]  ;;  %v602_v19 = vld [vmem:[%s2330_s30 + $0x3f8] sm:$0x1]  ;;  %v599_v20 = vld [vmem:[%s2330_s30 + $0x3e0] sm:$0x1] }
  0xc4   : > { %978 = vmatpush.msra.mxu2 %v557_v54  ;;  %1001 = vmatpush.msra.mxu3 %v558_v55  ;;  %v600_v21 = vld [vmem:[%s2330_s30 + $0x3e8] sm:$0x1]  ;;  %v565_v22 = vld [vmem:[%s2330_s30 + $0x2d0] sm:$0xff]  ;;  %v566_v23 = vld [vmem:[%s2330_s30 + $0x2d8] sm:$0xff] }
  0xc5   : > { %932 = vmatpush.msra.mxu0 %v555_v56  ;;  %955 = vmatpush.msra.mxu1 %v556_v57  ;;  %v563_v24 = vld [vmem:[%s2330_s30 + $0x2c0] sm:$0xff]  ;;  %v564_v25 = vld [vmem:[%s2330_s30 + $0x2c8] sm:$0xff]  ;;  %v529_v26 = vld [vmem:[%s2330_s30 + $0x1b0] sm:$0xff] }
  0xc6   : > { %1819 = vmatmul.msk.f32.vlgmr.msrb.gmra.mxu0 %vm619_vm1, %v2355_v32  ;;  %1822 = vmatmul.msk.f32.vlgmr.msrb.gmra.mxu1 %vm619_vm1, %v2355_v32  ;;  %v530_v27 = vld [vmem:[%s2330_s30 + $0x1b8] sm:$0xff]  ;;  %v527_v28 = vld [vmem:[%s2330_s30 + $0x1a0] sm:$0xff]  ;;  %v528_v29 = vld [vmem:[%s2330_s30 + $0x1a8] sm:$0xff] }
  0xc7   : > { %1825 = vmatmul.msk.f32.vlgmr.msrb.gmra.mxu2 %vm619_vm1, %v2355_v32  ;;  %1828 = vmatmul.msk.f32.vlgmr.msrb.gmra.mxu3 %vm619_vm1, %v2355_v32  ;;  %v493_v30 = vld [vmem:[%s2330_s30 + $0x90] sm:$0xff]  ;;  %v494_v31 = vld [vmem:[%s2330_s30 + $0x98] sm:$0xff]  ;;  %v491_v33 = vld [vmem:[%s2330_s30 + $0x80] sm:$0xff] }
  0xc8   : > { %979 = vmatpush.msra.mxu2 %v521_v58  ;;  %1002 = vmatpush.msra.mxu3 %v522_v59  ;;  %v492_v34 = vld [vmem:[%s2330_s30 + $0x88] sm:$0xff]  ;;  %v605_v35 = vld [vmem:[%s2330_s30 + $0x410] sm:$0x1]  ;;  %v606_v36 = vld [vmem:[%s2330_s30 + $0x418] sm:$0x1] }
  0xc9   : > { %933 = vmatpush.msra.mxu0 %v519_v60  ;;  %956 = vmatpush.msra.mxu1 %v520_v61  ;;  %v603_v37 = vld [vmem:[%s2330_s30 + $0x400] sm:$0x1]  ;;  %v604_v38 = vld [vmem:[%s2330_s30 + $0x408] sm:$0x1]  ;;  %v569_v39 = vld [vmem:[%s2330_s30 + $0x2f0] sm:$0xff] }
  0xca   : > { %980 = vmatpush.msra.mxu2 %v485_v62  ;;  %1003 = vmatpush.msra.mxu3 %v486_v63  ;;  %v570_v40 = vld [vmem:[%s2330_s30 + $0x2f8] sm:$0xff]  ;;  %v567_v41 = vld [vmem:[%s2330_s30 + $0x2e0] sm:$0xff]  ;;  %v568_v42 = vld [vmem:[%s2330_s30 + $0x2e8] sm:$0xff] }
  0xcb   : > { %934 = vmatpush.msra.mxu0 %v483_v0  ;;  %957 = vmatpush.msra.mxu1 %v484_v1  ;;  %v533_v43 = vld [vmem:[%s2330_s30 + $0x1d0] sm:$0xff]  ;;  %v534_v44 = vld [vmem:[%s2330_s30 + $0x1d8] sm:$0xff]  ;;  %v531_v46 = vld [vmem:[%s2330_s30 + $0x1c0] sm:$0xff] }
  0xcc   : > { %1848 = vmatpush.msk.msrb.mxu2 %vm626_vm0, %v597_v2  ;;  %1851 = vmatpush.msk.msrb.mxu3 %vm626_vm0, %v598_v3  ;;  %v532_v47 = vld [vmem:[%s2330_s30 + $0x1c8] sm:$0xff]  ;;  %v497_v48 = vld [vmem:[%s2330_s30 + $0xb0] sm:$0xff]  ;;  %v498_v49 = vld [vmem:[%s2330_s30 + $0xb8] sm:$0xff] }
  0xcd   : > { %1842 = vmatpush.msk.msrb.mxu0 %vm626_vm0, %v595_v4  ;;  %1845 = vmatpush.msk.msrb.mxu1 %vm626_vm0, %v596_v5  ;;  %v495_v50 = vld [vmem:[%s2330_s30 + $0xa0] sm:$0xff]  ;;  %v496_v51 = vld [vmem:[%s2330_s30 + $0xa8] sm:$0xff]  ;;  %v609_v52 = vld [vmem:[%s2330_s30 + $0x430] sm:$0x1] }
  0xce   : > { %1820 = vmatmul.msk.f32.gmra.mxu0 %vm619_vm1, %v2384_v45  ;;  %1823 = vmatmul.msk.f32.gmra.mxu1 %vm619_vm1, %v2384_v45  ;;  %v610_v53 = vld [vmem:[%s2330_s30 + $0x438] sm:$0x1]  ;;  %v607_v54 = vld [vmem:[%s2330_s30 + $0x420] sm:$0x1]  ;;  %v608_v55 = vld [vmem:[%s2330_s30 + $0x428] sm:$0x1] }
  0xcf   : > { %1826 = vmatmul.msk.f32.gmra.mxu2 %vm619_vm1, %v2384_v45  ;;  %1829 = vmatmul.msk.f32.gmra.mxu3 %vm619_vm1, %v2384_v45  ;;  %v573_v56 = vld [vmem:[%s2330_s30 + $0x310] sm:$0xff]  ;;  %v574_v57 = vld [vmem:[%s2330_s30 + $0x318] sm:$0xff]  ;;  %v571_v58 = vld [vmem:[%s2330_s30 + $0x300] sm:$0xff] }
  0xd0   : > { %1070 = vmatpush.msrb.mxu2 %v561_v6  ;;  %1093 = vmatpush.msrb.mxu3 %v562_v7  ;;  %v572_v59 = vld [vmem:[%s2330_s30 + $0x308] sm:$0xff]  ;;  %v537_v60 = vld [vmem:[%s2330_s30 + $0x1f0] sm:$0xff]  ;;  %v538_v61 = vld [vmem:[%s2330_s30 + $0x1f8] sm:$0xff] }
  0xd1   : > { %1024 = vmatpush.msrb.mxu0 %v559_v8  ;;  %1047 = vmatpush.msrb.mxu1 %v560_v9  ;;  %v535_v62 = vld [vmem:[%s2330_s30 + $0x1e0] sm:$0xff]  ;;  %v536_v63 = vld [vmem:[%s2330_s30 + $0x1e8] sm:$0xff]  ;;  %v501_v0 = vld [vmem:[%s2330_s30 + $0xd0] sm:$0xff] }
  0xd2   : > { %1071 = vmatpush.msrb.mxu2 %v525_v10  ;;  %1094 = vmatpush.msrb.mxu3 %v526_v11  ;;  %v502_v1 = vld [vmem:[%s2330_s30 + $0xd8] sm:$0xff]  ;;  %v499_v2 = vld [vmem:[%s2330_s30 + $0xc0] sm:$0xff]  ;;  %v500_v3 = vld [vmem:[%s2330_s30 + $0xc8] sm:$0xff] }
  0xd3   : > { %1025 = vmatpush.msrb.mxu0 %v523_v12  ;;  %1048 = vmatpush.msrb.mxu1 %v524_v13  ;;  %v613_v4 = vld [vmem:[%s2330_s30 + $0x450] sm:$0x1]  ;;  %v614_v5 = vld [vmem:[%s2330_s30 + $0x458] sm:$0x1]  ;;  %v611_v6 = vld [vmem:[%s2330_s30 + $0x440] sm:$0x1] }
  0xd4   : > { %1072 = vmatpush.msrb.mxu2 %v489_v14  ;;  %1095 = vmatpush.msrb.mxu3 %v490_v15  ;;  %v612_v7 = vld [vmem:[%s2330_s30 + $0x448] sm:$0x1]  ;;  %v577_v8 = vld [vmem:[%s2330_s30 + $0x330] sm:$0xff]  ;;  %v578_v9 = vld [vmem:[%s2330_s30 + $0x338] sm:$0xff] }
  0xd5   : > { %1026 = vmatpush.msrb.mxu0 %v487_v16  ;;  %1049 = vmatpush.msrb.mxu1 %v488_v17  ;;  %v575_v10 = vld [vmem:[%s2330_s30 + $0x320] sm:$0xff]  ;;  %v576_v11 = vld [vmem:[%s2330_s30 + $0x328] sm:$0xff]  ;;  %v541_v12 = vld [vmem:[%s2330_s30 + $0x210] sm:$0xff] }
  0xd6   : > { %1831 = vmatmul.msk.f32.vlgmr.msra.gmra.mxu0 %vm619_vm1, %v2355_v32  ;;  %1834 = vmatmul.msk.f32.vlgmr.msra.gmra.mxu1 %vm619_vm1, %v2355_v32  ;;  %v542_v13 = vld [vmem:[%s2330_s30 + $0x218] sm:$0xff]  ;;  %v539_v14 = vld [vmem:[%s2330_s30 + $0x200] sm:$0xff]  ;;  %v540_v15 = vld [vmem:[%s2330_s30 + $0x208] sm:$0xff] }
  0xd7   : > { %1837 = vmatmul.msk.f32.vlgmr.msra.gmra.mxu2 %vm619_vm1, %v2355_v32  ;;  %1840 = vmatmul.msk.f32.vlgmr.msra.gmra.mxu3 %vm619_vm1, %v2355_v32  ;;  %v505_v16 = vld [vmem:[%s2330_s30 + $0xf0] sm:$0xff]  ;;  %v506_v17 = vld [vmem:[%s2330_s30 + $0xf8] sm:$0xff] }
  0xd8   : > { %1860 = vmatpush.msk.msra.mxu2 %vm626_vm0, %v601_v18  ;;  %1863 = vmatpush.msk.msra.mxu3 %vm626_vm0, %v602_v19  ;;  %v503_v18 = vld [vmem:[%s2330_s30 + $0xe0] sm:$0xff]  ;;  %v504_v19 = vld [vmem:[%s2330_s30 + $0xe8] sm:$0xff] }
  0xd9   : > { %1854 = vmatpush.msk.msra.mxu0 %vm626_vm0, %v599_v20  ;;  %1857 = vmatpush.msk.msra.mxu1 %vm626_vm0, %v600_v21  ;;  %v1617_v20 = vld [vmem:[%s2935_s2] sm:$0xff]  ;;  %v1972_v21 = vmov 0  }
  0xda   : > { %1162 = vmatpush.msra.mxu2 %v565_v22  ;;  %1185 = vmatpush.msra.mxu3 %v566_v23  ;;  %v617_v22 = vld [vmem:[%s2330_s30 + $0x470] sm:$0x1]  ;;  %v618_v23 = vld [vmem:[%s2330_s30 + $0x478] sm:$0x1] }
  0xdb   : > { %1116 = vmatpush.msra.mxu0 %v563_v24  ;;  %1139 = vmatpush.msra.mxu1 %v564_v25  ;;  %v615_v24 = vld [vmem:[%s2330_s30 + $0x460] sm:$0x1]  ;;  %v616_v25 = vld [vmem:[%s2330_s30 + $0x468] sm:$0x1] }
  0xdc   : > { %1163 = vmatpush.msra.mxu2 %v529_v26  ;;  %1186 = vmatpush.msra.mxu3 %v530_v27  ;;  %v581_v26 = vld [vmem:[%s2330_s30 + $0x350] sm:$0xff]  ;;  %v582_v27 = vld [vmem:[%s2330_s30 + $0x358] sm:$0xff] }
  0xdd   : > { %1117 = vmatpush.msra.mxu0 %v527_v28  ;;  %1140 = vmatpush.msra.mxu1 %v528_v29  ;;  %v579_v28 = vld [vmem:[%s2330_s30 + $0x340] sm:$0xff]  ;;  %v580_v29 = vld [vmem:[%s2330_s30 + $0x348] sm:$0xff] }
  0xde   : > { %1832 = vmatmul.msk.f32.gmra.mxu0 %vm619_vm1, %v2384_v45  ;;  %1835 = vmatmul.msk.f32.gmra.mxu1 %vm619_vm1, %v2384_v45 }
  0xdf   : > { %1838 = vmatmul.msk.f32.gmra.mxu2 %vm619_vm1, %v2384_v45  ;;  %1841 = vmatmul.msk.f32.gmra.mxu3 %vm619_vm1, %v2384_v45 }
  0xe0   : > { %1164 = vmatpush.msra.mxu2 %v493_v30  ;;  %1187 = vmatpush.msra.mxu3 %v494_v31  ;;  %v545_v30 = vld [vmem:[%s2330_s30 + $0x230] sm:$0xff]  ;;  %v546_v31 = vld [vmem:[%s2330_s30 + $0x238] sm:$0xff] }
  0xe1   : > { %1118 = vmatpush.msra.mxu0 %v491_v33  ;;  %1141 = vmatpush.msra.mxu1 %v492_v34  ;;  %v1618_v33 = vld [vmem:[%s2935_s2 + $0x8] sm:$0x3]  ;;  %v543_v34 = vld [vmem:[%s2330_s30 + $0x220] sm:$0xff] }
  0xe2   : > { %1947 = vset.pattern.permute.xlu0 %v1972_v21 }
  0xe3   : > { %1621 = vperm.xlu0 %1947, %v1617_v20  }
  0xe6   : > { %1843 = vmatmul.msk.f32.vlgmr.msrb.gmra.mxu0 %vm619_vm1, %v2355_v32  ;;  %1846 = vmatmul.msk.f32.vlgmr.msrb.gmra.mxu1 %vm619_vm1, %v2355_v32 }
  0xe7   : > { %1849 = vmatmul.msk.f32.vlgmr.msrb.gmra.mxu2 %vm619_vm1, %v2355_v32  ;;  %1852 = vmatmul.msk.f32.vlgmr.msrb.gmra.mxu3 %vm619_vm1, %v2355_v32 }
  0xe8   : > { %1872 = vmatpush.msk.msrb.mxu2 %vm626_vm0, %v605_v35  ;;  %1875 = vmatpush.msk.msrb.mxu3 %vm626_vm0, %v606_v36  ;;  %v509_v35 = vld [vmem:[%s2330_s30 + $0x110] sm:$0xff]  ;;  %v510_v36 = vld [vmem:[%s2330_s30 + $0x118] sm:$0xff] }
  0xe9   : > { %1866 = vmatpush.msk.msrb.mxu0 %vm626_vm0, %v603_v37  ;;  %1869 = vmatpush.msk.msrb.mxu1 %vm626_vm0, %v604_v38  ;;  %v544_v37 = vld [vmem:[%s2330_s30 + $0x228] sm:$0xff]  ;;  %v507_v38 = vld [vmem:[%s2330_s30 + $0x100] sm:$0xff] }
  0xea   : > { %1254 = vmatpush.msrb.mxu2 %v569_v39  ;;  %1277 = vmatpush.msrb.mxu3 %v570_v40  ;;  %v508_v39 = vld [vmem:[%s2330_s30 + $0x108] sm:$0xff] }
  0xeb   : > { %1208 = vmatpush.msrb.mxu0 %v567_v41  ;;  %1231 = vmatpush.msrb.mxu1 %v568_v42 }
  0xec   : > { %1255 = vmatpush.msrb.mxu2 %v533_v43  ;;  %1278 = vmatpush.msrb.mxu3 %v534_v44 }
  0xed   : > { %1209 = vmatpush.msrb.mxu0 %v531_v46  ;;  %1232 = vmatpush.msrb.mxu1 %v532_v47 }
  0xee   : > { %1844 = vmatmul.msk.f32.gmra.mxu0 %vm619_vm1, %v2384_v45  ;;  %1847 = vmatmul.msk.f32.gmra.mxu1 %vm619_vm1, %v2384_v45 }
  0xef   : > { %1850 = vmatmul.msk.f32.gmra.mxu2 %vm619_vm1, %v2384_v45  ;;  %1853 = vmatmul.msk.f32.gmra.mxu3 %vm619_vm1, %v2384_v45 }
  0xf0   : > { %1256 = vmatpush.msrb.mxu2 %v497_v48  ;;  %1279 = vmatpush.msrb.mxu3 %v498_v49 }
  0xf1   : > { %1210 = vmatpush.msrb.mxu0 %v495_v50  ;;  %1233 = vmatpush.msrb.mxu1 %v496_v51 }
  0xf2   : > { %1626 = vperm.xlu0 %1947, %v1618_v33  }
  0xf6   : > { %1855 = vmatmul.msk.f32.vlgmr.msra.gmra.mxu0 %vm619_vm1, %v2355_v32  ;;  %1858 = vmatmul.msk.f32.vlgmr.msra.gmra.mxu1 %vm619_vm1, %v2355_v32 }
  0xf7   : > { %1861 = vmatmul.msk.f32.vlgmr.msra.gmra.mxu2 %vm619_vm1, %v2355_v32  ;;  %1864 = vmatmul.msk.f32.vlgmr.msra.gmra.mxu3 %vm619_vm1, %v2355_v32 }
  0xf8   : > { %1884 = vmatpush.msk.msra.mxu2 %vm626_vm0, %v609_v52  ;;  %1887 = vmatpush.msk.msra.mxu3 %vm626_vm0, %v610_v53 }
  0xf9   : > { %1878 = vmatpush.msk.msra.mxu0 %vm626_vm0, %v607_v54  ;;  %1881 = vmatpush.msk.msra.mxu1 %vm626_vm0, %v608_v55 }
  0xfa   : > { %1346 = vmatpush.msra.mxu2 %v573_v56  ;;  %1369 = vmatpush.msra.mxu3 %v574_v57 }
  0xfb   : > { %1300 = vmatpush.msra.mxu0 %v571_v58  ;;  %1323 = vmatpush.msra.mxu1 %v572_v59 }
  0xfc   : > { %1347 = vmatpush.msra.mxu2 %v537_v60  ;;  %1370 = vmatpush.msra.mxu3 %v538_v61 }
  0xfd   : > { %1301 = vmatpush.msra.mxu0 %v535_v62  ;;  %1324 = vmatpush.msra.mxu1 %v536_v63 }
  0xfe   : > { %1856 = vmatmul.msk.f32.gmra.mxu0 %vm619_vm1, %v2384_v45  ;;  %1859 = vmatmul.msk.f32.gmra.mxu1 %vm619_vm1, %v2384_v45 }
  0xff   : > { %1862 = vmatmul.msk.f32.gmra.mxu2 %vm619_vm1, %v2384_v45  ;;  %1865 = vmatmul.msk.f32.gmra.mxu3 %vm619_vm1, %v2384_v45 }
 0x100   : > { %1348 = vmatpush.msra.mxu2 %v501_v0  ;;  %1371 = vmatpush.msra.mxu3 %v502_v1 }
 0x101   : > { %1302 = vmatpush.msra.mxu0 %v499_v2  ;;  %1325 = vmatpush.msra.mxu1 %v500_v3 }
 0x106   : > { %1867 = vmatmul.msk.f32.vlgmr.msrb.gmra.mxu0 %vm619_vm1, %v2355_v32  ;;  %1870 = vmatmul.msk.f32.vlgmr.msrb.gmra.mxu1 %vm619_vm1, %v2355_v32 }
 0x107   : > { %1873 = vmatmul.msk.f32.vlgmr.msrb.gmra.mxu2 %vm619_vm1, %v2355_v32  ;;  %1876 = vmatmul.msk.f32.vlgmr.msrb.gmra.mxu3 %vm619_vm1, %v2355_v32 }
 0x108   : > { %1896 = vmatpush.msk.msrb.mxu2 %vm626_vm0, %v613_v4  ;;  %1899 = vmatpush.msk.msrb.mxu3 %vm626_vm0, %v614_v5 }
 0x109   : > { %1890 = vmatpush.msk.msrb.mxu0 %vm626_vm0, %v611_v6  ;;  %1893 = vmatpush.msk.msrb.mxu1 %vm626_vm0, %v612_v7 }
 0x10a   : > { %1438 = vmatpush.msrb.mxu2 %v577_v8  ;;  %1461 = vmatpush.msrb.mxu3 %v578_v9 }
 0x10b   : > { %1392 = vmatpush.msrb.mxu0 %v575_v10  ;;  %1415 = vmatpush.msrb.mxu1 %v576_v11 }
 0x10c   : > { %1439 = vmatpush.msrb.mxu2 %v541_v12  ;;  %1462 = vmatpush.msrb.mxu3 %v542_v13 }
 0x10d   : > { %1393 = vmatpush.msrb.mxu0 %v539_v14  ;;  %1416 = vmatpush.msrb.mxu1 %v540_v15 }
 0x10e   : > { %1868 = vmatmul.msk.f32.gmra.mxu0 %vm619_vm1, %v2384_v45  ;;  %1871 = vmatmul.msk.f32.gmra.mxu1 %vm619_vm1, %v2384_v45 }
 0x10f   : > { %1874 = vmatmul.msk.f32.gmra.mxu2 %vm619_vm1, %v2384_v45  ;;  %1877 = vmatmul.msk.f32.gmra.mxu3 %vm619_vm1, %v2384_v45 }
 0x110   : > { %1440 = vmatpush.msrb.mxu2 %v505_v16  ;;  %1463 = vmatpush.msrb.mxu3 %v506_v17 }
 0x111   : > { %1394 = vmatpush.msrb.mxu0 %v503_v18  ;;  %1417 = vmatpush.msrb.mxu1 %v504_v19 }
 0x116   : > { %1879 = vmatmul.msk.f32.vlgmr.msra.gmra.mxu0 %vm619_vm1, %v2355_v32  ;;  %1882 = vmatmul.msk.f32.vlgmr.msra.gmra.mxu1 %vm619_vm1, %v2355_v32 }
 0x117   : > { %1885 = vmatmul.msk.f32.vlgmr.msra.gmra.mxu2 %vm619_vm1, %v2355_v32  ;;  %1888 = vmatmul.msk.f32.vlgmr.msra.gmra.mxu3 %vm619_vm1, %v2355_v32 }
 0x118   : > { %1908 = vmatpush.msk.msra.mxu2 %vm626_vm0, %v617_v22  ;;  %1911 = vmatpush.msk.msra.mxu3 %vm626_vm0, %v618_v23 }
 0x119   : > { %1902 = vmatpush.msk.msra.mxu0 %vm626_vm0, %v615_v24  ;;  %1905 = vmatpush.msk.msra.mxu1 %vm626_vm0, %v616_v25 }
 0x11a   : > { %1530 = vmatpush.msra.mxu2 %v581_v26  ;;  %1553 = vmatpush.msra.mxu3 %v582_v27 }
 0x11b   : > { %1484 = vmatpush.msra.mxu0 %v579_v28  ;;  %1507 = vmatpush.msra.mxu1 %v580_v29 }
 0x11c   : > { %1531 = vmatpush.msra.mxu2 %v545_v30  ;;  %1554 = vmatpush.msra.mxu3 %v546_v31 }
 0x11d   : > { %1485 = vmatpush.msra.mxu0 %v543_v34  ;;  %1508 = vmatpush.msra.mxu1 %v544_v37 }
 0x11e   : > { %1880 = vmatmul.msk.f32.gmra.mxu0 %vm619_vm1, %v2384_v45  ;;  %1883 = vmatmul.msk.f32.gmra.mxu1 %vm619_vm1, %v2384_v45 }
 0x11f   : > { %1886 = vmatmul.msk.f32.gmra.mxu2 %vm619_vm1, %v2384_v45  ;;  %1889 = vmatmul.msk.f32.gmra.mxu3 %vm619_vm1, %v2384_v45 }
 0x120   : > { %1532 = vmatpush.msra.mxu2 %v509_v35  ;;  %1555 = vmatpush.msra.mxu3 %v510_v36 }
 0x121   : > { %1486 = vmatpush.msra.mxu0 %v507_v38  ;;  %1509 = vmatpush.msra.mxu1 %v508_v39 }
 0x126   : > { %1891 = vmatmul.msk.f32.vlgmr.msrb.gmra.mxu0 %vm619_vm1, %v2355_v32  ;;  %1894 = vmatmul.msk.f32.vlgmr.msrb.gmra.mxu1 %vm619_vm1, %v2355_v32 }
 0x127   : > { %1897 = vmatmul.msk.f32.vlgmr.msrb.gmra.mxu2 %vm619_vm1, %v2355_v32  ;;  %1900 = vmatmul.msk.f32.vlgmr.msrb.gmra.mxu3 %vm619_vm1, %v2355_v32 }
 0x12e   : > { %1892 = vmatmul.msk.f32.gmra.mxu0 %vm619_vm1, %v2384_v45  ;;  %1895 = vmatmul.msk.f32.gmra.mxu1 %vm619_vm1, %v2384_v45 }
 0x12f   : > { %1898 = vmatmul.msk.f32.gmra.mxu2 %vm619_vm1, %v2384_v45  ;;  %1901 = vmatmul.msk.f32.gmra.mxu3 %vm619_vm1, %v2384_v45 }
 0x133   : > { %v2656_v40 = vpop.f32.mrf.mxu0  ;;  %v2658_v41 = vpop.f32.mrf.mxu1 }
 0x136   : > { %1903 = vmatmul.msk.f32.vlgmr.msra.gmra.mxu0 %vm619_vm1, %v2355_v32  ;;  %1906 = vmatmul.msk.f32.vlgmr.msra.gmra.mxu1 %vm619_vm1, %v2355_v32 }
 0x137   : > { %1909 = vmatmul.msk.f32.vlgmr.msra.gmra.mxu2 %vm619_vm1, %v2355_v32  ;;  %1912 = vmatmul.msk.f32.vlgmr.msra.gmra.mxu3 %vm619_vm1, %v2355_v32 }
 0x13a   : > { %v2668_v42 = vpop.f32.mrf.mxu2  ;;  %v2670_v43 = vpop.f32.mrf.mxu3 }
 0x13b   : > { %v2672_v44 = vpop.f32.mrf.mxu0  ;;  %v2674_v46 = vpop.f32.mrf.mxu1 }
 0x13e   : > { %1904 = vmatmul.msk.f32.gmra.mxu0 %vm619_vm1, %v2384_v45  ;;  %1907 = vmatmul.msk.f32.gmra.mxu1 %vm619_vm1, %v2384_v45 }
 0x13f   : > { %1910 = vmatmul.msk.f32.gmra.mxu2 %vm619_vm1, %v2384_v45  ;;  %1913 = vmatmul.msk.f32.gmra.mxu3 %vm619_vm1, %v2384_v45 }
 0x142   : > { %v2684_v32 = vpop.f32.mrf.mxu2  ;;  %v2686_v47 = vpop.f32.mrf.mxu3 }
 0x143   : > { %v2688_v48 = vpop.f32.mrf.mxu0  ;;  %v2690_v49 = vpop.f32.mrf.mxu1 }
 0x14a   : > { %v2692_v50 = vpop.f32.mrf.mxu2  ;;  %v2694_v51 = vpop.f32.mrf.mxu3 }
 0x14b   : > { %v2696_v52 = vpop.f32.mrf.mxu0  ;;  %v2698_v53 = vpop.f32.mrf.mxu1 }
 0x152   : > { %v2700_v54 = vpop.f32.mrf.mxu2  ;;  %v2702_v55 = vpop.f32.mrf.mxu3 }
 0x153   : > { %v2704_v45 = vpop.f32.mrf.mxu0  ;;  %v959_v56 = vpop.f32.mrf.mxu1 }
 0x154   : > { %v1563_v57 = vmax.f32 %v2656_v40, %v959_v56 }
 0x155   : > { %v2778_v56 = vpop.permute.xlu0 %1621 }
 0x15a   : > { %v2707_v58 = vpop.f32.mrf.mxu2  ;;  %v2709_v59 = vpop.f32.mrf.mxu3 }
 0x15b   : > { %v1564_v60 = vmax.f32 %v2658_v41, %v2707_v58  ;;  %v1565_v61 = vmax.f32 %v2668_v42, %v2709_v59  ;;  %v2715_v62 = vpop.f32.mrf.mxu0  ;;  %v962_v63 = vpop.f32.mrf.mxu1 }
 0x15c   : > { %v1572_v0 = vmax.f32 %v2672_v44, %v962_v63 }
 0x162   : > { %v2718_v1 = vpop.f32.mrf.mxu2  ;;  %v2720_v2 = vpop.f32.mrf.mxu3 }
 0x163   : > { %v1573_v3 = vmax.f32 %v2674_v46, %v2718_v1  ;;  %v2726_v5 = vpop.f32.mrf.mxu0  ;;  %v2728_v6 = vpop.f32.mrf.mxu1 }
 0x164   : > { %v1566_v7 = vmax.f32 %v2670_v43, %v2726_v5  ;;  %v1567_v8 = vmax.f32 %v2688_v48, %v2728_v6  ;;  %v2792_v12 = vpop.permute.xlu0 %1626 }
 0x16a   : > { %v2734_v9 = vpop.f32.mrf.mxu2  ;;  %v2736_v10 = vpop.f32.mrf.mxu3 }
 0x16b   : > { %v2742_v13 = vpop.f32.mrf.mxu0  ;;  %v2744_v14 = vpop.f32.mrf.mxu1 }
 0x172   : > { %v2750_v17 = vpop.f32.mrf.mxu2  ;;  %v2752_v18 = vpop.f32.mrf.mxu3 }
 0x173   : > { %v2758_v21 = vpop.f32.mrf.mxu0  ;;  %v2760_v22 = vpop.f32.mrf.mxu1 }
 0x17a   : > { %v1166_v25 = vpop.f32.mrf.mxu2  ;;  %v1189_v26 = vpop.f32.mrf.mxu3 }
 0x17b   : > { %v2766_v27 = vpop.f32.mrf.mxu0  ;;  %v2768_v28 = vpop.f32.mrf.mxu1  ;;  %v1581_v58 = vmax.f32 %v1563_v57, %v1166_v25  ;;  %v1582_v57 = vmax.f32 %v1564_v60, %v1189_v26 }
 0x182   : > { %v1169_v31 = vpop.f32.mrf.mxu2  ;;  %v1192_v33 = vpop.f32.mrf.mxu3 }
 0x183   : > { %v1212_v34 = vpop.f32.mrf.mxu0  ;;  %v1235_v35 = vpop.f32.mrf.mxu1  ;;  %v1590_v23 = vmax.f32 %v1572_v0, %v1169_v31 }
 0x184   : > { %v1583_v25 = vmax.f32 %v1565_v61, %v1212_v34  ;;  %v1584_v26 = vmax.f32 %v1566_v7, %v1235_v35 }
 0x18a   : > { %v1258_v36 = vpop.f32.mrf.mxu2  ;;  %v1281_v37 = vpop.f32.mrf.mxu3 }
 0x18b   : > { %v1215_v38 = vpop.f32.mrf.mxu0  ;;  %v1238_v39 = vpop.f32.mrf.mxu1 }
 0x192   : > { %v1261_v40 = vpop.f32.mrf.mxu2  ;;  %v2774_v41 = vpop.f32.mrf.mxu3 }
 0x193   : > { %v1304_v42 = vpop.f32.mrf.mxu0  ;;  %v2776_v44 = vpop.f32.mrf.mxu1 }
 0x19a   : > { %v2780_v59 = vpop.f32.mrf.mxu2  ;;  %v1373_v63 = vpop.f32.mrf.mxu3 }
 0x19b   : > { %v1599_v30 = vmax.f32 %v1581_v58, %v1373_v63  ;;  %v2784_v29 = vpop.f32.mrf.mxu0  ;;  %v2786_v20 = vpop.f32.mrf.mxu1 }
 0x19d   : > { %v1629_v19 = vadd.f32 %v2778_v56, %v1599_v30 }
 0x19f   : > { %v1647_v24 = vmax.f32 %v1629_v19, 0.0 }
 0x1a1   : > { %1665 = vst [vmem:[%s2789_s18] sm:$0xff] %v1647_v24 }
 0x1a2   : > { %v2794_v11 = vpop.f32.mrf.mxu2  ;;  %v1376_v58 = vpop.f32.mrf.mxu3 }
 0x1a3   : > { %v1608_v63 = vmax.f32 %v1590_v23, %v1376_v58  ;;  %v1396_v16 = vpop.f32.mrf.mxu0  ;;  %v1419_v15 = vpop.f32.mrf.mxu1  ;;  %v1585_v23 = vmax.f32 %v1567_v8, %v1258_v36  ;;  %v2939_v36 = vmax.f32 %v2686_v47, %v2742_v13  ;;  %v2940_v58 = vmax.f32 %v2696_v52, %v2744_v14 }
 0x1a4   : > { %v1600_v4 = vmax.f32 %v1582_v57, %v1396_v16  ;;  %v1601_v19 = vmax.f32 %v1583_v25, %v1419_v15  ;;  %v1591_v15 = vmax.f32 %v1573_v3, %v1192_v33 }
 0x1a5   : > { %v1638_v0 = vadd.f32 %v2792_v12, %v1608_v63  ;;  %v1594_v63 = vmax.f32 %v2940_v58, %v1261_v40 }
 0x1a6   : > { %v1630_v30 = vadd.f32 %v2778_v56, %v1600_v4  ;;  %v1631_v24 = vadd.f32 %v2778_v56, %v1601_v19  ;;  %v2938_v4 = vmax.f32 %v2684_v32, %v2720_v2  ;;  %v2941_v19 = vmax.f32 %v2690_v49, %v2734_v9 }
 0x1a7   : > { %v1656_v31 = vmax.f32 %v1638_v0, 0.0 }
 0x1a8   : > { %v1648_v60 = vmax.f32 %v1630_v30, 0.0  ;;  %v1649_v61 = vmax.f32 %v1631_v24, 0.0  ;;  %v1592_v16 = vmax.f32 %v2938_v4, %v1215_v38  ;;  %v1593_v38 = vmax.f32 %v2939_v36, %v1238_v39 }
 0x1a9   : > { %1674 = vst [vmem:[%s2789_s18 + $0x48] sm:$0x3] %v1656_v31  ;;  %v1586_v0 = vmax.f32 %v2941_v19, %v1281_v37  ;;  %v2942_v30 = vmax.f32 %v2692_v50, %v2736_v10  ;;  %v2944_v4 = vmax.f32 %v2704_v45, %v2760_v22 }
 0x1aa   : > { %1666 = vst [vmem:[%s2789_s18 + $0x8] sm:$0xff] %v1648_v60  ;;  %v1442_v34 = vpop.f32.mrf.mxu2  ;;  %v1465_v57 = vpop.f32.mrf.mxu3 }
 0x1ab   : > { %1667 = vst [vmem:[%s2789_s18 + $0x10] sm:$0xff] %v1649_v61  ;;  %v1602_v25 = vmax.f32 %v1584_v26, %v1442_v34  ;;  %v1603_v43 = vmax.f32 %v1585_v23, %v1465_v57  ;;  %v1399_v5 = vpop.f32.mrf.mxu0  ;;  %v1422_v7 = vpop.f32.mrf.mxu1  ;;  %v1587_v24 = vmax.f32 %v2942_v30, %v1304_v42  ;;  %v2943_v23 = vmax.f32 %v2694_v51, %v2758_v21 }
 0x1ac   : > { %v1609_v48 = vmax.f32 %v1591_v15, %v1399_v5  ;;  %v1610_v6 = vmax.f32 %v1592_v16, %v1422_v7  ;;  %v1589_v16 = vmax.f32 %v2944_v4, %v2780_v59  ;;  %v2945_v34 = vmax.f32 %v2698_v53, %v2750_v17 }
 0x1ad   : > { %v1632_v8 = vadd.f32 %v2778_v56, %v1602_v25  ;;  %v1633_v46 = vadd.f32 %v2778_v56, %v1603_v43  ;;  %v1588_v15 = vmax.f32 %v2943_v23, %v2776_v44  ;;  %v2946_v25 = vmax.f32 %v2700_v54, %v2752_v18 }
 0x1ae   : > { %v1639_v32 = vadd.f32 %v2792_v12, %v1609_v48  ;;  %v1640_v1 = vadd.f32 %v2792_v12, %v1610_v6  ;;  %v1595_v57 = vmax.f32 %v2945_v34, %v2774_v41 }
 0x1af   : > { %v1650_v2 = vmax.f32 %v1632_v8, 0.0  ;;  %v1651_v3 = vmax.f32 %v1633_v46, 0.0  ;;  %v1596_v43 = vmax.f32 %v2946_v25, %v2784_v29  ;;  %v2947_v8 = vmax.f32 %v2702_v55, %v2766_v27 }
 0x1b0   : > { %v1657_v33 = vmax.f32 %v1639_v32, 0.0  ;;  %v1658_v35 = vmax.f32 %v1640_v1, 0.0 }
 0x1b1   : > { %1668 = vst [vmem:[%s2789_s18 + $0x18] sm:$0xff] %v1650_v2  ;;  %v1597_v46 = vmax.f32 %v2947_v8, %v2786_v20 }
 0x1b2   : > { %1669 = vst [vmem:[%s2789_s18 + $0x20] sm:$0xff] %v1651_v3  ;;  %v1445_v31 = vpop.f32.mrf.mxu2  ;;  %v1468_v60 = vpop.f32.mrf.mxu3 }
 0x1b3   : > { %1675 = vst [vmem:[%s2789_s18 + $0x50] sm:$0x3] %v1657_v33  ;;  %v1611_v61 = vmax.f32 %v1593_v38, %v1445_v31  ;;  %v1612_v47 = vmax.f32 %v1594_v63, %v1468_v60  ;;  %v1488_v13 = vpop.f32.mrf.mxu0  ;;  %v1511_v39 = vpop.f32.mrf.mxu1 }
 0x1b4   : > { %1676 = vst [vmem:[%s2789_s18 + $0x58] sm:$0x3] %v1658_v35  ;;  %v1604_v52 = vmax.f32 %v1586_v0, %v1488_v13  ;;  %v1605_v14 = vmax.f32 %v1587_v24, %v1511_v39  ;;  %v1723_v0 = vld [vmem:[%s2789_s18 + $0x48] sm:$0xff] (%p2023_p5) }
 0x1b5   : > { %v1641_v49 = vadd.f32 %v2792_v12, %v1611_v61  ;;  %v1642_v9 = vadd.f32 %v2792_v12, %v1612_v47  ;;  %1724 = vst [vmem:[%s2887_s20 + $0x90] sm:$0xff] (%p2023_p5), %v1723_v0 }
 0x1b6   : > { %v1634_v50 = vadd.f32 %v2778_v56, %v1604_v52  ;;  %v1635_v10 = vadd.f32 %v2778_v56, %v1605_v14 }
 0x1b7   : > { %v1659_v37 = vmax.f32 %v1641_v49, 0.0  ;;  %v1660_v40 = vmax.f32 %v1642_v9, 0.0 }
 0x1b8   : > { %v1652_v42 = vmax.f32 %v1634_v50, 0.0  ;;  %v1653_v26 = vmax.f32 %v1635_v10, 0.0  ;;  %v1711_v20 = vld [vmem:[%s2789_s18 + $0x18] sm:$0xff] (%p2023_p5) }
 0x1b9   : > { %1677 = vst [vmem:[%s2789_s18 + $0x60] sm:$0x3] %v1659_v37 }
 0x1ba   : > { %1678 = vst [vmem:[%s2789_s18 + $0x68] sm:$0x3] %v1660_v40  ;;  %v1534_v5 = vpop.f32.mrf.mxu2  ;;  %v1557_v51 = vpop.f32.mrf.mxu3  ;;  %v1725_v30 = vld [vmem:[%s2789_s18 + $0x50] sm:$0xff] (%p2023_p5) }
 0x1bb   : > { %1670 = vst [vmem:[%s2789_s18 + $0x28] sm:$0xff] %v1652_v42  ;;  %v1606_v21 = vmax.f32 %v1588_v15, %v1534_v5  ;;  %v1607_v44 = vmax.f32 %v1589_v16, %v1557_v51  ;;  %v1491_v45 = vpop.f32.mrf.mxu0  ;;  %v1514_v22 = vpop.f32.mrf.mxu1  ;;  %v1727_v24 = vld [vmem:[%s2789_s18 + $0x58] sm:$0xff] (%p2023_p5) }
 0x1bc   : > { %1671 = vst [vmem:[%s2789_s18 + $0x30] sm:$0xff] %v1653_v26  ;;  %v1613_v59 = vmax.f32 %v1595_v57, %v1491_v45  ;;  %v1614_v53 = vmax.f32 %v1596_v43, %v1514_v22 }
 0x1bd   : > { %v1636_v17 = vadd.f32 %v2778_v56, %v1606_v21  ;;  %v1637_v41 = vadd.f32 %v2778_v56, %v1607_v44  ;;  %v2948_v56 = vmax.f32 %v2715_v62, %v2768_v28  ;;  %v1705_v62 = vld [vmem:[%s2789_s18] sm:$0xff] (%p2023_p5)  ;;  %1712 = vst [vmem:[%s2887_s20 + $0x18] sm:$0xff] (%p2023_p5), %v1711_v20 }
 0x1be   : > { %v1643_v54 = vadd.f32 %v2792_v12, %v1613_v59  ;;  %v1644_v18 = vadd.f32 %v2792_v12, %v1614_v53  ;;  %1706 = vst [vmem:[%s2887_s20] sm:$0xff] (%p2023_p5), %v1705_v62  ;;  %v1713_v28 = vld [vmem:[%s2789_s18 + $0x20] sm:$0xff] (%p2023_p5) }
 0x1bf   : > { %v1654_v29 = vmax.f32 %v1636_v17, 0.0  ;;  %v1655_v7 = vmax.f32 %v1637_v41, 0.0  ;;  %v1598_v32 = vmax.f32 %v2948_v56, %v2794_v11  ;;  %v1707_v11 = vld [vmem:[%s2789_s18 + $0x8] sm:$0xff] (%p2023_p5)  ;;  %1714 = vst [vmem:[%s2887_s20 + $0x20] sm:$0xff] (%p2023_p5), %v1713_v28 }
 0x1c0   : > { %v1661_v48 = vmax.f32 %v1643_v54, 0.0  ;;  %v1662_v6 = vmax.f32 %v1644_v18, 0.0  ;;  %1708 = vst [vmem:[%s2887_s20 + $0x8] sm:$0xff] (%p2023_p5), %v1707_v11  ;;  %v1729_v31 = vld [vmem:[%s2789_s18 + $0x60] sm:$0xff] (%p2023_p5) }
 0x1c1   : > { %1672 = vst [vmem:[%s2789_s18 + $0x38] sm:$0xff] %v1654_v29  ;;  %v1731_v60 = vld [vmem:[%s2789_s18 + $0x68] sm:$0xff] (%p2023_p5) }
 0x1c2   : > { %1673 = vst [vmem:[%s2789_s18 + $0x40] sm:$0xff] %v1655_v7  ;;  %v1537_v1 = vpop.f32.mrf.mxu2  ;;  %v1560_v2 = vpop.f32.mrf.mxu3  ;;  %v1715_v38 = vld [vmem:[%s2789_s18 + $0x28] sm:$0xff] (%p2023_p5) }
 0x1c3   : > { %1679 = vst [vmem:[%s2789_s18 + $0x70] sm:$0x3] %v1661_v48  ;;  %v1615_v3 = vmax.f32 %v1597_v46, %v1537_v1  ;;  %v1616_v33 = vmax.f32 %v1598_v32, %v1560_v2  ;;  %v1717_v58 = vld [vmem:[%s2789_s18 + $0x30] sm:$0xff] (%p2023_p5) }
 0x1c4   : > { %1680 = vst [vmem:[%s2789_s18 + $0x78] sm:$0x3] %v1662_v6 }
 0x1c5   : > { %v1645_v35 = vadd.f32 %v2792_v12, %v1615_v3  ;;  %v1646_v36 = vadd.f32 %v2792_v12, %v1616_v33  ;;  %v1709_v12 = vld [vmem:[%s2789_s18 + $0x10] sm:$0xff] (%p2023_p5)  ;;  %1716 = vst [vmem:[%s2887_s20 + $0x28] sm:$0xff] (%p2023_p5), %v1715_v38 }
 0x1c6   : > { %1689 = sbr.rel (!%p2023_p5) target bundleno = 468 (0x1d4), region = 59  ;;  %1710 = vst [vmem:[%s2887_s20 + $0x10] sm:$0xff] (%p2023_p5), %v1709_v12 }
 0x1c7   : > { %v1663_v55 = vmax.f32 %v1645_v35, 0.0  ;;  %v1664_v27 = vmax.f32 %v1646_v36, 0.0  ;;  %1718 = vst [vmem:[%s2887_s20 + $0x30] sm:$0xff] (%p2023_p5), %v1717_v58 }
 0x1c8   : > { %v1719_v63 = vld [vmem:[%s2789_s18 + $0x38] sm:$0xff] (%p2023_p5)  ;;  %1726 = vst [vmem:[%s2887_s20 + $0x98] sm:$0xff] (%p2023_p5), %v1725_v30 }
 0x1c9   : > { %1681 = vst [vmem:[%s2789_s18 + $0x80] sm:$0x3] %v1663_v55  ;;  %v1721_v19 = vld [vmem:[%s2789_s18 + $0x40] sm:$0xff] (%p2023_p5) }
 0x1ca   : > { %1682 = vst [vmem:[%s2789_s18 + $0x88] sm:$0x3] %v1664_v27  ;;  %v1733_v61 = vld [vmem:[%s2789_s18 + $0x70] sm:$0xff] (%p2023_p5) }
 0x1cb   : > { %1720 = vst [vmem:[%s2887_s20 + $0x38] sm:$0xff] %v1719_v63  ;;  %v1735_v47 = vld [vmem:[%s2789_s18 + $0x78] sm:$0xff] }
 0x1cc   : > { %1722 = vst [vmem:[%s2887_s20 + $0x40] sm:$0xff] %v1721_v19 }
 0x1cd   : > { %1728 = vst [vmem:[%s2887_s20 + $0xa0] sm:$0xff] %v1727_v24 }
 0x1ce   : > { %1730 = vst [vmem:[%s2887_s20 + $0xa8] sm:$0xff] %v1729_v31 }
 0x1cf   : > { %1732 = vst [vmem:[%s2887_s20 + $0xb0] sm:$0xff] %v1731_v60 }
 0x1d0   : > { %v1737_v13 = vld [vmem:[%s2789_s18 + $0x80] sm:$0xff]  ;;  %1734 = vst [vmem:[%s2887_s20 + $0xb8] sm:$0xff] %v1733_v61 }
 0x1d1   : > { %v1739_v39 = vld [vmem:[%s2789_s18 + $0x88] sm:$0xff]  ;;  %1736 = vst [vmem:[%s2887_s20 + $0xc0] sm:$0xff] %v1735_v47 }
 0x1d2   : > { %1738 = vst [vmem:[%s2887_s20 + $0xc8] sm:$0xff] %v1737_v13 }
 0x1d3   : > { %1740 = vst [vmem:[%s2887_s20 + $0xd0] sm:$0xff] %v1739_v39 }
 0x1d4 PF: > { %p10_p10 = scmp.ge.s32.totalorder %s2010_s16, 4   ;;  %s2949_s12 = smov %s1966_s13 }
 0x1d5   : > { %s2950_s13 = smov %s2021_s19  ;;  %s2951_s14 = smov %s2010_s16 }
 0x1d6   :  { %12 = sbr.rel (!%p10_p10) target bundleno = 2 (0x2), region = 113 }

// kernel: net_forward.3
= control target key start
LH: loop header
LB: loop body
LE: loop exit
PB: predicated region body
PF: predicated region fallthrough
CT: control target
= control target key end

     0   :  { %s1962_s27 = smov 0   ;;  %s1964_s28 = smov 0   ;;  %s3198_s0 = inlined_call_operand.vmem [shape: f32[250,1024], index: 0, kind: input, shape index: {}]   ;;  %s3199_s1 = inlined_call_operand.vmem [shape: f32[20,250], index: 1, kind: input, shape index: {}]   ;;  %s3200_s2 = inlined_call_operand.vmem [shape: f32[20,1], index: 2, kind: input, shape index: {}]   ;;  %s3201_s3 = inlined_call_operand.vmem [shape: f32[20,50,128], index: 3, kind: input, shape index: {}]   ;;  %s3202_s4 = inlined_call_operand.vmem [shape: f32[50,1], index: 4, kind: input, shape index: {}]   ;;  %s3203_s5 = inlined_call_operand.vmem [shape: f32[128,8], index: 5, kind: input, shape index: {}]   ;;  %s3204_s6 = inlined_call_operand.vmem [shape: f32[10,50], index: 6, kind: input, shape index: {}]   ;;  %s3205_s7 = inlined_call_operand.vmem [shape: f32[10,1], index: 7, kind: input, shape index: {}]   ;;  %s3206_s8 = inlined_call_operand.vmem [shape: f32[2,10,8], index: 8, kind: output, shape index: {}]  }
   0x1   :  { %s1966_s29 = smov 0  }
   0x2 LB: > { %s1675_s30 = sadd.s32 4294967295, %s1914_s29   ;;  %s1979_s9 = sadd.s32 1, %s1914_s29   ;;  %s1914_s29 = sphi %s1966_s29, %s3209_s29   ;;  %s1910_s28 = sphi %s1964_s28, %s3208_s28   ;;  %s1906_s27 = sphi %s1962_s27, %s3207_s27  }
   0x3   : > { %s22_s10 = ssub.s32 %s1914_s29, %s1979_s9  ;;  %s25_s11 = sadd.s32 1, %s1910_s28 }
   0x4   : > { %p23_p0 = scmp.eq.s32.totalorder %s22_s10, 0  ;;  %p32_p1 = scmp.ne.s32.totalorder %s1910_s28, %s1906_s27 }
   0x5   : > { %p33_p2 = scmp.eq.s32.totalorder %s1914_s29, 0  ;;  %p1678_p4 = scmp.ge.s32.totalorder %s1914_s29, 2 }
   0x6   : > { %s1988_s12 = scalar_select %p23_p0, %s1910_s28, %s25_s11  }
   0x7   : > { %p34_p3 = por %p33_p2, %p32_p1  ;;  %252 = sbr.rel (%p1678_p4) target bundleno = 144 (0x90), region = 44 }
   0xc   : > { %255 = sbr.rel (!%p34_p3) target bundleno = 144 (0x90), region = 48  ;;  %s257_s13 = sand.u32 (%p34_p3), 1, %s1910_s28  }
   0xd   : > { %s1840_s14 = sshll.u32 (%p34_p3), %s1914_s29, 5  ;;  %s1679_s15 = sshll.u32 (%p34_p3), %s257_s13, 10 }
   0xe   : > { %s1996_s18 = scalar_lea.vmem (%p34_p3), %s3198_s0, %s1840_s14  ;;  %s2001_s19 = scalar_lea.vmem (%p34_p3), [#allocation2], %s1679_s15 }
   0xf   : > { %v275_v0 = vld [vmem:[%s1996_s18] sm:$0xff] (%p34_p3)  ;;  %v277_v1 = vld [vmem:[%s1996_s18 + $0x8] sm:$0xff] (%p34_p3)  ;;  %v279_v2 = vld [vmem:[%s1996_s18 + $0x10] sm:$0xff] (%p34_p3) }
  0x10   : > { %276 = vst [vmem:[%s2001_s19] sm:$0xff] (%p34_p3), %v275_v0  ;;  %v281_v3 = vld [vmem:[%s1996_s18 + $0x18] sm:$0xff] (%p34_p3)  ;;  %v283_v4 = vld [vmem:[%s1996_s18 + $0x40] sm:$0xff] (%p34_p3)  ;;  %v285_v5 = vld [vmem:[%s1996_s18 + $0x48] sm:$0xff] (%p34_p3) }
  0x11   : > { %278 = vst [vmem:[%s2001_s19 + $0x8] sm:$0xff] %v277_v1  ;;  %v287_v6 = vld [vmem:[%s1996_s18 + $0x50] sm:$0xff]  ;;  %v289_v7 = vld [vmem:[%s1996_s18 + $0x58] sm:$0xff]  ;;  %v291_v8 = vld [vmem:[%s1996_s18 + $0x80] sm:$0xff] }
  0x12   : > { %280 = vst [vmem:[%s2001_s19 + $0x10] sm:$0xff] %v279_v2  ;;  %v293_v9 = vld [vmem:[%s1996_s18 + $0x88] sm:$0xff]  ;;  %v295_v10 = vld [vmem:[%s1996_s18 + $0x90] sm:$0xff]  ;;  %v297_v11 = vld [vmem:[%s1996_s18 + $0x98] sm:$0xff] }
  0x13   : > { %282 = vst [vmem:[%s2001_s19 + $0x18] sm:$0xff] %v281_v3  ;;  %v299_v12 = vld [vmem:[%s1996_s18 + $0xc0] sm:$0xff]  ;;  %v301_v13 = vld [vmem:[%s1996_s18 + $0xc8] sm:$0xff]  ;;  %v303_v14 = vld [vmem:[%s1996_s18 + $0xd0] sm:$0xff] }
  0x14   : > { %284 = vst [vmem:[%s2001_s19 + $0x20] sm:$0xff] %v283_v4  ;;  %v305_v15 = vld [vmem:[%s1996_s18 + $0xd8] sm:$0xff]  ;;  %v307_v16 = vld [vmem:[%s1996_s18 + $0x100] sm:$0xff]  ;;  %v309_v17 = vld [vmem:[%s1996_s18 + $0x108] sm:$0xff] }
  0x15   : > { %286 = vst [vmem:[%s2001_s19 + $0x28] sm:$0xff] %v285_v5  ;;  %v311_v18 = vld [vmem:[%s1996_s18 + $0x110] sm:$0xff]  ;;  %v313_v19 = vld [vmem:[%s1996_s18 + $0x118] sm:$0xff]  ;;  %v315_v20 = vld [vmem:[%s1996_s18 + $0x140] sm:$0xff] }
  0x16   : > { %288 = vst [vmem:[%s2001_s19 + $0x30] sm:$0xff] %v287_v6  ;;  %v317_v21 = vld [vmem:[%s1996_s18 + $0x148] sm:$0xff]  ;;  %v319_v22 = vld [vmem:[%s1996_s18 + $0x150] sm:$0xff]  ;;  %v321_v23 = vld [vmem:[%s1996_s18 + $0x158] sm:$0xff] }
  0x17   : > { %290 = vst [vmem:[%s2001_s19 + $0x38] sm:$0xff] %v289_v7  ;;  %v323_v24 = vld [vmem:[%s1996_s18 + $0x180] sm:$0xff]  ;;  %v325_v25 = vld [vmem:[%s1996_s18 + $0x188] sm:$0xff]  ;;  %v327_v26 = vld [vmem:[%s1996_s18 + $0x190] sm:$0xff] }
  0x18   : > { %292 = vst [vmem:[%s2001_s19 + $0x40] sm:$0xff] %v291_v8  ;;  %v329_v27 = vld [vmem:[%s1996_s18 + $0x198] sm:$0xff]  ;;  %v331_v28 = vld [vmem:[%s1996_s18 + $0x1c0] sm:$0xff]  ;;  %v333_v29 = vld [vmem:[%s1996_s18 + $0x1c8] sm:$0xff] }
  0x19   : > { %294 = vst [vmem:[%s2001_s19 + $0x48] sm:$0xff] %v293_v9  ;;  %v335_v30 = vld [vmem:[%s1996_s18 + $0x1d0] sm:$0xff]  ;;  %v337_v31 = vld [vmem:[%s1996_s18 + $0x1d8] sm:$0xff]  ;;  %v339_v32 = vld [vmem:[%s1996_s18 + $0x200] sm:$0xff] }
  0x1a   : > { %296 = vst [vmem:[%s2001_s19 + $0x50] sm:$0xff] %v295_v10  ;;  %v341_v33 = vld [vmem:[%s1996_s18 + $0x208] sm:$0xff]  ;;  %v343_v34 = vld [vmem:[%s1996_s18 + $0x210] sm:$0xff]  ;;  %v345_v35 = vld [vmem:[%s1996_s18 + $0x218] sm:$0xff] }
  0x1b   : > { %298 = vst [vmem:[%s2001_s19 + $0x58] sm:$0xff] %v297_v11  ;;  %v347_v36 = vld [vmem:[%s1996_s18 + $0x240] sm:$0xff]  ;;  %v349_v37 = vld [vmem:[%s1996_s18 + $0x248] sm:$0xff]  ;;  %v351_v38 = vld [vmem:[%s1996_s18 + $0x250] sm:$0xff] }
  0x1c   : > { %300 = vst [vmem:[%s2001_s19 + $0x60] sm:$0xff] %v299_v12  ;;  %v353_v39 = vld [vmem:[%s1996_s18 + $0x258] sm:$0xff]  ;;  %v355_v40 = vld [vmem:[%s1996_s18 + $0x280] sm:$0xff]  ;;  %v357_v41 = vld [vmem:[%s1996_s18 + $0x288] sm:$0xff] }
  0x1d   : > { %302 = vst [vmem:[%s2001_s19 + $0x68] sm:$0xff] %v301_v13  ;;  %v359_v42 = vld [vmem:[%s1996_s18 + $0x290] sm:$0xff]  ;;  %v361_v43 = vld [vmem:[%s1996_s18 + $0x298] sm:$0xff]  ;;  %v363_v44 = vld [vmem:[%s1996_s18 + $0x2c0] sm:$0xff] }
  0x1e   : > { %304 = vst [vmem:[%s2001_s19 + $0x70] sm:$0xff] %v303_v14  ;;  %v365_v45 = vld [vmem:[%s1996_s18 + $0x2c8] sm:$0xff]  ;;  %v367_v46 = vld [vmem:[%s1996_s18 + $0x2d0] sm:$0xff]  ;;  %v369_v47 = vld [vmem:[%s1996_s18 + $0x2d8] sm:$0xff] }
  0x1f   : > { %306 = vst [vmem:[%s2001_s19 + $0x78] sm:$0xff] %v305_v15  ;;  %v371_v48 = vld [vmem:[%s1996_s18 + $0x300] sm:$0xff]  ;;  %v373_v49 = vld [vmem:[%s1996_s18 + $0x308] sm:$0xff]  ;;  %v375_v50 = vld [vmem:[%s1996_s18 + $0x310] sm:$0xff] }
  0x20   : > { %308 = vst [vmem:[%s2001_s19 + $0x80] sm:$0xff] %v307_v16  ;;  %v377_v51 = vld [vmem:[%s1996_s18 + $0x318] sm:$0xff]  ;;  %v379_v52 = vld [vmem:[%s1996_s18 + $0x340] sm:$0xff]  ;;  %v381_v53 = vld [vmem:[%s1996_s18 + $0x348] sm:$0xff] }
  0x21   : > { %310 = vst [vmem:[%s2001_s19 + $0x88] sm:$0xff] %v309_v17  ;;  %v383_v54 = vld [vmem:[%s1996_s18 + $0x350] sm:$0xff]  ;;  %v385_v55 = vld [vmem:[%s1996_s18 + $0x358] sm:$0xff]  ;;  %v387_v56 = vld [vmem:[%s1996_s18 + $0x380] sm:$0xff] }
  0x22   : > { %312 = vst [vmem:[%s2001_s19 + $0x90] sm:$0xff] %v311_v18  ;;  %v389_v57 = vld [vmem:[%s1996_s18 + $0x388] sm:$0xff]  ;;  %v391_v58 = vld [vmem:[%s1996_s18 + $0x390] sm:$0xff]  ;;  %v393_v59 = vld [vmem:[%s1996_s18 + $0x398] sm:$0xff] }
  0x23   : > { %314 = vst [vmem:[%s2001_s19 + $0x98] sm:$0xff] %v313_v19  ;;  %v395_v60 = vld [vmem:[%s1996_s18 + $0x3c0] sm:$0xff]  ;;  %v397_v61 = vld [vmem:[%s1996_s18 + $0x3c8] sm:$0xff]  ;;  %v399_v62 = vld [vmem:[%s1996_s18 + $0x3d0] sm:$0xff] }
  0x24   : > { %316 = vst [vmem:[%s2001_s19 + $0xa0] sm:$0xff] %v315_v20  ;;  %v401_v63 = vld [vmem:[%s1996_s18 + $0x3d8] sm:$0xff]  ;;  %v403_v0 = vld [vmem:[%s1996_s18 + $0x400] sm:$0xff]  ;;  %v405_v1 = vld [vmem:[%s1996_s18 + $0x408] sm:$0xff] }
  0x25   : > { %318 = vst [vmem:[%s2001_s19 + $0xa8] sm:$0xff] %v317_v21  ;;  %v407_v2 = vld [vmem:[%s1996_s18 + $0x410] sm:$0xff]  ;;  %v409_v3 = vld [vmem:[%s1996_s18 + $0x418] sm:$0xff]  ;;  %v411_v4 = vld [vmem:[%s1996_s18 + $0x440] sm:$0xff] }
  0x26   : > { %320 = vst [vmem:[%s2001_s19 + $0xb0] sm:$0xff] %v319_v22  ;;  %v413_v5 = vld [vmem:[%s1996_s18 + $0x448] sm:$0xff]  ;;  %v415_v6 = vld [vmem:[%s1996_s18 + $0x450] sm:$0xff]  ;;  %v417_v7 = vld [vmem:[%s1996_s18 + $0x458] sm:$0xff] }
  0x27   : > { %322 = vst [vmem:[%s2001_s19 + $0xb8] sm:$0xff] %v321_v23  ;;  %v419_v8 = vld [vmem:[%s1996_s18 + $0x480] sm:$0xff]  ;;  %v421_v9 = vld [vmem:[%s1996_s18 + $0x488] sm:$0xff]  ;;  %v423_v10 = vld [vmem:[%s1996_s18 + $0x490] sm:$0xff] }
  0x28   : > { %324 = vst [vmem:[%s2001_s19 + $0xc0] sm:$0xff] %v323_v24  ;;  %v425_v11 = vld [vmem:[%s1996_s18 + $0x498] sm:$0xff]  ;;  %v427_v12 = vld [vmem:[%s1996_s18 + $0x4c0] sm:$0xff]  ;;  %v429_v13 = vld [vmem:[%s1996_s18 + $0x4c8] sm:$0xff] }
  0x29   : > { %326 = vst [vmem:[%s2001_s19 + $0xc8] sm:$0xff] %v325_v25  ;;  %v431_v14 = vld [vmem:[%s1996_s18 + $0x4d0] sm:$0xff]  ;;  %v433_v15 = vld [vmem:[%s1996_s18 + $0x4d8] sm:$0xff]  ;;  %v435_v16 = vld [vmem:[%s1996_s18 + $0x500] sm:$0xff] }
  0x2a   : > { %328 = vst [vmem:[%s2001_s19 + $0xd0] sm:$0xff] %v327_v26  ;;  %v437_v17 = vld [vmem:[%s1996_s18 + $0x508] sm:$0xff]  ;;  %v439_v18 = vld [vmem:[%s1996_s18 + $0x510] sm:$0xff]  ;;  %v441_v19 = vld [vmem:[%s1996_s18 + $0x518] sm:$0xff] }
  0x2b   : > { %330 = vst [vmem:[%s2001_s19 + $0xd8] sm:$0xff] %v329_v27  ;;  %v443_v20 = vld [vmem:[%s1996_s18 + $0x540] sm:$0xff]  ;;  %v445_v21 = vld [vmem:[%s1996_s18 + $0x548] sm:$0xff]  ;;  %v447_v22 = vld [vmem:[%s1996_s18 + $0x550] sm:$0xff] }
  0x2c   : > { %332 = vst [vmem:[%s2001_s19 + $0xe0] sm:$0xff] %v331_v28  ;;  %v449_v23 = vld [vmem:[%s1996_s18 + $0x558] sm:$0xff]  ;;  %v451_v24 = vld [vmem:[%s1996_s18 + $0x580] sm:$0xff]  ;;  %v453_v25 = vld [vmem:[%s1996_s18 + $0x588] sm:$0xff] }
  0x2d   : > { %334 = vst [vmem:[%s2001_s19 + $0xe8] sm:$0xff] %v333_v29  ;;  %v455_v26 = vld [vmem:[%s1996_s18 + $0x590] sm:$0xff]  ;;  %v457_v27 = vld [vmem:[%s1996_s18 + $0x598] sm:$0xff]  ;;  %v459_v28 = vld [vmem:[%s1996_s18 + $0x5c0] sm:$0xff] }
  0x2e   : > { %336 = vst [vmem:[%s2001_s19 + $0xf0] sm:$0xff] %v335_v30  ;;  %v461_v29 = vld [vmem:[%s1996_s18 + $0x5c8] sm:$0xff]  ;;  %v463_v30 = vld [vmem:[%s1996_s18 + $0x5d0] sm:$0xff] }
  0x2f   : > { %338 = vst [vmem:[%s2001_s19 + $0xf8] sm:$0xff] %v337_v31  ;;  %v465_v31 = vld [vmem:[%s1996_s18 + $0x5d8] sm:$0xff] }
  0x30   : > { %340 = vst [vmem:[%s2001_s19 + $0x100] sm:$0xff] %v339_v32  ;;  %v467_v32 = vld [vmem:[%s1996_s18 + $0x600] sm:$0xff] }
  0x31   : > { %342 = vst [vmem:[%s2001_s19 + $0x108] sm:$0xff] %v341_v33  ;;  %v469_v33 = vld [vmem:[%s1996_s18 + $0x608] sm:$0xff] }
  0x32   : > { %344 = vst [vmem:[%s2001_s19 + $0x110] sm:$0xff] %v343_v34  ;;  %v471_v34 = vld [vmem:[%s1996_s18 + $0x610] sm:$0xff] }
  0x33   : > { %346 = vst [vmem:[%s2001_s19 + $0x118] sm:$0xff] %v345_v35  ;;  %v473_v35 = vld [vmem:[%s1996_s18 + $0x618] sm:$0xff] }
  0x34   : > { %348 = vst [vmem:[%s2001_s19 + $0x120] sm:$0xff] %v347_v36  ;;  %v475_v36 = vld [vmem:[%s1996_s18 + $0x640] sm:$0xff] }
  0x35   : > { %350 = vst [vmem:[%s2001_s19 + $0x128] sm:$0xff] %v349_v37  ;;  %v477_v37 = vld [vmem:[%s1996_s18 + $0x648] sm:$0xff] }
  0x36   : > { %352 = vst [vmem:[%s2001_s19 + $0x130] sm:$0xff] %v351_v38  ;;  %v479_v38 = vld [vmem:[%s1996_s18 + $0x650] sm:$0xff] }
  0x37   : > { %354 = vst [vmem:[%s2001_s19 + $0x138] sm:$0xff] %v353_v39  ;;  %v481_v39 = vld [vmem:[%s1996_s18 + $0x658] sm:$0xff] }
  0x38   : > { %356 = vst [vmem:[%s2001_s19 + $0x140] sm:$0xff] %v355_v40  ;;  %v483_v40 = vld [vmem:[%s1996_s18 + $0x680] sm:$0xff] }
  0x39   : > { %358 = vst [vmem:[%s2001_s19 + $0x148] sm:$0xff] %v357_v41  ;;  %v485_v41 = vld [vmem:[%s1996_s18 + $0x688] sm:$0xff] }
  0x3a   : > { %360 = vst [vmem:[%s2001_s19 + $0x150] sm:$0xff] %v359_v42  ;;  %v487_v42 = vld [vmem:[%s1996_s18 + $0x690] sm:$0xff] }
  0x3b   : > { %362 = vst [vmem:[%s2001_s19 + $0x158] sm:$0xff] %v361_v43  ;;  %v489_v43 = vld [vmem:[%s1996_s18 + $0x698] sm:$0xff] }
  0x3c   : > { %364 = vst [vmem:[%s2001_s19 + $0x160] sm:$0xff] %v363_v44  ;;  %v491_v44 = vld [vmem:[%s1996_s18 + $0x6c0] sm:$0xff] }
  0x3d   : > { %366 = vst [vmem:[%s2001_s19 + $0x168] sm:$0xff] %v365_v45  ;;  %v493_v45 = vld [vmem:[%s1996_s18 + $0x6c8] sm:$0xff] }
  0x3e   : > { %368 = vst [vmem:[%s2001_s19 + $0x170] sm:$0xff] %v367_v46  ;;  %v495_v46 = vld [vmem:[%s1996_s18 + $0x6d0] sm:$0xff] }
  0x3f   : > { %370 = vst [vmem:[%s2001_s19 + $0x178] sm:$0xff] %v369_v47  ;;  %v497_v47 = vld [vmem:[%s1996_s18 + $0x6d8] sm:$0xff] }
  0x40   : > { %372 = vst [vmem:[%s2001_s19 + $0x180] sm:$0xff] %v371_v48  ;;  %v499_v48 = vld [vmem:[%s1996_s18 + $0x700] sm:$0xff] }
  0x41   : > { %374 = vst [vmem:[%s2001_s19 + $0x188] sm:$0xff] %v373_v49  ;;  %v501_v49 = vld [vmem:[%s1996_s18 + $0x708] sm:$0xff] }
  0x42   : > { %376 = vst [vmem:[%s2001_s19 + $0x190] sm:$0xff] %v375_v50  ;;  %v503_v50 = vld [vmem:[%s1996_s18 + $0x710] sm:$0xff] }
  0x43   : > { %378 = vst [vmem:[%s2001_s19 + $0x198] sm:$0xff] %v377_v51  ;;  %v505_v51 = vld [vmem:[%s1996_s18 + $0x718] sm:$0xff] }
  0x44   : > { %380 = vst [vmem:[%s2001_s19 + $0x1a0] sm:$0xff] %v379_v52  ;;  %v507_v52 = vld [vmem:[%s1996_s18 + $0x740] sm:$0xff] }
  0x45   : > { %382 = vst [vmem:[%s2001_s19 + $0x1a8] sm:$0xff] %v381_v53  ;;  %v509_v53 = vld [vmem:[%s1996_s18 + $0x748] sm:$0xff] }
  0x46   : > { %384 = vst [vmem:[%s2001_s19 + $0x1b0] sm:$0xff] %v383_v54  ;;  %v511_v54 = vld [vmem:[%s1996_s18 + $0x750] sm:$0xff] }
  0x47   : > { %386 = vst [vmem:[%s2001_s19 + $0x1b8] sm:$0xff] %v385_v55  ;;  %v513_v55 = vld [vmem:[%s1996_s18 + $0x758] sm:$0xff] }
  0x48   : > { %388 = vst [vmem:[%s2001_s19 + $0x1c0] sm:$0xff] %v387_v56  ;;  %v515_v56 = vld [vmem:[%s1996_s18 + $0x780] sm:$0xff] }
  0x49   : > { %390 = vst [vmem:[%s2001_s19 + $0x1c8] sm:$0xff] %v389_v57  ;;  %v517_v57 = vld [vmem:[%s1996_s18 + $0x788] sm:$0xff] }
  0x4a   : > { %392 = vst [vmem:[%s2001_s19 + $0x1d0] sm:$0xff] %v391_v58  ;;  %v519_v58 = vld [vmem:[%s1996_s18 + $0x790] sm:$0xff] }
  0x4b   : > { %394 = vst [vmem:[%s2001_s19 + $0x1d8] sm:$0xff] %v393_v59  ;;  %v521_v59 = vld [vmem:[%s1996_s18 + $0x798] sm:$0xff] }
  0x4c   : > { %396 = vst [vmem:[%s2001_s19 + $0x1e0] sm:$0xff] %v395_v60  ;;  %v523_v60 = vld [vmem:[%s1996_s18 + $0x7c0] sm:$0xff] }
  0x4d   : > { %398 = vst [vmem:[%s2001_s19 + $0x1e8] sm:$0xff] %v397_v61  ;;  %v525_v61 = vld [vmem:[%s1996_s18 + $0x7c8] sm:$0xff] }
  0x4e   : > { %400 = vst [vmem:[%s2001_s19 + $0x1f0] sm:$0xff] %v399_v62  ;;  %v527_v62 = vld [vmem:[%s1996_s18 + $0x7d0] sm:$0xff] }
  0x4f   : > { %402 = vst [vmem:[%s2001_s19 + $0x1f8] sm:$0xff] %v401_v63  ;;  %v529_v63 = vld [vmem:[%s1996_s18 + $0x7d8] sm:$0xff] }
  0x50   : > { %404 = vst [vmem:[%s2001_s19 + $0x200] sm:$0xff] %v403_v0 }
  0x51   : > { %406 = vst [vmem:[%s2001_s19 + $0x208] sm:$0xff] %v405_v1 }
  0x52   : > { %408 = vst [vmem:[%s2001_s19 + $0x210] sm:$0xff] %v407_v2 }
  0x53   : > { %410 = vst [vmem:[%s2001_s19 + $0x218] sm:$0xff] %v409_v3 }
  0x54   : > { %412 = vst [vmem:[%s2001_s19 + $0x220] sm:$0xff] %v411_v4 }
  0x55   : > { %414 = vst [vmem:[%s2001_s19 + $0x228] sm:$0xff] %v413_v5 }
  0x56   : > { %416 = vst [vmem:[%s2001_s19 + $0x230] sm:$0xff] %v415_v6 }
  0x57   : > { %418 = vst [vmem:[%s2001_s19 + $0x238] sm:$0xff] %v417_v7 }
  0x58   : > { %420 = vst [vmem:[%s2001_s19 + $0x240] sm:$0xff] %v419_v8 }
  0x59   : > { %422 = vst [vmem:[%s2001_s19 + $0x248] sm:$0xff] %v421_v9 }
  0x5a   : > { %424 = vst [vmem:[%s2001_s19 + $0x250] sm:$0xff] %v423_v10 }
  0x5b   : > { %426 = vst [vmem:[%s2001_s19 + $0x258] sm:$0xff] %v425_v11 }
  0x5c   : > { %428 = vst [vmem:[%s2001_s19 + $0x260] sm:$0xff] %v427_v12 }
  0x5d   : > { %430 = vst [vmem:[%s2001_s19 + $0x268] sm:$0xff] %v429_v13 }
  0x5e   : > { %432 = vst [vmem:[%s2001_s19 + $0x270] sm:$0xff] %v431_v14 }
  0x5f   : > { %434 = vst [vmem:[%s2001_s19 + $0x278] sm:$0xff] %v433_v15 }
  0x60   : > { %436 = vst [vmem:[%s2001_s19 + $0x280] sm:$0xff] %v435_v16 }
  0x61   : > { %438 = vst [vmem:[%s2001_s19 + $0x288] sm:$0xff] %v437_v17 }
  0x62   : > { %440 = vst [vmem:[%s2001_s19 + $0x290] sm:$0xff] %v439_v18 }
  0x63   : > { %442 = vst [vmem:[%s2001_s19 + $0x298] sm:$0xff] %v441_v19 }
  0x64   : > { %444 = vst [vmem:[%s2001_s19 + $0x2a0] sm:$0xff] %v443_v20 }
  0x65   : > { %446 = vst [vmem:[%s2001_s19 + $0x2a8] sm:$0xff] %v445_v21 }
  0x66   : > { %448 = vst [vmem:[%s2001_s19 + $0x2b0] sm:$0xff] %v447_v22 }
  0x67   : > { %450 = vst [vmem:[%s2001_s19 + $0x2b8] sm:$0xff] %v449_v23 }
  0x68   : > { %452 = vst [vmem:[%s2001_s19 + $0x2c0] sm:$0xff] %v451_v24 }
  0x69   : > { %454 = vst [vmem:[%s2001_s19 + $0x2c8] sm:$0xff] %v453_v25 }
  0x6a   : > { %456 = vst [vmem:[%s2001_s19 + $0x2d0] sm:$0xff] %v455_v26 }
  0x6b   : > { %458 = vst [vmem:[%s2001_s19 + $0x2d8] sm:$0xff] %v457_v27 }
  0x6c   : > { %460 = vst [vmem:[%s2001_s19 + $0x2e0] sm:$0xff] %v459_v28 }
  0x6d   : > { %462 = vst [vmem:[%s2001_s19 + $0x2e8] sm:$0xff] %v461_v29 }
  0x6e   : > { %464 = vst [vmem:[%s2001_s19 + $0x2f0] sm:$0xff] %v463_v30 }
  0x6f   : > { %466 = vst [vmem:[%s2001_s19 + $0x2f8] sm:$0xff] %v465_v31 }
  0x70   : > { %468 = vst [vmem:[%s2001_s19 + $0x300] sm:$0xff] %v467_v32 }
  0x71   : > { %470 = vst [vmem:[%s2001_s19 + $0x308] sm:$0xff] %v469_v33 }
  0x72   : > { %472 = vst [vmem:[%s2001_s19 + $0x310] sm:$0xff] %v471_v34 }
  0x73   : > { %474 = vst [vmem:[%s2001_s19 + $0x318] sm:$0xff] %v473_v35 }
  0x74   : > { %476 = vst [vmem:[%s2001_s19 + $0x320] sm:$0xff] %v475_v36 }
  0x75   : > { %478 = vst [vmem:[%s2001_s19 + $0x328] sm:$0xff] %v477_v37 }
  0x76   : > { %480 = vst [vmem:[%s2001_s19 + $0x330] sm:$0xff] %v479_v38 }
  0x77   : > { %482 = vst [vmem:[%s2001_s19 + $0x338] sm:$0xff] %v481_v39 }
  0x78   : > { %484 = vst [vmem:[%s2001_s19 + $0x340] sm:$0xff] %v483_v40 }
  0x79   : > { %486 = vst [vmem:[%s2001_s19 + $0x348] sm:$0xff] %v485_v41 }
  0x7a   : > { %488 = vst [vmem:[%s2001_s19 + $0x350] sm:$0xff] %v487_v42 }
  0x7b   : > { %490 = vst [vmem:[%s2001_s19 + $0x358] sm:$0xff] %v489_v43 }
  0x7c   : > { %492 = vst [vmem:[%s2001_s19 + $0x360] sm:$0xff] %v491_v44 }
  0x7d   : > { %494 = vst [vmem:[%s2001_s19 + $0x368] sm:$0xff] %v493_v45 }
  0x7e   : > { %496 = vst [vmem:[%s2001_s19 + $0x370] sm:$0xff] %v495_v46 }
  0x7f   : > { %498 = vst [vmem:[%s2001_s19 + $0x378] sm:$0xff] %v497_v47 }
  0x80   : > { %500 = vst [vmem:[%s2001_s19 + $0x380] sm:$0xff] %v499_v48 }
  0x81   : > { %502 = vst [vmem:[%s2001_s19 + $0x388] sm:$0xff] %v501_v49 }
  0x82   : > { %504 = vst [vmem:[%s2001_s19 + $0x390] sm:$0xff] %v503_v50 }
  0x83   : > { %506 = vst [vmem:[%s2001_s19 + $0x398] sm:$0xff] %v505_v51 }
  0x84   : > { %508 = vst [vmem:[%s2001_s19 + $0x3a0] sm:$0xff] %v507_v52 }
  0x85   : > { %510 = vst [vmem:[%s2001_s19 + $0x3a8] sm:$0xff] %v509_v53 }
  0x86   : > { %512 = vst [vmem:[%s2001_s19 + $0x3b0] sm:$0xff] %v511_v54 }
  0x87   : > { %514 = vst [vmem:[%s2001_s19 + $0x3b8] sm:$0xff] %v513_v55 }
  0x88   : > { %516 = vst [vmem:[%s2001_s19 + $0x3c0] sm:$0xff] %v515_v56 }
  0x89   : > { %518 = vst [vmem:[%s2001_s19 + $0x3c8] sm:$0xff] %v517_v57 }
  0x8a   : > { %520 = vst [vmem:[%s2001_s19 + $0x3d0] sm:$0xff] %v519_v58 }
  0x8b   : > { %522 = vst [vmem:[%s2001_s19 + $0x3d8] sm:$0xff] %v521_v59 }
  0x8c   : > { %524 = vst [vmem:[%s2001_s19 + $0x3e0] sm:$0xff] %v523_v60 }
  0x8d   : > { %526 = vst [vmem:[%s2001_s19 + $0x3e8] sm:$0xff] %v525_v61 }
  0x8e   : > { %528 = vst [vmem:[%s2001_s19 + $0x3f0] sm:$0xff] %v527_v62 }
  0x8f   : > { %530 = vst [vmem:[%s2001_s19 + $0x3f8] sm:$0xff] %v529_v63 }
  0x90 PF: > { %p1682_p5 = scmp.ge.s32.totalorder %s1914_s29, 1  ;;  %p535_p6 = scmp.lt.s32.totalorder %s1914_s29, 3 }
  0x92   : > { %p536_p7 = pnand %p1682_p5, %p535_p6 }
  0x93   : > { %s542_s20 = sand.u32 (!%p536_p7), 1, %s1906_s27   ;;  %p576_p8 = scmp.lt.s32.totalorder (!%p536_p7), %s1675_s30, 1 }
  0x94   : > { %539 = sbr.rel (%p536_p7) target bundleno = 814 (0x32e), region = 71  ;;  %s1683_s21 = sshll.u32 (!%p536_p7), %s542_s20, 10 }
  0x95   : > { %s2259_s22 = scalar_lea.vmem (!%p536_p7), [#allocation2], %s1683_s21 }
  0x99   : > { %vm725_vm0 = vcmask 1041408   ;;  %v647_v0 = vld [vmem:[%s2259_s22 + $0x1e0] sm:$0xff]  ;;  %v712_v12 = vld [vmem:[%s2259_s22 + $0x3e8] sm:$0x3]  ;;  %v649_v21 = vld [vmem:[%s2259_s22 + $0x1f0] sm:$0xff]  ;;  %vm715_vm1 = vcmask 998400  }
  0x9a   : > { %v643_v1 = vld [vmem:[%s2259_s22 + $0x1c0] sm:$0xff]  ;;  %738 = vmatpush.msra.mxu2 %v647_v0  ;;  %1690 = vmatpush.msk.msra.mxu3 %vm725_vm0, %v712_v12  ;;  %v708_v14 = vld [vmem:[%s2259_s22 + $0x3c8] sm:$0xff]  ;;  %v645_v24 = vld [vmem:[%s2259_s22 + $0x1d0] sm:$0xff]  ;;  %vm1548_vm2 = vcmask 408576   ;;  %vm1581_vm3 = vcmask 64512   ;;  %vm1583_vm4 = vcmask 58368  }
  0x9b   : > { %v711_v2 = vld [vmem:[%s2259_s22 + $0x3e0] sm:$0x3]  ;;  %v704_v16 = vld [vmem:[%s2259_s22 + $0x3a8] sm:$0xff]  ;;  %842 = vmatpush.msra.mxu0 %v649_v21  ;;  %v641_v28 = vld [vmem:[%s2259_s22 + $0x1b0] sm:$0xff]  ;;  %s3211_s30 = smov (!%p576_p8, %s1675_s30), 1 }
  0x9c   : > { %v639_v3 = vld [vmem:[%s2259_s22 + $0x1a0] sm:$0xff]  ;;  %1686 = vmatpush.msk.msra.mxu1 %vm725_vm0, %v711_v2  ;;  %739 = vmatpush.msra.mxu2 %v643_v1  ;;  %v700_v19 = vld [vmem:[%s2259_s22 + $0x388] sm:$0xff]  ;;  %v637_v30 = vld [vmem:[%s2259_s22 + $0x190] sm:$0xff]  ;;  %s1841_s18 = sshll.u32 %s3211_s30, 4 }
  0x9d   : > { %v707_v4 = vld [vmem:[%s2259_s22 + $0x3c0] sm:$0xff]  ;;  %817 = vmatpush.msra.mxu3 %v708_v14  ;;  %v696_v23 = vld [vmem:[%s2259_s22 + $0x368] sm:$0xff]  ;;  %843 = vmatpush.msra.mxu0 %v645_v24  ;;  %v633_v34 = vld [vmem:[%s2259_s22 + $0x170] sm:$0xff]  ;;  %s580_s21 = scalar_lea.vmem %s3206_s8, %s1841_s18 }
  0x9e   : > { %v703_v5 = vld [vmem:[%s2259_s22 + $0x3a0] sm:$0xff]  ;;  %765 = vmatpush.msra.mxu1 %v707_v4  ;;  %740 = vmatpush.msra.mxu2 %v639_v3  ;;  %v692_v27 = vld [vmem:[%s2259_s22 + $0x348] sm:$0xff]  ;;  %v629_v38 = vld [vmem:[%s2259_s22 + $0x150] sm:$0xff] }
  0x9f   : > { %v635_v6 = vld [vmem:[%s2259_s22 + $0x180] sm:$0xff]  ;;  %818 = vmatpush.msra.mxu3 %v704_v16  ;;  %v688_v32 = vld [vmem:[%s2259_s22 + $0x328] sm:$0xff]  ;;  %844 = vmatpush.msra.mxu0 %v641_v28  ;;  %v625_v42 = vld [vmem:[%s2259_s22 + $0x130] sm:$0xff] }
  0xa0   : > { %v699_v7 = vld [vmem:[%s2259_s22 + $0x380] sm:$0xff]  ;;  %766 = vmatpush.msra.mxu1 %v703_v5  ;;  %741 = vmatpush.msra.mxu2 %v635_v6  ;;  %v684_v36 = vld [vmem:[%s2259_s22 + $0x308] sm:$0xff]  ;;  %v621_v46 = vld [vmem:[%s2259_s22 + $0x110] sm:$0xff] }
  0xa1   : > { %v631_v8 = vld [vmem:[%s2259_s22 + $0x160] sm:$0xff]  ;;  %819 = vmatpush.msra.mxu3 %v700_v19  ;;  %845 = vmatpush.msra.mxu0 %v637_v30  ;;  %v680_v40 = vld [vmem:[%s2259_s22 + $0x2e8] sm:$0xff]  ;;  %v617_v50 = vld [vmem:[%s2259_s22 + $0xf0] sm:$0xff] }
  0xa2   : > { %v695_v9 = vld [vmem:[%s2259_s22 + $0x360] sm:$0xff]  ;;  %767 = vmatpush.msra.mxu1 %v699_v7  ;;  %742 = vmatpush.msra.mxu2 %v631_v8  ;;  %v676_v44 = vld [vmem:[%s2259_s22 + $0x2c8] sm:$0xff]  ;;  %v713_v54 = vld [vmem:[%s2259_s22 + $0x3f0] sm:$0x3] }
  0xa3   : > { %v627_v10 = vld [vmem:[%s2259_s22 + $0x140] sm:$0xff]  ;;  %820 = vmatpush.msra.mxu3 %v696_v23  ;;  %846 = vmatpush.msra.mxu0 %v633_v34  ;;  %v672_v48 = vld [vmem:[%s2259_s22 + $0x2a8] sm:$0xff]  ;;  %v709_v57 = vld [vmem:[%s2259_s22 + $0x3d0] sm:$0xff] }
  0xa4   : > { %v691_v11 = vld [vmem:[%s2259_s22 + $0x340] sm:$0xff]  ;;  %768 = vmatpush.msra.mxu1 %v695_v9  ;;  %743 = vmatpush.msra.mxu2 %v627_v10  ;;  %v648_v51 = vld [vmem:[%s2259_s22 + $0x1e8] sm:$0xff]  ;;  %v613_v60 = vld [vmem:[%s2259_s22 + $0xd0] sm:$0xff] }
  0xa5   : > { %v623_v13 = vld [vmem:[%s2259_s22 + $0x120] sm:$0xff]  ;;  %821 = vmatpush.msra.mxu3 %v692_v27  ;;  %847 = vmatpush.msra.mxu0 %v629_v38  ;;  %v644_v55 = vld [vmem:[%s2259_s22 + $0x1c8] sm:$0xff]  ;;  %v705_v61 = vld [vmem:[%s2259_s22 + $0x3b0] sm:$0xff] }
  0xa6   : > { %v687_v15 = vld [vmem:[%s2259_s22 + $0x320] sm:$0xff]  ;;  %769 = vmatpush.msra.mxu1 %v691_v11  ;;  %744 = vmatpush.msra.mxu2 %v623_v13  ;;  %v2326_v56 = vld [vmem:[%s3199_s1 + $0x8] sm:$0xff]  ;;  %v609_v0 = vld [vmem:[%s2259_s22 + $0xb0] sm:$0xff] }
  0xa7   : > { %v619_v17 = vld [vmem:[%s2259_s22 + $0x100] sm:$0xff]  ;;  %822 = vmatpush.msra.mxu3 %v688_v32  ;;  %848 = vmatpush.msra.mxu0 %v625_v42  ;;  %v668_v58 = vld [vmem:[%s2259_s22 + $0x288] sm:$0xff]  ;;  %v701_v1 = vld [vmem:[%s2259_s22 + $0x390] sm:$0xff] }
  0xa8   : > { %v683_v18 = vld [vmem:[%s2259_s22 + $0x300] sm:$0xff]  ;;  %770 = vmatpush.msra.mxu1 %v687_v15  ;;  %745 = vmatpush.msra.mxu2 %v619_v17  ;;  %v640_v59 = vld [vmem:[%s2259_s22 + $0x1a8] sm:$0xff]  ;;  %v605_v4 = vld [vmem:[%s2259_s22 + $0x90] sm:$0xff] }
  0xa9   : > { %v615_v20 = vld [vmem:[%s2259_s22 + $0xe0] sm:$0xff]  ;;  %823 = vmatpush.msra.mxu3 %v684_v36  ;;  %849 = vmatpush.msra.mxu0 %v621_v46  ;;  %v664_v62 = vld [vmem:[%s2259_s22 + $0x268] sm:$0xff]  ;;  %v2347_v5 = vld [vmem:[%s3199_s1 + $0x10] sm:$0xff] }
  0xaa   : > { %v679_v22 = vld [vmem:[%s2259_s22 + $0x2e0] sm:$0xff]  ;;  %771 = vmatpush.msra.mxu1 %v683_v18  ;;  %746 = vmatpush.msra.mxu2 %v615_v20  ;;  %v636_v63 = vld [vmem:[%s2259_s22 + $0x188] sm:$0xff]  ;;  %v697_v6 = vld [vmem:[%s2259_s22 + $0x370] sm:$0xff] }
  0xab   : > { %v611_v25 = vld [vmem:[%s2259_s22 + $0xc0] sm:$0xff]  ;;  %824 = vmatpush.msra.mxu3 %v680_v40  ;;  %850 = vmatpush.msra.mxu0 %v617_v50  ;;  %v660_v2 = vld [vmem:[%s2259_s22 + $0x248] sm:$0xff]  ;;  %v2354_v8 = vld [vmem:[%s3199_s1 + $0x18] sm:$0xff] }
  0xac   : > { %v675_v26 = vld [vmem:[%s2259_s22 + $0x2c0] sm:$0xff]  ;;  %772 = vmatpush.msra.mxu1 %v679_v22  ;;  %747 = vmatpush.msra.mxu2 %v611_v25  ;;  %v632_v3 = vld [vmem:[%s2259_s22 + $0x168] sm:$0xff]  ;;  %v693_v9 = vld [vmem:[%s2259_s22 + $0x350] sm:$0xff] }
  0xad   : > { %v607_v29 = vld [vmem:[%s2259_s22 + $0xa0] sm:$0xff]  ;;  %825 = vmatpush.msra.mxu3 %v676_v44  ;;  %851 = vmatpush.msra.mxu0 %v613_v60  ;;  %v628_v7 = vld [vmem:[%s2259_s22 + $0x148] sm:$0xff]  ;;  %v601_v12 = vld [vmem:[%s2259_s22 + $0x70] sm:$0xff] }
  0xae   : > { %v671_v31 = vld [vmem:[%s2259_s22 + $0x2a0] sm:$0xff]  ;;  %773 = vmatpush.msra.mxu1 %v675_v26  ;;  %748 = vmatpush.msra.mxu2 %v607_v29  ;;  %v656_v10 = vld [vmem:[%s2259_s22 + $0x228] sm:$0xff]  ;;  %v689_v13 = vld [vmem:[%s2259_s22 + $0x330] sm:$0xff] }
  0xaf   : > { %v603_v33 = vld [vmem:[%s2259_s22 + $0x80] sm:$0xff]  ;;  %826 = vmatpush.msra.mxu3 %v672_v48  ;;  %852 = vmatpush.msra.mxu0 %v609_v0  ;;  %v624_v11 = vld [vmem:[%s2259_s22 + $0x128] sm:$0xff]  ;;  %v685_v16 = vld [vmem:[%s2259_s22 + $0x310] sm:$0xff] }
  0xb0   : > { %v667_v35 = vld [vmem:[%s2259_s22 + $0x280] sm:$0xff]  ;;  %774 = vmatpush.msra.mxu1 %v671_v31  ;;  %749 = vmatpush.msra.mxu2 %v603_v33  ;;  %v652_v14 = vld [vmem:[%s2259_s22 + $0x208] sm:$0xff]  ;;  %v714_v17 = vld [vmem:[%s2259_s22 + $0x3f8] sm:$0x3] }
  0xb1   : > { %v599_v37 = vld [vmem:[%s2259_s22 + $0x60] sm:$0xff]  ;;  %827 = vmatpush.msra.mxu3 %v668_v58  ;;  %853 = vmatpush.msra.mxu0 %v605_v4  ;;  %v620_v15 = vld [vmem:[%s2259_s22 + $0x108] sm:$0xff]  ;;  %v597_v19 = vld [vmem:[%s2259_s22 + $0x50] sm:$0xff] }
  0xb2   : > { %v663_v39 = vld [vmem:[%s2259_s22 + $0x260] sm:$0xff]  ;;  %775 = vmatpush.msra.mxu1 %v667_v35  ;;  %750 = vmatpush.msra.mxu2 %v599_v37  ;;  %v616_v18 = vld [vmem:[%s2259_s22 + $0xe8] sm:$0xff]  ;;  %v681_v21 = vld [vmem:[%s2259_s22 + $0x2f0] sm:$0xff] }
  0xb3   : > { %v595_v41 = vld [vmem:[%s2259_s22 + $0x40] sm:$0xff]  ;;  %828 = vmatpush.msra.mxu3 %v664_v62  ;;  %854 = vmatpush.msra.mxu0 %v601_v12  ;;  %v612_v22 = vld [vmem:[%s2259_s22 + $0xc8] sm:$0xff]  ;;  %v677_v24 = vld [vmem:[%s2259_s22 + $0x2d0] sm:$0xff] }
  0xb4   : > { %v659_v43 = vld [vmem:[%s2259_s22 + $0x240] sm:$0xff]  ;;  %776 = vmatpush.msra.mxu1 %v663_v39  ;;  %751 = vmatpush.msra.mxu2 %v595_v41  ;;  %v2382_v23 = vld [vmem:[%s3199_s1 + $0x28] sm:$0xf]  ;;  %v710_v25 = vld [vmem:[%s2259_s22 + $0x3d8] sm:$0xff] }
  0xb5   : > { %v591_v45 = vld [vmem:[%s2259_s22 + $0x20] sm:$0xff]  ;;  %829 = vmatpush.msra.mxu3 %v660_v2  ;;  %855 = vmatpush.msra.mxu0 %v597_v19  ;;  %v608_v26 = vld [vmem:[%s2259_s22 + $0xa8] sm:$0xff]  ;;  %v593_v27 = vld [vmem:[%s2259_s22 + $0x30] sm:$0xff] }
  0xb6   : > { %v655_v47 = vld [vmem:[%s2259_s22 + $0x220] sm:$0xff]  ;;  %777 = vmatpush.msra.mxu1 %v659_v43  ;;  %752 = vmatpush.msra.mxu2 %v591_v45  ;;  %v673_v28 = vld [vmem:[%s2259_s22 + $0x2b0] sm:$0xff]  ;;  %v706_v29 = vld [vmem:[%s2259_s22 + $0x3b8] sm:$0xff]  ;;  %v1916_v45 = vmov 0  }
  0xb7   : > { %v587_v49 = vld [vmem:[%s2259_s22] sm:$0xff]  ;;  %830 = vmatpush.msra.mxu3 %v656_v10  ;;  %v604_v30 = vld [vmem:[%s2259_s22 + $0x88] sm:$0xff]  ;;  %v589_v31 = vld [vmem:[%s2259_s22 + $0x10] sm:$0xff]  ;;  %856 = vmatpush.msra.mxu0 %v593_v27 }
  0xb8   : > { %v651_v52 = vld [vmem:[%s2259_s22 + $0x200] sm:$0xff]  ;;  %778 = vmatpush.msra.mxu1 %v655_v47  ;;  %753 = vmatpush.msra.mxu2 %v587_v49  ;;  %v669_v32 = vld [vmem:[%s2259_s22 + $0x290] sm:$0xff]  ;;  %v702_v33 = vld [vmem:[%s2259_s22 + $0x398] sm:$0xff] }
  0xb9   : > { %v2319_v53 = vld [vmem:[%s3199_s1] sm:$0xff]  ;;  %831 = vmatpush.msra.mxu3 %v652_v14  ;;  %v600_v34 = vld [vmem:[%s2259_s22 + $0x68] sm:$0xff]  ;;  %v665_v35 = vld [vmem:[%s2259_s22 + $0x270] sm:$0xff]  ;;  %857 = vmatpush.msra.mxu0 %v589_v31 }
  0xba   : > { %790 = vmatpush.msrb.mxu2 %v648_v51  ;;  %779 = vmatpush.msra.mxu1 %v651_v52  ;;  %v2373_v20 = vld [vmem:[%s3199_s1 + $0x20] sm:$0xf]  ;;  %v596_v36 = vld [vmem:[%s2259_s22 + $0x48] sm:$0xff]  ;;  %v698_v37 = vld [vmem:[%s2259_s22 + $0x378] sm:$0xff] }
  0xbb   : > { %754 = vmatmul.f32.vlgmr.msra.gmra.mxu2 %v2319_v53  ;;  %1687 = vmatmul.msk.f32.vlgmr.msra.gmra.mxu1 %vm715_vm1, %v2326_v56  ;;  %v661_v38 = vld [vmem:[%s2259_s22 + $0x250] sm:$0xff]  ;;  %v592_v39 = vld [vmem:[%s2259_s22 + $0x28] sm:$0xff]  ;;  %v694_v40 = vld [vmem:[%s2259_s22 + $0x358] sm:$0xff] }
  0xbc   : > { %1694 = vmatpush.msk.msrb.mxu1 %vm725_vm0, %v713_v54  ;;  %791 = vmatpush.msrb.mxu2 %v644_v55  ;;  %v657_v41 = vld [vmem:[%s2259_s22 + $0x230] sm:$0xff]  ;;  %v955_v42 = vld [vmem:[%s3200_s2] sm:$0xff]  ;;  %v588_v43 = vld [vmem:[%s2259_s22 + $0x8] sm:$0xff] }
  0xbd   : > { %1691 = vmatmul.msk.f32.vlgmr.msra.gmra.mxu3 %vm715_vm1, %v2326_v56  ;;  %858 = vmatmul.f32.vlgmr.msra.gmra.mxu0 %v2319_v53  ;;  %v690_v44 = vld [vmem:[%s2259_s22 + $0x338] sm:$0xff]  ;;  %v653_v46 = vld [vmem:[%s2259_s22 + $0x210] sm:$0xff]  ;;  %v956_v54 = vld [vmem:[%s3200_s2 + $0x8] sm:$0xff] }
  0xbe   : > { %869 = vmatpush.msrb.mxu1 %v709_v57  ;;  %792 = vmatpush.msrb.mxu2 %v640_v59  ;;  %v650_v47 = vld [vmem:[%s2259_s22 + $0x1f8] sm:$0xff]  ;;  %v1447_v10 = vld [vmem:[%s3202_s4] sm:$0xff] }
  0xbf   : > { %1698 = vmatpush.msk.msrb.mxu3 %vm725_vm0, %v714_v17  ;;  %1883 = vset.pattern.permute.xlu0 %v1916_v45  ;;  %v686_v48 = vld [vmem:[%s2259_s22 + $0x318] sm:$0xff]  ;;  %v1536_v17 = vld [vmem:[%s3205_s7] sm:$0xff] }
  0xc0   : > { %870 = vmatpush.msrb.mxu1 %v705_v61  ;;  %793 = vmatpush.msrb.mxu2 %v636_v63  ;;  %v646_v49 = vld [vmem:[%s2259_s22 + $0x1d8] sm:$0xff] }
  0xc1   : > { %921 = vmatpush.msrb.mxu3 %v710_v25  ;;  %960 = vperm.xlu0 %1883, %v955_v42   ;;  %v682_v50 = vld [vmem:[%s2259_s22 + $0x2f8] sm:$0xff] }
  0xc2   : > { %871 = vmatpush.msrb.mxu1 %v701_v1  ;;  %794 = vmatpush.msrb.mxu2 %v632_v3  ;;  %v642_v51 = vld [vmem:[%s2259_s22 + $0x1b8] sm:$0xff] }
  0xc3   : > { %757 = vmatmul.f32.gmra.mxu2 %v2347_v5  ;;  %1688 = vmatmul.msk.f32.gmra.mxu1 %vm715_vm1, %v2354_v8  ;;  %v678_v52 = vld [vmem:[%s2259_s22 + $0x2d8] sm:$0xff] }
  0xc4   : > { %872 = vmatpush.msrb.mxu1 %v697_v6  ;;  %795 = vmatpush.msrb.mxu2 %v628_v7  ;;  %v638_v55 = vld [vmem:[%s2259_s22 + $0x198] sm:$0xff]  ;;  %v957_v7 = vld [vmem:[%s3200_s2 + $0x10] sm:$0xf] }
  0xc5   : > { %922 = vmatpush.msrb.mxu3 %v706_v29  ;;  %861 = vmatmul.f32.gmra.mxu0 %v2347_v5  ;;  %v674_v57 = vld [vmem:[%s2259_s22 + $0x2b8] sm:$0xff] }
  0xc6   : > { %873 = vmatpush.msrb.mxu1 %v693_v9  ;;  %796 = vmatpush.msrb.mxu2 %v624_v11  ;;  %v634_v58 = vld [vmem:[%s2259_s22 + $0x178] sm:$0xff] }
  0xc7   : > { %923 = vmatpush.msrb.mxu3 %v702_v33  ;;  %1884 = vset.pattern.permute.xlu1 %v1916_v45  ;;  %v670_v59 = vld [vmem:[%s2259_s22 + $0x298] sm:$0xff] }
  0xc8   : > { %874 = vmatpush.msrb.mxu1 %v689_v13  ;;  %797 = vmatpush.msrb.mxu2 %v620_v15  ;;  %v630_v60 = vld [vmem:[%s2259_s22 + $0x158] sm:$0xff]  ;;  %v1453_v13 = vld [vmem:[%s3202_s4 + $0x30] sm:$0x3] }
  0xc9   : > { %1692 = vmatmul.msk.f32.gmra.mxu3 %vm715_vm1, %v2354_v8  ;;  %1885 = vset.pattern.permute.xlu2 %v1916_v45  ;;  %v666_v61 = vld [vmem:[%s2259_s22 + $0x278] sm:$0xff]  ;;  %v1439_v45 = vld [vmem:[%s3203_s5 + $0x40] sm:$0xff] }
  0xca   : > { %875 = vmatpush.msrb.mxu1 %v685_v16  ;;  %798 = vmatpush.msrb.mxu2 %v616_v18  ;;  %v626_v62 = vld [vmem:[%s2259_s22 + $0x138] sm:$0xff]  ;;  %v1449_v16 = vld [vmem:[%s3202_s4 + $0x10] sm:$0xff] }
  0xcb   : > { %760 = vmatmul.f32.gmra.mxu2 %v2373_v20  ;;  %1689 = vmatmul.msk.f32.gmra.mxu1 %vm715_vm1, %v2382_v23  ;;  %v662_v63 = vld [vmem:[%s2259_s22 + $0x258] sm:$0xff] }
  0xcc   : > { %876 = vmatpush.msrb.mxu1 %v681_v21  ;;  %799 = vmatpush.msrb.mxu2 %v612_v22  ;;  %v1450_v0 = vld [vmem:[%s3202_s4 + $0x18] sm:$0xff] }
  0xcd   : > { %924 = vmatpush.msrb.mxu3 %v698_v37  ;;  %965 = vperm.xlu0 %1883, %v956_v54   ;;  %v622_v1 = vld [vmem:[%s2259_s22 + $0x118] sm:$0xff] }
  0xce   : > { %877 = vmatpush.msrb.mxu1 %v677_v24  ;;  %800 = vmatpush.msrb.mxu2 %v608_v26  ;;  %v658_v2 = vld [vmem:[%s2259_s22 + $0x238] sm:$0xff] }
  0xcf   : > { %925 = vmatpush.msrb.mxu3 %v694_v40  ;;  %864 = vmatmul.f32.gmra.mxu0 %v2373_v20  ;;  %v618_v3 = vld [vmem:[%s2259_s22 + $0xf8] sm:$0xff] }
  0xd0   : > { %878 = vmatpush.msrb.mxu1 %v673_v28  ;;  %801 = vmatpush.msrb.mxu2 %v604_v30  ;;  %v654_v4 = vld [vmem:[%s2259_s22 + $0x218] sm:$0xff]  ;;  %v1445_v28 = vld [vmem:[%s3203_s5 + $0x70] sm:$0xff] }
  0xd1   : > { %926 = vmatpush.msrb.mxu3 %v690_v44  ;;  %v614_v6 = vld [vmem:[%s2259_s22 + $0xd8] sm:$0xff]  ;;  %970 = vperm.xlu1 %1884, %v957_v7  }
  0xd2   : > { %879 = vmatpush.msrb.mxu1 %v669_v32  ;;  %802 = vmatpush.msrb.mxu2 %v600_v34  ;;  %v610_v9 = vld [vmem:[%s2259_s22 + $0xb8] sm:$0xff]  ;;  %v1444_v32 = vld [vmem:[%s3203_s5 + $0x68] sm:$0xff]  ;;  %v1443_v34 = vld [vmem:[%s3203_s5 + $0x60] sm:$0xff] }
  0xd3   : > { %927 = vmatpush.msrb.mxu3 %v686_v48  ;;  %v606_v11 = vld [vmem:[%s2259_s22 + $0x98] sm:$0xff] }
  0xd4   : > { %880 = vmatpush.msrb.mxu1 %v665_v35  ;;  %803 = vmatpush.msrb.mxu2 %v596_v36  ;;  %v602_v12 = vld [vmem:[%s2259_s22 + $0x78] sm:$0xff] }
  0xd5   : > { %1693 = vmatmul.msk.f32.gmra.mxu3 %vm715_vm1, %v2382_v23  ;;  %1471 = vperm.xlu0 %1883, %v1450_v0   ;;  %v598_v14 = vld [vmem:[%s2259_s22 + $0x58] sm:$0xff] }
  0xd6   : > { %881 = vmatpush.msrb.mxu1 %v661_v38  ;;  %804 = vmatpush.msrb.mxu2 %v592_v39  ;;  %v594_v15 = vld [vmem:[%s2259_s22 + $0x38] sm:$0xff]  ;;  %v1441_v39 = vld [vmem:[%s3203_s5 + $0x50] sm:$0xff] }
  0xd7   : > { %928 = vmatpush.msrb.mxu3 %v682_v50  ;;  %v1442_v35 = vld [vmem:[%s3203_s5 + $0x58] sm:$0xff] }
  0xd8   : > { %882 = vmatpush.msrb.mxu1 %v657_v41  ;;  %805 = vmatpush.msrb.mxu2 %v588_v43  ;;  %v1440_v41 = vld [vmem:[%s3203_s5 + $0x48] sm:$0xff] }
  0xd9   : > { %806 = vmatmul.f32.vlgmr.msrb.gmra.mxu2 %v2319_v53  ;;  %929 = vmatpush.msrb.mxu3 %v678_v52 }
  0xda   : > { %883 = vmatpush.msrb.mxu1 %v653_v46  ;;  %894 = vmatpush.msra.mxu2 %v650_v47 }
  0xdb   : > { %1695 = vmatmul.msk.f32.vlgmr.msrb.gmra.mxu1 %vm715_vm1, %v2326_v56  ;;  %930 = vmatpush.msrb.mxu3 %v674_v57  ;;  %v1437_v57 = vld [vmem:[%s3203_s5 + $0x30] sm:$0xff] }
  0xdc   : > { %895 = vmatpush.msra.mxu2 %v646_v49  ;;  %1486 = vperm.xlu1 %1884, %v1453_v13   ;;  %v1708_v13 = vld [vmem:[%s3201_s3 + $0x68] sm:$0x3] }
  0xdd   : > { %931 = vmatpush.msrb.mxu3 %v670_v59  ;;  %1456 = vperm.xlu0 %1883, %v1447_v10  }
  0xde   : > { %896 = vmatpush.msra.mxu2 %v642_v51  ;;  %v1438_v51 = vld [vmem:[%s3203_s5 + $0x38] sm:$0xff] }
  0xdf   : > { %932 = vmatpush.msrb.mxu3 %v666_v61  ;;  %v1436_v61 = vld [vmem:[%s3203_s5 + $0x28] sm:$0xff] }
  0xe0   : > { %897 = vmatpush.msra.mxu2 %v638_v55 }
  0xe1   : > { %809 = vmatmul.f32.gmra.mxu2 %v2347_v5  ;;  %933 = vmatpush.msrb.mxu3 %v662_v63  ;;  %v1702_v63 = vld [vmem:[%s3201_s3 + $0x38] sm:$0xff] }
  0xe2   : > { %898 = vmatpush.msra.mxu2 %v634_v58 }
  0xe3   : > { %1696 = vmatmul.msk.f32.gmra.mxu1 %vm715_vm1, %v2354_v8  ;;  %934 = vmatpush.msrb.mxu3 %v658_v2 }
  0xe4   : > { %899 = vmatpush.msra.mxu2 %v630_v60  ;;  %1466 = vperm.xlu1 %1884, %v1449_v16  }
  0xe5   : > { %935 = vmatpush.msrb.mxu3 %v654_v4  ;;  %v1435_v4 = vld [vmem:[%s3203_s5 + $0x20] sm:$0xff] }
  0xe6   : > { %900 = vmatpush.msra.mxu2 %v626_v62  ;;  %1699 = vmatmul.msk.f32.vlgmr.msrb.gmra.mxu3 %vm715_vm1, %v2326_v56  ;;  %v590_v56 = vld [vmem:[%s2259_s22 + $0x18] sm:$0xff]  ;;  %v979_v62 = vld [vmem:[%s3201_s3] sm:$0xff] }
  0xe8   : > { %901 = vmatpush.msra.mxu2 %v622_v1 }
  0xe9   : > { %812 = vmatmul.f32.gmra.mxu2 %v2373_v20 }
  0xea   : > { %902 = vmatpush.msra.mxu2 %v618_v3 }
  0xeb   : > { %1697 = vmatmul.msk.f32.gmra.mxu1 %vm715_vm1, %v2382_v23 }
  0xec   : > { %903 = vmatpush.msra.mxu2 %v614_v6  ;;  %1540 = vperm.xlu1 %1884, %v1536_v17   ;;  %v1709_v6 = vld [vmem:[%s3201_s3 + $0x70] sm:$0xff] }
  0xee   : > { %904 = vmatpush.msra.mxu2 %v610_v9  ;;  %1700 = vmatmul.msk.f32.gmra.mxu3 %vm715_vm1, %v2354_v8 }
  0xf0   : > { %905 = vmatpush.msra.mxu2 %v606_v11 }
  0xf2   : > { %906 = vmatpush.msra.mxu2 %v602_v12  ;;  %v985_v12 = vld [vmem:[%s3201_s3 + $0x30] sm:$0x3] }
  0xf4   : > { %907 = vmatpush.msra.mxu2 %v598_v14  ;;  %v1434_v14 = vld [vmem:[%s3203_s5 + $0x18] sm:$0xff] }
  0xf6   : > { %908 = vmatpush.msra.mxu2 %v594_v15  ;;  %1701 = vmatmul.msk.f32.gmra.mxu3 %vm715_vm1, %v2382_v23  ;;  %v1716_v15 = vld [vmem:[%s3201_s3 + $0xa8] sm:$0xff] }
  0xf8   : > { %909 = vmatpush.msra.mxu2 %v590_v56 }
  0xf9   : > { %910 = vmatmul.f32.vlgmr.msra.gmra.mxu2 %v2319_v53 }
 0x101   : > { %913 = vmatmul.f32.gmra.mxu2 %v2347_v5  ;;  %v1446_v5 = vld [vmem:[%s3203_s5 + $0x78] sm:$0xff] }
 0x102   : > { %1489 = vmatpush.msrb.mxu0 %v1446_v5  ;;  %1842 = vmatpush.msra.mxu3 %v1446_v5 }
 0x104   : > { %1490 = vmatpush.msrb.mxu0 %v1445_v28  ;;  %1843 = vmatpush.msra.mxu3 %v1445_v28 }
 0x106   : > { %1491 = vmatpush.msrb.mxu0 %v1444_v32  ;;  %1844 = vmatpush.msra.mxu3 %v1444_v32 }
 0x108   : > { %1492 = vmatpush.msrb.mxu0 %v1443_v34  ;;  %1845 = vmatpush.msra.mxu3 %v1443_v34 }
 0x109   : > { %916 = vmatmul.f32.gmra.mxu2 %v2373_v20 }
 0x10a   : > { %1493 = vmatpush.msrb.mxu0 %v1442_v35  ;;  %1846 = vmatpush.msra.mxu3 %v1442_v35 }
 0x10c   : > { %1494 = vmatpush.msrb.mxu0 %v1441_v39  ;;  %1847 = vmatpush.msra.mxu3 %v1441_v39 }
 0x10e   : > { %1495 = vmatpush.msrb.mxu0 %v1440_v41  ;;  %1848 = vmatpush.msra.mxu3 %v1440_v41 }
 0x110   : > { %1496 = vmatpush.msrb.mxu0 %v1439_v45  ;;  %1849 = vmatpush.msra.mxu3 %v1439_v45  ;;  %v1737_v45 = vld [vmem:[%s3201_s3 + $0x150] sm:$0xff] }
 0x112   : > { %1497 = vmatpush.msrb.mxu0 %v1438_v51  ;;  %1850 = vmatpush.msra.mxu3 %v1438_v51  ;;  %v980_v51 = vld [vmem:[%s3201_s3 + $0x8] sm:$0xff] }
 0x114   : > { %1498 = vmatpush.msrb.mxu0 %v1437_v57  ;;  %1851 = vmatpush.msra.mxu3 %v1437_v57 }
 0x116   : > { %1499 = vmatpush.msrb.mxu0 %v1436_v61  ;;  %1852 = vmatpush.msra.mxu3 %v1436_v61 }
 0x118   : > { %1500 = vmatpush.msrb.mxu0 %v1435_v4  ;;  %1853 = vmatpush.msra.mxu3 %v1435_v4  ;;  %v1751_v4 = vld [vmem:[%s3201_s3 + $0x1c0] sm:$0xff] }
 0x11a   : > { %1501 = vmatpush.msrb.mxu0 %v1434_v14  ;;  %1854 = vmatpush.msra.mxu3 %v1434_v14 }
 0x133   : > { %v961_v50 = vpop.permute.xlu0 %960 }
 0x138   : > { %v781_v21 = vpop.f32.mrf.mxu1 }
 0x13a   : > { %v859_v30 = vpop.f32.mrf.mxu0 }
 0x13e   : > { %v755_v8 = vpop.f32.mrf.mxu2 }
 0x13f   : > { %v782_v33 = vadd.f32 %v781_v21, %v755_v8  ;;  %v1433_v21 = vld [vmem:[%s3203_s5 + $0x10] sm:$0xff] }
 0x140   : > { %v833_v22 = vpop.f32.mrf.mxu3  ;;  %v784_v24 = vpop.f32.mrf.mxu1  ;;  %1502 = vmatpush.msrb.mxu0 %v1433_v21  ;;  %1855 = vmatpush.msra.mxu3 %v1433_v21  ;;  %v1710_v21 = vld [vmem:[%s3201_s3 + $0x78] sm:$0xff] }
 0x142   : > { %v862_v46 = vpop.f32.mrf.mxu0 }
 0x146   : > { %v758_v18 = vpop.f32.mrf.mxu2 }
 0x147   : > { %v785_v49 = vadd.f32 %v784_v24, %v758_v18  ;;  %v966_v18 = vpop.permute.xlu0 %965 }
 0x148   : > { %v2485_v23 = vpop.f32.mrf.mxu1 }
 0x14c   : > { %v836_v25 = vpop.f32.mrf.mxu3  ;;  %v865_v24 = vpop.f32.mrf.mxu0 }
 0x14e   : > { %v2483_v19 = vpop.f32.mrf.mxu2 }
 0x158   : > { %v2487_v27 = vpop.f32.mrf.mxu3  ;;  %v885_v31 = vpop.f32.mrf.mxu1 }
 0x159   : > { %v886_v37 = vadd.f32 %v885_v31, %v859_v30  ;;  %v1432_v30 = vld [vmem:[%s3203_s5 + $0x8] sm:$0xff]  ;;  %v1723_v31 = vld [vmem:[%s3201_s3 + $0xe0] sm:$0xff] }
 0x15a   : > { %1503 = vmatpush.msrb.mxu0 %v1432_v30  ;;  %1856 = vmatpush.msra.mxu3 %v1432_v30  ;;  %v1779_v30 = vld [vmem:[%s3201_s3 + $0x2a0] sm:$0xff] }
 0x15c   : > { %v807_v53 = vpop.f32.mrf.mxu2 }
 0x15d   : > { %v834_v29 = vadd.f32 %v833_v22, %v807_v53 }
 0x15f   : > { %v946_v36 = vmax.f32 %v782_v33, %v834_v29  ;;  %v788_v29 = vadd.f32 %v2485_v23, %v2483_v19  ;;  %v1431_v19 = vld [vmem:[%s3203_s5] sm:$0xff]  ;;  %v1730_v23 = vld [vmem:[%s3201_s3 + $0x118] sm:$0xff] }
 0x160   : > { %v888_v47 = vpop.f32.mrf.mxu1  ;;  %1504 = vmatpush.msrb.mxu0 %v1431_v19  ;;  %1857 = vmatpush.msra.mxu3 %v1431_v19  ;;  %v1757_v19 = vld [vmem:[%s3201_s3 + $0x1f0] sm:$0x3] }
 0x161   : > { %v949_v42 = vmax.f32 %v946_v36, %v886_v37  ;;  %v889_v55 = vadd.f32 %v888_v47, %v862_v46  ;;  %v1729_v47 = vld [vmem:[%s3201_s3 + $0x110] sm:$0x3] }
 0x164   : > { %v810_v26 = vpop.f32.mrf.mxu2 }
 0x165   : > { %v837_v44 = vadd.f32 %v836_v25, %v810_v26 }
 0x167   : > { %v947_v54 = vmax.f32 %v785_v49, %v837_v44 }
 0x168   : > { %v891_v25 = vpop.f32.mrf.mxu1 }
 0x169   : > { %v937_v38 = vpop.f32.mrf.mxu3  ;;  %v950_v3 = vmax.f32 %v947_v54, %v889_v55  ;;  %v1744_v55 = vld [vmem:[%s3201_s3 + $0x188] sm:$0xff] }
 0x16c   : > { %v2492_v20 = vpop.f32.mrf.mxu2 }
 0x16d   : > { %v840_v8 = vadd.f32 %v2487_v27, %v2492_v20  ;;  %v1715_v20 = vld [vmem:[%s3201_s3 + $0xa0] sm:$0x3] }
 0x16f   : > { %v948_v37 = vmax.f32 %v788_v29, %v840_v8 }
 0x171   : > { %v940_v59 = vpop.f32.mrf.mxu3 }
 0x179   : > { %v943_v35 = vpop.f32.mrf.mxu3 }
 0x17c   : > { %v911_v40 = vpop.f32.mrf.mxu2 }
 0x17d   : > { %v938_v43 = vadd.f32 %v937_v38, %v911_v40  ;;  %v892_v38 = vadd.f32 %v891_v25, %v865_v24  ;;  %v971_v24 = vpop.permute.xlu1 %970 }
 0x17f   : > { %v952_v48 = vmax.f32 %v949_v42, %v938_v43  ;;  %v1722_v43 = vld [vmem:[%s3201_s3 + $0xd8] sm:$0x3]  ;;  %v951_v54 = vmax.f32 %v948_v37, %v892_v38 }
 0x181   : > { %v973_v52 = vadd.f32 %v961_v50, %v952_v48 }
 0x183   : > { %v2521_v58 = vmax.f32 %v973_v52, 0.0  ;;  %v1703_v52 = vld [vmem:[%s3201_s3 + $0x40] sm:$0xff] }
 0x184   : > { %v914_v60 = vpop.f32.mrf.mxu2 }
 0x185   : > { %v2533_v0 = vperm.slane %v2521_v58, 0  ;;  %v2536_v1 = vperm.slane %v2521_v58, 1  ;;  %v2539_v2 = vperm.slane %v2521_v58, 2  ;;  %v2548_v7 = vperm.slane %v2521_v58, 3 }
 0x186   : > { %v941_v9 = vadd.f32 %v940_v59, %v914_v60  ;;  %v2573_v26 = vperm.slane %v2521_v58, 4  ;;  %v2588_v33 = vperm.slane %v2521_v58, 5  ;;  %v2598_v40 = vperm.slane %v2521_v58, 6 }
 0x187   : > { %v987_v10 = vmul.f32 %v2533_v0, %v979_v62  ;;  %v1003_v11 = vmul.f32 %v1702_v63, %v2536_v1  ;;  %v1026_v17 = vmul.f32 %v1709_v6, %v2539_v2  ;;  %v993_v22 = vmul.f32 %v2533_v0, %v985_v12  ;;  %v1743_v63 = vld [vmem:[%s3201_s3 + $0x180] sm:$0x3] }
 0x188   : > { %v953_v56 = vmax.f32 %v950_v3, %v941_v9  ;;  %v1009_v53 = vmul.f32 %v1708_v13, %v2536_v1  ;;  %v1049_v27 = vmul.f32 %v1716_v15, %v2548_v7  ;;  %v1032_v39 = vmul.f32 %v1715_v20, %v2539_v2  ;;  %v1750_v9 = vld [vmem:[%s3201_s3 + $0x1b8] sm:$0x3] }
 0x189   : > { %v1010_v16 = vadd.f32 %v1003_v11, %v987_v10  ;;  %v1072_v42 = vmul.f32 %v1723_v31, %v2573_v26  ;;  %v2611_v48 = vperm.slane %v2521_v58, 7  ;;  %v1095_v50 = vmul.f32 %v1730_v23, %v2588_v33  ;;  %v1736_v58 = vld [vmem:[%s3201_s3 + $0x148] sm:$0x3]  ;;  %v1786_v31 = vld [vmem:[%s3201_s3 + $0x2d8] sm:$0xff] }
 0x18a   : > { %v974_v5 = vadd.f32 %v966_v18, %v953_v56  ;;  %v1016_v32 = vadd.f32 %v1009_v53, %v993_v22  ;;  %v1055_v57 = vmul.f32 %v1722_v43, %v2548_v7  ;;  %v1118_v61 = vmul.f32 %v1737_v45, %v2598_v40 }
 0x18b   : > { %v1033_v28 = vadd.f32 %v1026_v17, %v1010_v16  ;;  %v1078_v62 = vmul.f32 %v1729_v47, %v2573_v26  ;;  %v988_v10 = vmul.f32 %v2533_v0, %v980_v51  ;;  %v1004_v11 = vmul.f32 %v1703_v52, %v2536_v1  ;;  %v1758_v17 = vld [vmem:[%s3201_s3 + $0x1f8] sm:$0xff]  ;;  %v1771_v51 = vld [vmem:[%s3201_s3 + $0x260] sm:$0x3] }
 0x18c   : > { %v917_v34 = vpop.f32.mrf.mxu2  ;;  %v977_v41 = vmax.f32 %v974_v5, 0.0  ;;  %v1039_v46 = vadd.f32 %v1032_v39, %v1016_v32  ;;  %v1141_v14 = vmul.f32 %v1744_v55, %v2611_v48  ;;  %v1101_v15 = vmul.f32 %v1736_v58, %v2588_v33  ;;  %v1765_v5 = vld [vmem:[%s3201_s3 + $0x230] sm:$0xff] }
 0x18d   : > { %v1056_v36 = vadd.f32 %v1049_v27, %v1033_v28  ;;  %v944_v44 = vadd.f32 %v943_v35, %v917_v34  ;;  %v1124_v18 = vmul.f32 %v1743_v63, %v2598_v40  ;;  %v1772_v28 = vld [vmem:[%s3201_s3 + $0x268] sm:$0xff]  ;;  %v1147_v27 = vmul.f32 %v1750_v9, %v2611_v48  ;;  %v1717_v35 = vld [vmem:[%s3201_s3 + $0xb0] sm:$0xff]  ;;  %v1731_v63 = vld [vmem:[%s3201_s3 + $0x120] sm:$0xff] }
 0x18e   : > { %v2627_v59 = vperm.slane %v977_v41, 0  ;;  %v1062_v6 = vadd.f32 %v1055_v57, %v1039_v46  ;;  %v2642_v12 = vperm.slane %v977_v41, 1  ;;  %v2646_v56 = vperm.slane %v977_v41, 2  ;;  %v1724_v46 = vld [vmem:[%s3201_s3 + $0xe8] sm:$0xff] }
 0x18f   : > { %v1079_v49 = vadd.f32 %v1072_v42, %v1056_v36  ;;  %v954_v3 = vmax.f32 %v951_v54, %v944_v44  ;;  %v2648_v16 = vperm.slane %v977_v41, 3  ;;  %v2657_v22 = vperm.slane %v977_v41, 4  ;;  %v1793_v44 = vld [vmem:[%s3201_s3 + $0x310] sm:$0xff] }
 0x190   : > { %v1085_v8 = vadd.f32 %v1078_v62, %v1062_v6  ;;  %v2659_v53 = vperm.slane %v977_v41, 5  ;;  %v1164_v25 = vmul.f32 %v1751_v4, %v2627_v59  ;;  %v1011_v34 = vadd.f32 %v1004_v11, %v988_v10  ;;  %v1785_v62 = vld [vmem:[%s3201_s3 + $0x2d0] sm:$0x3]  ;;  %v1792_v6 = vld [vmem:[%s3201_s3 + $0x308] sm:$0x3] }
 0x191   : > { %v1102_v60 = vadd.f32 %v1095_v50, %v1079_v49  ;;  %v975_v20 = vadd.f32 %v971_v24, %v954_v3  ;;  %v2678_v36 = vperm.slane %v977_v41, 6  ;;  %v2680_v37 = vperm.slane %v977_v41, 7  ;;  %v1800_v41 = vld [vmem:[%s3201_s3 + $0x348] sm:$0xff] }
 0x192   : > { %v1108_v32 = vadd.f32 %v1101_v15, %v1085_v8  ;;  %v1187_v38 = vmul.f32 %v1758_v17, %v2642_v12  ;;  %v1027_v23 = vmul.f32 %v1710_v21, %v2539_v2  ;;  %v1210_v42 = vmul.f32 %v1765_v5, %v2646_v56  ;;  %v1764_v50 = vld [vmem:[%s3201_s3 + $0x228] sm:$0x3]  ;;  %v1799_v17 = vld [vmem:[%s3201_s3 + $0x340] sm:$0x3]  ;;  %v1738_v8 = vld [vmem:[%s3201_s3 + $0x158] sm:$0xff] }
 0x193   : > { %v1125_v13 = vadd.f32 %v1118_v61, %v1102_v60  ;;  %v1233_v43 = vmul.f32 %v1772_v28, %v2648_v16  ;;  %v1256_v47 = vmul.f32 %v1779_v30, %v2657_v22  ;;  %v1279_v49 = vmul.f32 %v1786_v31, %v2659_v53  ;;  %v1778_v61 = vld [vmem:[%s3201_s3 + $0x298] sm:$0x3]  ;;  %v981_v5 = vld [vmem:[%s3201_s3 + $0x10] sm:$0xff]  ;;  %v1704_v31 = vld [vmem:[%s3201_s3 + $0x48] sm:$0xff] }
 0x194   : > { %v1131_v45 = vadd.f32 %v1124_v18, %v1108_v32  ;;  %v1034_v52 = vadd.f32 %v1027_v23, %v1011_v34  ;;  %v1050_v54 = vmul.f32 %v1717_v35, %v2548_v7  ;;  %v978_v55 = vmax.f32 %v975_v20, 0.0  ;;  %v1745_v30 = vld [vmem:[%s3201_s3 + $0x190] sm:$0xff]  ;;  %v1807_v34 = vld [vmem:[%s3201_s3 + $0x380] sm:$0xff] }
 0x195   : > { %v1148_v29 = vadd.f32 %v1141_v14, %v1125_v13  ;;  %v1170_v60 = vmul.f32 %v1757_v19, %v2627_v59  ;;  %v1302_v3 = vmul.f32 %v1793_v44, %v2678_v36  ;;  %v2719_v4 = vmul.f32 %v1800_v41, %v2680_v37  ;;  %v1752_v44 = vld [vmem:[%s3201_s3 + $0x1c8] sm:$0xff] }
 0x196   : > { %v1154_v58 = vadd.f32 %v1147_v27, %v1131_v45  ;;  %v1057_v9 = vadd.f32 %v1050_v54, %v1034_v52  ;;  %v1073_v10 = vmul.f32 %v1724_v46, %v2573_v26  ;;  %v1193_v14 = vmul.f32 %v1764_v50, %v2642_v12  ;;  %v1711_v45 = vld [vmem:[%s3201_s3 + $0x80] sm:$0xff]  ;;  %v1814_v50 = vld [vmem:[%s3201_s3 + $0x3b8] sm:$0xff] }
 0x197   : > { %v1171_v39 = vadd.f32 %v1164_v25, %v1148_v29  ;;  %v1216_v15 = vmul.f32 %v1771_v51, %v2646_v56  ;;  %v1239_v18 = vmul.f32 %v1778_v61, %v2648_v16  ;;  %v1262_v21 = vmul.f32 %v1785_v62, %v2657_v22  ;;  %v1759_v61 = vld [vmem:[%s3201_s3 + $0x200] sm:$0xff]  ;;  %v1718_v62 = vld [vmem:[%s3201_s3 + $0xb8] sm:$0xff] }
 0x198   : > { %v1177_v13 = vadd.f32 %v1170_v60, %v1154_v58  ;;  %v1080_v24 = vadd.f32 %v1073_v10, %v1057_v9  ;;  %v1096_v25 = vmul.f32 %v1731_v63, %v2588_v33  ;;  %v2739_v28 = vperm.slane %v978_v55, 0  ;;  %v1828_v63 = vld [vmem:[%s3201_s3 + $0x428] sm:$0xff] }
 0x199   : > { %v1194_v57 = vadd.f32 %v1187_v38, %v1171_v39  ;;  %v1285_v29 = vmul.f32 %v1792_v6, %v2659_v53  ;;  %v2748_v32 = vperm.slane %v978_v55, 1  ;;  %v1308_v35 = vmul.f32 %v1799_v17, %v2678_v36  ;;  %v1806_v38 = vld [vmem:[%s3201_s3 + $0x378] sm:$0x3] }
 0x19a   : > { %v1200_v20 = vadd.f32 %v1193_v14, %v1177_v13  ;;  %v1103_v19 = vadd.f32 %v1096_v25, %v1080_v24  ;;  %v1119_v23 = vmul.f32 %v1738_v8, %v2598_v40  ;;  %v2758_v39 = vperm.slane %v978_v55, 2  ;;  %v1766_v8 = vld [vmem:[%s3201_s3 + $0x238] sm:$0xff]  ;;  %v1820_v24 = vld [vmem:[%s3201_s3 + $0x3e8] sm:$0x3] }
 0x19b   : > { %v1217_v11 = vadd.f32 %v1210_v42, %v1194_v57  ;;  %v989_v41 = vmul.f32 %v2533_v0, %v981_v5  ;;  %v2767_v46 = vperm.slane %v978_v55, 3  ;;  %v1142_v52 = vmul.f32 %v1745_v30, %v2611_v48 }
 0x19c   : > { %v1126_v51 = vadd.f32 %v1119_v23, %v1103_v19  ;;  %v1005_v54 = vmul.f32 %v1704_v31, %v2536_v1  ;;  %v1348_v58 = vmul.f32 %v1807_v34, %v2739_v28  ;;  %v1331_v55 = vmul.f32 %v1806_v38, %v2680_v37  ;;  %v1773_v38 = vld [vmem:[%s3201_s3 + $0x270] sm:$0xff]  ;;  %v1732_v19 = vld [vmem:[%s3201_s3 + $0x128] sm:$0xff] }
 0x19d   : > { %v1240_v27 = vadd.f32 %v1233_v43, %v1217_v11  ;;  %v1223_v43 = vadd.f32 %v1216_v15, %v1200_v20  ;;  %v1165_v9 = vmul.f32 %v1752_v44, %v2627_v59  ;;  %v1028_v11 = vmul.f32 %v1711_v45, %v2539_v2 }
 0x19e   : > { %v1149_v6 = vadd.f32 %v1142_v52, %v1126_v51  ;;  %v1012_v10 = vadd.f32 %v1005_v54, %v989_v41  ;;  %v1371_v14 = vmul.f32 %v1814_v50, %v2748_v32  ;;  %v1188_v5 = vmul.f32 %v1759_v61, %v2642_v12  ;;  %v1780_v51 = vld [vmem:[%s3201_s3 + $0x2a8] sm:$0xff]  ;;  %v1739_v52 = vld [vmem:[%s3201_s3 + $0x160] sm:$0xff] }
 0x19f   : > { %v1263_v42 = vadd.f32 %v1256_v47, %v1240_v27  ;;  %v1821_v47 = vld [vmem:[%s3201_s3 + $0x3f0] sm:$0xff]  ;;  %v1246_v60 = vadd.f32 %v1239_v18, %v1223_v43  ;;  %v1051_v27 = vmul.f32 %v1718_v62, %v2548_v7  ;;  %v1417_v30 = vmul.f32 %v1828_v63, %v2767_v46  ;;  %v1787_v63 = vld [vmem:[%s3201_s3 + $0x2e0] sm:$0xff] }
 0x1a0   : > { %v1394_v15 = vmul.f32 %v1821_v47, %v2758_v39  ;;  %v1725_v18 = vld [vmem:[%s3201_s3 + $0xf0] sm:$0xff]  ;;  %v1172_v25 = vadd.f32 %v1165_v9, %v1149_v6  ;;  %v1377_v50 = vmul.f32 %v1820_v24, %v2748_v32  ;;  %v1097_v61 = vmul.f32 %v1732_v19, %v2588_v33 }
 0x1a1   : > { %v1286_v57 = vadd.f32 %v1279_v49, %v1263_v42  ;;  %v1813_v49 = vld [vmem:[%s3201_s3 + $0x3b0] sm:$0x3]  ;;  %v1269_v17 = vadd.f32 %v1262_v21, %v1246_v60  ;;  %v1035_v21 = vadd.f32 %v1028_v11, %v1012_v10  ;;  %v1211_v42 = vmul.f32 %v1766_v8, %v2646_v56 }
 0x1a2   : > { %v1354_v34 = vmul.f32 %v1813_v49, %v2739_v28  ;;  %v1195_v23 = vadd.f32 %v1188_v5, %v1172_v25  ;;  %v1074_v44 = vmul.f32 %v1725_v18, %v2573_v26  ;;  %v1746_v49 = vld [vmem:[%s3201_s3 + $0x198] sm:$0xff]  ;;  %v1257_v11 = vmul.f32 %v1780_v51, %v2657_v22  ;;  %v1753_v24 = vld [vmem:[%s3201_s3 + $0x1d0] sm:$0xff]  ;;  %v1808_v51 = vld [vmem:[%s3201_s3 + $0x388] sm:$0xff] }
 0x1a3   : > { %v1309_v13 = vadd.f32 %v1302_v3, %v1286_v57  ;;  %v1827_v3 = vld [vmem:[%s3201_s3 + $0x420] sm:$0x3]  ;;  %v1292_v31 = vadd.f32 %v1285_v29, %v1269_v17  ;;  %v1058_v43 = vadd.f32 %v1051_v27, %v1035_v21  ;;  %v1705_v29 = vld [vmem:[%s3201_s3 + $0x50] sm:$0xff]  ;;  %v1234_v57 = vmul.f32 %v1773_v38, %v2648_v16  ;;  %v1794_v18 = vld [vmem:[%s3201_s3 + $0x318] sm:$0xff] }
 0x1a4   : > { %v1400_v47 = vmul.f32 %v1827_v3, %v2758_v39  ;;  %v1218_v54 = vadd.f32 %v1211_v42, %v1195_v23  ;;  %v1006_v9 = vmul.f32 %v1705_v29, %v2536_v1  ;;  %v1120_v17 = vmul.f32 %v1739_v52, %v2598_v40  ;;  %v1834_v5 = vld [vmem:[%s3201_s3 + $0x458] sm:$0x3]  ;;  %v1801_v19 = vld [vmem:[%s3201_s3 + $0x350] sm:$0xff]  ;;  %v1760_v23 = vld [vmem:[%s3201_s3 + $0x208] sm:$0xff] }
 0x1a5   : > { %v1332_v20 = vadd.f32 %v2719_v4, %v1309_v13  ;;  %v982_v4 = vld [vmem:[%s3201_s3 + $0x18] sm:$0xff]  ;;  %v1315_v45 = vadd.f32 %v1308_v35, %v1292_v31  ;;  %v1081_v60 = vadd.f32 %v1074_v44, %v1058_v43  ;;  %v1712_v35 = vld [vmem:[%s3201_s3 + $0x88] sm:$0xff]  ;;  %v1280_v27 = vmul.f32 %v1787_v63, %v2659_v53  ;;  %v1767_v52 = vld [vmem:[%s3201_s3 + $0x240] sm:$0xff] }
 0x1a6   : > { %v990_v6 = vmul.f32 %v2533_v0, %v982_v4  ;;  %v1241_v10 = vadd.f32 %v1234_v57, %v1218_v54  ;;  %v1029_v25 = vmul.f32 %v1712_v35, %v2539_v2  ;;  %v1726_v31 = vld [vmem:[%s3201_s3 + $0xf8] sm:$0xff]  ;;  %v1303_v4 = vmul.f32 %v1794_v18, %v2678_v36  ;;  %v983_v63 = vld [vmem:[%s3201_s3 + $0x20] sm:$0xff] }
 0x1a7   : > { %v1355_v41 = vadd.f32 %v1348_v58, %v1332_v20  ;;  %v1338_v62 = vadd.f32 %v1331_v55, %v1315_v45  ;;  %v1104_v13 = vadd.f32 %v1097_v61, %v1081_v60  ;;  %v1719_v55 = vld [vmem:[%s3201_s3 + $0xc0] sm:$0xff]  ;;  %v1143_v20 = vmul.f32 %v1746_v49, %v2611_v48 }
 0x1a8   : > { %v1013_v3 = vadd.f32 %v1006_v9, %v990_v6  ;;  %v1264_v21 = vadd.f32 %v1257_v11, %v1241_v10  ;;  %v1052_v43 = vmul.f32 %v1719_v55, %v2548_v7  ;;  %v1075_v57 = vmul.f32 %v1726_v31, %v2573_v26  ;;  %v1774_v6 = vld [vmem:[%s3201_s3 + $0x278] sm:$0xff]  ;;  %v1452_v11 = vld [vmem:[%s3202_s4 + $0x28] sm:$0xff]  ;;  %v1829_v31 = vld [vmem:[%s3201_s3 + $0x430] sm:$0xff] }
 0x1a9   : > { %v1378_v58 = vadd.f32 %v1371_v14, %v1355_v41  ;;  %v1361_v8 = vadd.f32 %v1354_v34, %v1338_v62  ;;  %v1166_v41 = vmul.f32 %v1753_v24, %v2627_v59  ;;  %v1326_v61 = vmul.f32 %v1801_v19, %v2680_v37  ;;  %v1740_v62 = vld [vmem:[%s3201_s3 + $0x168] sm:$0xff]  ;;  %v1781_v24 = vld [vmem:[%s3201_s3 + $0x2b0] sm:$0xff]  ;;  %1481 = vperm.xlu2 %1885, %v1452_v11  }
 0x1aa   : > { %v1036_v42 = vadd.f32 %v1029_v25, %v1013_v3  ;;  %v1287_v44 = vadd.f32 %v1280_v27, %v1264_v21  ;;  %v1349_v55 = vmul.f32 %v1808_v51, %v2739_v28  ;;  %v1212_v18 = vmul.f32 %v1767_v52, %v2646_v56  ;;  %v1747_v3 = vld [vmem:[%s3201_s3 + $0x1a0] sm:$0xff]  ;;  %v1788_v19 = vld [vmem:[%s3201_s3 + $0x2e8] sm:$0xff]  ;;  %v1761_v51 = vld [vmem:[%s3201_s3 + $0x210] sm:$0xff] }
 0x1ab   : > { %v1401_v14 = vadd.f32 %v1394_v15, %v1378_v58  ;;  %v1127_v15 = vadd.f32 %v1120_v17, %v1104_v13  ;;  %v1384_v38 = vadd.f32 %v1377_v50, %v1361_v8  ;;  %v1423_v50 = vmul.f32 %v1834_v5, %v2767_v46  ;;  %v1706_v13 = vld [vmem:[%s3201_s3 + $0x58] sm:$0xff] }
 0x1ac   : > { %v1059_v54 = vadd.f32 %v1052_v43, %v1036_v42  ;;  %v1310_v60 = vadd.f32 %v1303_v4, %v1287_v44  ;;  %v1189_v58 = vmul.f32 %v1760_v23, %v2642_v12  ;;  %v1121_v21 = vmul.f32 %v1740_v62, %v2598_v40  ;;  %v1754_v23 = vld [vmem:[%s3201_s3 + $0x1d8] sm:$0xff] }
 0x1ad   : > { %v1424_v34 = vadd.f32 %v1417_v30, %v1401_v14  ;;  %v1150_v29 = vadd.f32 %v1143_v20, %v1127_v15  ;;  %v1733_v30 = vld [vmem:[%s3201_s3 + $0x130] sm:$0xff]  ;;  %v1407_v45 = vadd.f32 %v1400_v47, %v1384_v38  ;;  %v1815_v47 = vld [vmem:[%s3201_s3 + $0x3c0] sm:$0xff]  ;;  %v1822_v14 = vld [vmem:[%s3201_s3 + $0x3f8] sm:$0xff]  ;;  %v991_v27 = vmul.f32 %v2533_v0, %v983_v63 }
 0x1ae   : > { %v1082_v9 = vadd.f32 %v1075_v57, %v1059_v54  ;;  %v1098_v10 = vmul.f32 %v1733_v30, %v2588_v33  ;;  %v1333_v17 = vadd.f32 %v1326_v61, %v1310_v60  ;;  %v1372_v25 = vmul.f32 %v1815_v47, %v2748_v32  ;;  %v1713_v15 = vld [vmem:[%s3201_s3 + $0x90] sm:$0xff]  ;;  %v1768_v63 = vld [vmem:[%s3201_s3 + $0x248] sm:$0xff] }
 0x1af   : > { %1505 = vmatmul.f32.vlgmr.msrb.gmra.mxu0 %v1424_v34  ;;  %v1173_v35 = vadd.f32 %v1166_v41, %v1150_v29  ;;  %v1430_v49 = vadd.f32 %v1423_v50, %v1407_v45  ;;  %v1235_v38 = vmul.f32 %v1774_v6, %v2648_v16  ;;  %v1007_v42 = vmul.f32 %v1706_v13, %v2536_v1  ;;  %v1720_v41 = vld [vmem:[%s3201_s3 + $0xc8] sm:$0xff]  ;;  %v1795_v50 = vld [vmem:[%s3201_s3 + $0x320] sm:$0xff] }
 0x1b0   : > { %v1105_v5 = vadd.f32 %v1098_v10, %v1082_v9  ;;  %v1356_v20 = vadd.f32 %v1349_v55, %v1333_v17  ;;  %v1395_v43 = vmul.f32 %v1822_v14, %v2758_v39  ;;  %v1258_v44 = vmul.f32 %v1781_v24, %v2657_v22  ;;  %v1802_v10 = vld [vmem:[%s3201_s3 + $0x358] sm:$0xff] }
 0x1b1   : > { %v1196_v8 = vadd.f32 %v1189_v58, %v1173_v35  ;;  %1523 = vmatmul.f32.vlgmr.msra.gmra.mxu3 %v1430_v49  ;;  %v1144_v29 = vmul.f32 %v1747_v3, %v2611_v48  ;;  %v1014_v52 = vadd.f32 %v1007_v42, %v991_v27  ;;  %v1030_v54 = vmul.f32 %v1713_v15, %v2539_v2  ;;  %v1727_v35 = vld [vmem:[%s3201_s3 + $0x100] sm:$0xff]  ;;  %v1734_v17 = vld [vmem:[%s3201_s3 + $0x138] sm:$0xff]  ;;  %v984_v3 = vld [vmem:[%s3201_s3 + $0x28] sm:$0xff] }
 0x1b2   : > { %v1128_v4 = vadd.f32 %v1121_v21, %v1105_v5  ;;  %v1379_v30 = vadd.f32 %v1372_v25, %v1356_v20  ;;  %v1418_v57 = vmul.f32 %v1829_v31, %v2767_v46  ;;  %v1281_v60 = vmul.f32 %v1788_v19, %v2659_v53  ;;  %v1707_v25 = vld [vmem:[%s3201_s3 + $0x60] sm:$0xff]  ;;  %v1809_v5 = vld [vmem:[%s3201_s3 + $0x390] sm:$0xff]  ;;  %v1714_v42 = vld [vmem:[%s3201_s3 + $0x98] sm:$0xff] }
 0x1b3   : > { %v1219_v34 = vadd.f32 %v1212_v18, %v1196_v8  ;;  %v1167_v47 = vmul.f32 %v1754_v23, %v2627_v59  ;;  %v1037_v49 = vadd.f32 %v1030_v54, %v1014_v52  ;;  %v1053_v6 = vmul.f32 %v1720_v41, %v2548_v7  ;;  %v1775_v8 = vld [vmem:[%s3201_s3 + $0x280] sm:$0xff]  ;;  %v1741_v15 = vld [vmem:[%s3201_s3 + $0x170] sm:$0xff] }
 0x1b4   : > { %v1151_v61 = vadd.f32 %v1144_v29, %v1128_v4  ;;  %v1402_v58 = vadd.f32 %v1395_v43, %v1379_v30  ;;  %v1304_v9 = vmul.f32 %v1795_v50, %v2678_v36  ;;  %v1190_v13 = vmul.f32 %v1761_v51, %v2642_v12  ;;  %v1451_v23 = vld [vmem:[%s3202_s4 + $0x20] sm:$0xff]  ;;  %v1816_v43 = vld [vmem:[%s3201_s3 + $0x3c8] sm:$0xff]  ;;  %v1789_v51 = vld [vmem:[%s3201_s3 + $0x2f0] sm:$0xff] }
 0x1b5   : > { %v1242_v45 = vadd.f32 %v1235_v38, %v1219_v34  ;;  %v1060_v18 = vadd.f32 %v1053_v6, %v1037_v49  ;;  %v1076_v24 = vmul.f32 %v1727_v35, %v2573_v26  ;;  %v1213_v27 = vmul.f32 %v1768_v63, %v2646_v56  ;;  %v1782_v34 = vld [vmem:[%s3201_s3 + $0x2b8] sm:$0xff]  ;;  %v1748_v29 = vld [vmem:[%s3201_s3 + $0x1a8] sm:$0xff]  ;;  %1476 = vperm.xlu2 %1885, %v1451_v23  }
 0x1b6   : > { %v1174_v11 = vadd.f32 %v1167_v47, %v1151_v61  ;;  %v1425_v55 = vadd.f32 %v1418_v57, %v1402_v58  ;;  %v1327_v31 = vmul.f32 %v1802_v10, %v2680_v37  ;;  %v1099_v19 = vmul.f32 %v1734_v17, %v2588_v33  ;;  %v1721_v57 = vld [vmem:[%s3201_s3 + $0xd0] sm:$0xff]  ;;  %v1755_v61 = vld [vmem:[%s3201_s3 + $0x1e0] sm:$0xff]  ;;  %v1796_v63 = vld [vmem:[%s3201_s3 + $0x328] sm:$0xff] }
 0x1b7   : > { %v1265_v62 = vadd.f32 %v1258_v44, %v1242_v45  ;;  %v1083_v38 = vadd.f32 %v1076_v24, %v1060_v18  ;;  %v1236_v4 = vmul.f32 %v1775_v8, %v2648_v16  ;;  %v992_v41 = vmul.f32 %v2533_v0, %v984_v3  ;;  %v1823_v0 = vld [vmem:[%s3201_s3 + $0x400] sm:$0xff]  ;;  %v1830_v10 = vld [vmem:[%s3201_s3 + $0x438] sm:$0xff] }
 0x1b8   : > { %v1197_v21 = vadd.f32 %v1190_v13, %v1174_v11  ;;  %1508 = vmatmul.f32.gmra.mxu0 %v1425_v55  ;;  %v1008_v30 = vmul.f32 %v1707_v25, %v2536_v1  ;;  %v1350_v50 = vmul.f32 %v1809_v5, %v2739_v28  ;;  %v1122_v54 = vmul.f32 %v1741_v15, %v2598_v40  ;;  %v1762_v13 = vld [vmem:[%s3201_s3 + $0x218] sm:$0xff]  ;;  %v1803_v18 = vld [vmem:[%s3201_s3 + $0x360] sm:$0xff] }
 0x1b9   : > { %v1288_v14 = vadd.f32 %v1281_v60, %v1265_v62  ;;  %v1106_v52 = vadd.f32 %v1099_v19, %v1083_v38  ;;  %v1259_v1 = vmul.f32 %v1782_v34, %v2657_v22  ;;  %v1031_v35 = vmul.f32 %v1714_v42, %v2539_v2  ;;  %v1735_v25 = vld [vmem:[%s3201_s3 + $0x140] sm:$0xff]  ;;  %v1810_v34 = vld [vmem:[%s3201_s3 + $0x398] sm:$0xff] }
 0x1ba   : > { %v1220_v44 = vadd.f32 %v1213_v27, %v1197_v21  ;;  %v1015_v47 = vadd.f32 %v1008_v30, %v992_v41  ;;  %v1373_v62 = vmul.f32 %v1816_v43, %v2748_v32  ;;  %v1145_v6 = vmul.f32 %v1748_v29, %v2611_v48  ;;  %v1742_v23 = vld [vmem:[%s3201_s3 + $0x178] sm:$0xff]  ;;  %v1448_v29 = vld [vmem:[%s3202_s4 + $0x8] sm:$0xff]  ;;  %v1817_v30 = vld [vmem:[%s3201_s3 + $0x3d0] sm:$0xff] }
 0x1bb   : > { %v1311_v20 = vadd.f32 %v1304_v9, %v1288_v14  ;;  %v1129_v49 = vadd.f32 %v1122_v54, %v1106_v52  ;;  %v1728_v9 = vld [vmem:[%s3201_s3 + $0x108] sm:$0xff]  ;;  %v1282_v2 = vmul.f32 %v1789_v51, %v2659_v53  ;;  %v1054_v55 = vmul.f32 %v1721_v57, %v2548_v7  ;;  %v1769_v7 = vld [vmem:[%s3201_s3 + $0x250] sm:$0xff]  ;;  %v1783_v54 = vld [vmem:[%s3201_s3 + $0x2c0] sm:$0xff] }
 0x1bc   : > { %v1243_v60 = vadd.f32 %v1236_v4, %v1220_v44  ;;  %v1038_v17 = vadd.f32 %v1031_v35, %v1015_v47  ;;  %v1396_v8 = vmul.f32 %v1823_v0, %v2758_v39  ;;  %v1168_v3 = vmul.f32 %v1755_v61, %v2627_v59  ;;  %v1749_v51 = vld [vmem:[%s3201_s3 + $0x1b0] sm:$0xff]  ;;  %v1756_v47 = vld [vmem:[%s3201_s3 + $0x1e8] sm:$0xff] }
 0x1bd   : > { %v1334_v45 = vadd.f32 %v1327_v31, %v1311_v20  ;;  %v1152_v24 = vadd.f32 %v1145_v6, %v1129_v49  ;;  %v1305_v21 = vmul.f32 %v1796_v63, %v2678_v36  ;;  %v1077_v15 = vmul.f32 %v1728_v9, %v2573_v26  ;;  %v1776_v26 = vld [vmem:[%s3201_s3 + $0x288] sm:$0xff]  ;;  %1461 = vperm.xlu2 %1885, %v1448_v29   ;;  %v1831_v49 = vld [vmem:[%s3201_s3 + $0x440] sm:$0xff] }
 0x1be   : > { %v1266_v11 = vadd.f32 %v1259_v1, %v1243_v60  ;;  %v1061_v27 = vadd.f32 %v1054_v55, %v1038_v17  ;;  %v1419_v31 = vmul.f32 %v1830_v10, %v2767_v46  ;;  %v1191_v19 = vmul.f32 %v1762_v13, %v2642_v12  ;;  %v1824_v60 = vld [vmem:[%s3201_s3 + $0x408] sm:$0xff]  ;;  %v1763_v10 = vld [vmem:[%s3201_s3 + $0x220] sm:$0xff]  ;;  %v1797_v13 = vld [vmem:[%s3201_s3 + $0x330] sm:$0xff] }
 0x1bf   : > { %v1357_v58 = vadd.f32 %v1350_v50, %v1334_v45  ;;  %v1175_v38 = vadd.f32 %v1168_v3, %v1152_v24  ;;  %v1328_v43 = vmul.f32 %v1803_v18, %v2680_v37  ;;  %v1100_v4 = vmul.f32 %v1735_v25, %v2588_v33  ;;  %v1537_v55 = vld [vmem:[%s3205_s7 + $0x8] sm:$0x3]  ;;  %v1770_v18 = vld [vmem:[%s3201_s3 + $0x258] sm:$0xff] }
 0x1c0   : > { %v1289_v5 = vadd.f32 %v1282_v2, %v1266_v11  ;;  %v1084_v44 = vadd.f32 %v1077_v15, %v1061_v27  ;;  %v1214_v50 = vmul.f32 %v1769_v7, %v2646_v56  ;;  %v1351_v33 = vmul.f32 %v1810_v34, %v2739_v28  ;;  %v1804_v25 = vld [vmem:[%s3201_s3 + $0x368] sm:$0xff]  ;;  %v1777_v27 = vld [vmem:[%s3201_s3 + $0x290] sm:$0xff] }
 0x1c1   : > { %v1380_v14 = vadd.f32 %v1373_v62, %v1357_v58  ;;  %v1198_v45 = vadd.f32 %v1191_v19, %v1175_v38  ;;  %v1123_v0 = vmul.f32 %v1742_v23, %v2598_v40  ;;  %v1237_v61 = vmul.f32 %v1776_v26, %v2648_v16  ;;  %v1790_v62 = vld [vmem:[%s3201_s3 + $0x2f8] sm:$0xff] }
 0x1c2   : > { %v1312_v42 = vadd.f32 %v1305_v21, %v1289_v5  ;;  %v1107_v57 = vadd.f32 %v1100_v4, %v1084_v44  ;;  %v1374_v58 = vmul.f32 %v1817_v30, %v2748_v32  ;;  %v1146_v63 = vmul.f32 %v1749_v51, %v2611_v48  ;;  %v1818_v23 = vld [vmem:[%s3201_s3 + $0x3d8] sm:$0xff]  ;;  %v1825_v4 = vld [vmem:[%s3201_s3 + $0x410] sm:$0xff] }
 0x1c3   : > { %v1403_v20 = vadd.f32 %v1396_v8, %v1380_v14  ;;  %v1221_v1 = vadd.f32 %v1214_v50, %v1198_v45  ;;  %v1260_v9 = vmul.f32 %v1783_v54, %v2657_v22  ;;  %v1397_v2 = vmul.f32 %v1824_v60, %v2758_v39  ;;  %v1832_v50 = vld [vmem:[%s3201_s3 + $0x448] sm:$0xff] }
 0x1c4   : > { %v1335_v52 = vadd.f32 %v1328_v43, %v1312_v42  ;;  %v1130_v40 = vadd.f32 %v1123_v0, %v1107_v57  ;;  %v1169_v48 = vmul.f32 %v1756_v47, %v2627_v59  ;;  %v1283_v8 = vmul.f32 %v1790_v62, %v2659_v53 }
 0x1c5   : > { %v1426_v41 = vadd.f32 %v1419_v31, %v1403_v20  ;;  %v1244_v6 = vadd.f32 %v1237_v61, %v1221_v1  ;;  %v1420_v3 = vmul.f32 %v1831_v49, %v2767_v46  ;;  %v1192_v59 = vmul.f32 %v1763_v10, %v2642_v12  ;;  %1545 = vperm.xlu2 %1885, %v1537_v55   ;;  %v1811_v20 = vld [vmem:[%s3201_s3 + $0x3a0] sm:$0xff]  ;;  %v1784_v12 = vld [vmem:[%s3201_s3 + $0x2c8] sm:$0xff] }
 0x1c6   : > { %v1358_v35 = vadd.f32 %v1351_v33, %v1335_v52  ;;  %v1153_v17 = vadd.f32 %v1146_v63, %v1130_v40  ;;  %v1306_v7 = vmul.f32 %v1797_v13, %v2678_v36  ;;  %v1215_v34 = vmul.f32 %v1770_v18, %v2646_v56  ;;  %v1791_v56 = vld [vmem:[%s3201_s3 + $0x300] sm:$0xff]  ;;  %v1812_v61 = vld [vmem:[%s3201_s3 + $0x3a8] sm:$0xff]  ;;  %v1487_v13 = vpop.permute.xlu1 %1486 }
 0x1c7   : > { %1511 = vmatmul.f32.gmra.mxu0 %v1426_v41  ;;  %v1267_v14 = vadd.f32 %v1260_v9, %v1244_v6  ;;  %v1329_v19 = vmul.f32 %v1804_v25, %v2680_v37  ;;  %v1238_v43 = vmul.f32 %v1777_v27, %v2648_v16  ;;  %v1352_v44 = vmul.f32 %v1811_v20, %v2739_v28  ;;  %v1798_v16 = vld [vmem:[%s3201_s3 + $0x338] sm:$0xff]  ;;  %v1472_v25 = vpop.permute.xlu0 %1471 }
 0x1c8   : > { %v1381_v11 = vadd.f32 %v1374_v58, %v1358_v35  ;;  %v1176_v5 = vadd.f32 %v1169_v48, %v1153_v17  ;;  %v1261_v41 = vmul.f32 %v1784_v12, %v2657_v22  ;;  %v1375_v45 = vmul.f32 %v1818_v23, %v2748_v32  ;;  %v1805_v22 = vld [vmem:[%s3201_s3 + $0x370] sm:$0xff]  ;;  %v1819_v58 = vld [vmem:[%s3201_s3 + $0x3e0] sm:$0xff] }
 0x1c9   : > { %v1290_v21 = vadd.f32 %v1283_v8, %v1267_v14  ;;  %v1284_v52 = vmul.f32 %v1791_v56, %v2659_v53  ;;  %v1398_v54 = vmul.f32 %v1825_v4, %v2758_v39  ;;  %v1307_v0 = vmul.f32 %v1798_v16, %v2678_v36  ;;  %v1826_v36 = vld [vmem:[%s3201_s3 + $0x418] sm:$0xff] }
 0x1ca   : > { %v1404_v24 = vadd.f32 %v1397_v2, %v1381_v11  ;;  %v1199_v31 = vadd.f32 %v1192_v59, %v1176_v5  ;;  %v1421_v1 = vmul.f32 %v1832_v50, %v2767_v46  ;;  %v1330_v53 = vmul.f32 %v1805_v22, %v2680_v37  ;;  %v1833_v37 = vld [vmem:[%s3201_s3 + $0x450] sm:$0xff] }
 0x1cb   : > { %v1313_v38 = vadd.f32 %v1306_v7, %v1290_v21  ;;  %v1353_v40 = vmul.f32 %v1812_v61, %v2739_v28  ;;  %v1376_v49 = vmul.f32 %v1819_v58, %v2748_v32  ;;  %v1399_v9 = vmul.f32 %v1826_v36, %v2758_v39 }
 0x1cc   : > { %v1427_v15 = vadd.f32 %v1420_v3, %v1404_v24  ;;  %v1222_v42 = vadd.f32 %v1215_v34, %v1199_v31  ;;  %v1422_v11 = vmul.f32 %v1833_v37, %v2767_v46 }
 0x1cd   : > { %v1336_v26 = vadd.f32 %v1329_v19, %v1313_v38 }
 0x1ce   : > { %v1245_v29 = vadd.f32 %v1238_v43, %v1222_v42  ;;  %v1467_v7 = vpop.permute.xlu1 %1466  ;;  %v1534_v43 = vld [vmem:[%s3204_s6] sm:$0xff] }
 0x1cf   : > { %1514 = vmatmul.f32.gmra.mxu0 %v1427_v15  ;;  %v1359_v30 = vadd.f32 %v1352_v44, %v1336_v26  ;;  %v1457_v38 = vpop.permute.xlu0 %1456  ;;  %v1535_v26 = vld [vmem:[%s3204_s6 + $0x8] sm:$0x3] }
 0x1d0   : > { %v1268_v51 = vadd.f32 %v1261_v41, %v1245_v29 }
 0x1d1   : > { %v1382_v33 = vadd.f32 %v1375_v45, %v1359_v30 }
 0x1d2   : > { %v1291_v57 = vadd.f32 %v1284_v52, %v1268_v51 }
 0x1d3   : > { %v1405_v60 = vadd.f32 %v1398_v54, %v1382_v33 }
 0x1d4   : > { %v1314_v47 = vadd.f32 %v1307_v0, %v1291_v57 }
 0x1d5   : > { %v1428_v35 = vadd.f32 %v1421_v1, %v1405_v60 }
 0x1d6   : > { %v1337_v62 = vadd.f32 %v1330_v53, %v1314_v47  ;;  %v1541_v56 = vpop.permute.xlu1 %1540 }
 0x1d7   : > { %1517 = vmatmul.f32.gmra.mxu0 %v1428_v35 }
 0x1d8   : > { %v1360_v63 = vadd.f32 %v1353_v40, %v1337_v62 }
 0x1da   : > { %v1383_v6 = vadd.f32 %v1376_v49, %v1360_v63 }
 0x1dc   : > { %v1406_v10 = vadd.f32 %v1399_v9, %v1383_v6 }
 0x1de   : > { %v1429_v2 = vadd.f32 %v1422_v11, %v1406_v10 }
 0x1e0   : > { %1520 = vmatmul.f32.gmra.mxu0 %v1429_v2 }
 0x203   : > { %v1482_v18 = vpop.permute.xlu2 %1481 }
 0x20f   : > { %v1477_v3 = vpop.permute.xlu2 %1476 }
 0x217   : > { %v1462_v27 = vpop.permute.xlu2 %1461 }
 0x21f   : > { %v1546_v29 = vpop.permute.xlu2 %1545 }
 0x22c   : > { %v1506_v28 = vpop.f32.mrf.mxu0 }
 0x22d   : > { %v1507_v19 = vadd.f32 %v1506_v28, %v1457_v38 }
 0x22f   : > { %v1527_v42 = vmax.f32 %v1507_v19, 0.0 }
 0x234   : > { %v1524_v17 = vpop.f32.mrf.mxu3 }
 0x235   : > { %v1525_v48 = vadd.f32 %v1524_v17, %v1487_v13  ;;  %v1509_v14 = vpop.f32.mrf.mxu0 }
 0x236   : > { %v1510_v31 = vadd.f32 %v1509_v14, %v1462_v27 }
 0x237   : > { %v1533_v55 = vmax.f32 %v1525_v48, 0.0 }
 0x238   : > { %v1528_v23 = vmax.f32 %v1510_v31, 0.0 }
 0x239   : > { %1835 = vmatpush.msk.msra.mxu1 %vm725_vm0, %v1533_v55 }
 0x244   : > { %v1512_v32 = vpop.f32.mrf.mxu0 }
 0x245   : > { %v1513_v15 = vadd.f32 %v1512_v32, %v1467_v7 }
 0x247   : > { %v1529_v12 = vmax.f32 %v1513_v15, 0.0 }
 0x24c   : > { %v1515_v8 = vpop.f32.mrf.mxu0 }
 0x24d   : > { %v1516_v46 = vadd.f32 %v1515_v8, %v1472_v25 }
 0x24f   : > { %v1530_v34 = vmax.f32 %v1516_v46, 0.0 }
 0x254   : > { %v1518_v24 = vpop.f32.mrf.mxu0 }
 0x255   : > { %v1519_v5 = vadd.f32 %v1518_v24, %v1477_v3 }
 0x257   : > { %v1531_v20 = vmax.f32 %v1519_v5, 0.0 }
 0x25d   : > { %v1521_v39 = vpop.f32.mrf.mxu0 }
 0x25e   : > { %v1522_v59 = vadd.f32 %v1521_v39, %v1482_v18 }
 0x260   : > { %v1532_v21 = vmax.f32 %v1522_v59, 0.0 }
 0x262   : > { %1568 = vmatpush.msra.mxu1 %v1532_v21 }
 0x264   : > { %1569 = vmatpush.msra.mxu1 %v1531_v20 }
 0x266   : > { %1570 = vmatpush.msra.mxu1 %v1530_v34 }
 0x268   : > { %1571 = vmatpush.msra.mxu1 %v1529_v12 }
 0x26a   : > { %1572 = vmatpush.msra.mxu1 %v1528_v23 }
 0x26c   : > { %1573 = vmatpush.msra.mxu1 %v1527_v42 }
 0x26d   : > { %1836 = vmatmul.msk.f32.vlgmr.msra.gmra.mxu1 %vm1548_vm2, %v1534_v43 }
 0x275   : > { %1837 = vmatmul.msk.f32.gmra.mxu1 %vm1548_vm2, %v1535_v26 }
 0x2ea   : > { %v1575_v44 = vpop.f32.mrf.mxu1 }
 0x2eb   : > { %v1576_v4 = vadd.f32 %v1575_v44, %v1541_v56 }
 0x2ed   : > { %v1582_v45 = vsel %vm1581_vm3, %v1576_v4, -inf }
 0x2f2   : > { %v1578_v41 = vpop.f32.mrf.mxu1 }
 0x2f3   : > { %v1579_v30 = vadd.f32 %v1578_v41, %v1546_v29 }
 0x2f5   : > { %v1584_v16 = vsel %vm1583_vm4, %v1579_v30, -inf }
 0x2f6   : > { %v1585_v50 = vmax.f32 %v1582_v45, %v1584_v16 }
 0x2f8   : > { %v1586_v51 = vrot.slane %v1585_v50, 4 }
 0x2fa   : > { %v1587_v52 = vmax.f32 %v1585_v50, %v1586_v51 }
 0x2fc   : > { %v1588_v33 = vrot.slane %v1587_v52, 2 }
 0x2fe   : > { %v1589_v54 = vmax.f32 %v1587_v52, %v1588_v33 }
 0x300   : > { %v1590_v22 = vrot.slane %v1589_v54, 1 }
 0x302   : > { %v1591_v57 = vmax.f32 %v1589_v54, %v1590_v22 }
 0x304   : > { %v1592_v0 = vsub.f32 %v1576_v4, %v1591_v57  ;;  %v1593_v60 = vsub.f32 %v1579_v30, %v1591_v57 }
 0x306   : > { %v1594_v1 = vmul.f32 1.442695, %v1592_v0  ;;  %v1596_v61 = vmul.f32 1.442695, %v1593_v60 }
 0x308   : > { %1886 = vpow2.f32 %v1594_v1 }
 0x309   : > { %1888 = vpow2.f32 %v1596_v61 }
 0x30e   : > { %v1887_v47 = vpop.eup %1886 }
 0x30f   : > { %v1889_v53 = vpop.eup %1888  ;;  %v1598_v35 = vsel %vm1581_vm3, %v1887_v47, 0.0 }
 0x310   : > { %v1599_v58 = vsel %vm1583_vm4, %v1889_v53, 0.0 }
 0x311   : > { %v1600_v62 = vadd.f32 %v1599_v58, %v1598_v35 }
 0x313   : > { %v1601_v40 = vrot.slane %v1600_v62, 4 }
 0x315   : > { %v1602_v36 = vadd.f32 %v1601_v40, %v1600_v62 }
 0x317   : > { %v1603_v63 = vrot.slane %v1602_v36, 2 }
 0x319   : > { %v1604_v49 = vadd.f32 %v1603_v63, %v1602_v36 }
 0x31b   : > { %v1605_v37 = vrot.slane %v1604_v49, 1 }
 0x31d   : > { %v1606_v6 = vadd.f32 %v1605_v37, %v1604_v49 }
 0x31f   : > { %1890 = vlog2.f32 %v1606_v6 }
 0x325   : > { %v1891_v9 = vpop.eup %1890 }
 0x326   : > { %v1608_v10 = vmul.f32 0.6931472, %v1891_v9 }
 0x328   : > { %v1609_v11 = vadd.f32 %v1608_v10, %v1591_v57 }
 0x32a   : > { %v1610_v2 = vsub.f32 %v1576_v4, %v1609_v11  ;;  %v1611_v28 = vsub.f32 %v1579_v30, %v1609_v11 }
 0x32c   : > { %1612 = vst.msk [vmem:[%s580_s21] sm:$0xff] %vm1581_vm3, %v1610_v2 }
 0x32d   : > { %1613 = vst.msk [vmem:[%s580_s21 + $0x8] sm:$0x3] %vm1583_vm4, %v1611_v28 }
 0x32e PF: > { %p15_p9 = scmp.ge.s32.totalorder %s1979_s9, 4   ;;  %s3207_s27 = smov %s1910_s28 }
 0x32f   : > { %s3208_s28 = smov %s1988_s12  ;;  %s3209_s29 = smov %s1979_s9 }
 0x330   :  { %17 = sbr.rel (!%p15_p9) target bundleno = 2 (0x2), region = 129 }

</bundles_post_ra>
